<compile_context>
chip_gen: v5e
topology: v5e:2x2
jax: 0.10.0
libtpu: 0.0.40
codegen_flags: <defaults>
</compile_context>

<pallas_src>
import functools

import jax
import jax.numpy as jnp
from jax import lax
from jax.experimental import pallas as pl
from jax.experimental.pallas import tpu as pltpu


def _round_up(n, m):
    return ((n + m - 1) // m) * m


def decoder_kernel(x_ref, w1i_ref, w1h_ref, b1_ref, b2_ref, bd_ref,
                   w2i_hbm, w2h_hbm, wd_hbm,
                   out_ref,
                   g2_ref, w2i_v, w2h_v, wd_v, sem,
                   *, seq_len, d1p, d2p, out_p):
    f32 = jnp.float32
    bf16 = jnp.bfloat16

    # ---- kick off layer-2 / dense weight DMAs; they overlap phase 1 --------
    cp_w2i = pltpu.make_async_copy(w2i_hbm, w2i_v, sem.at[0])
    cp_w2h = pltpu.make_async_copy(w2h_hbm, w2h_v, sem.at[1])
    cp_wd = pltpu.make_async_copy(wd_hbm, wd_v, sem.at[2])
    cp_w2i.start()
    cp_w2h.start()
    cp_wd.start()

    # ---- phase 0: loop-invariant layer-1 input projection -------------------
    # The PyTorch module tiles x across time, so x @ W_ih^T + b is the same at
    # every step; compute it once. (1, 4*d1p) f32.
    gin1 = (jnp.dot(x_ref[...], w1i_ref[...], preferred_element_type=f32)
            + b1_ref[...])

    # ---- phase 1: layer-1 recurrence (only h @ W_hh on the critical path) ---
    # i/f/o gate weights/biases were pre-scaled by 0.5 in the wrapper, so
    # sigmoid(z) == 0.5 * tanh(z_scaled) + 0.5 : one tanh over the whole row.
    h1 = jnp.zeros((1, d1p), f32)
    c1 = jnp.zeros((1, d1p), f32)
    y1 = jnp.zeros((seq_len, d1p), f32)
    rows1 = lax.broadcasted_iota(jnp.int32, (seq_len, d1p), 0)
    for t in range(seq_len):               # static trip count -> unrolled
        z = gin1 + jnp.dot(h1.astype(bf16), w1h_ref[...],
                           preferred_element_type=f32)
        th = jnp.tanh(z)                    # single EUP pass over (1, 4*d1p)
        sg = 0.5 * th + 0.5
        i = sg[:, 0 * d1p:1 * d1p]
        f = sg[:, 1 * d1p:2 * d1p]
        g = th[:, 2 * d1p:3 * d1p]
        o = sg[:, 3 * d1p:4 * d1p]
        c1 = f * c1 + i * g                 # padded lanes stay exactly 0
        h1 = o * jnp.tanh(c1)
        # Register-resident row collect (no masked sublane stores).
        y1 = jnp.where(rows1 == t, jnp.broadcast_to(h1, (seq_len, d1p)), y1)

    # ---- phase 2: batched layer-2 input projection (one M=seq_len matmul) ---
    cp_w2i.wait()
    cp_w2h.wait()
    g2_ref[...] = (jnp.dot(y1.astype(bf16), w2i_v[...],
                           preferred_element_type=f32)
                   + b2_ref[...])           # single full-block store

    # ---- phase 3: layer-2 recurrence ----------------------------------------
    h2 = jnp.zeros((1, d2p), f32)
    c2 = jnp.zeros((1, d2p), f32)
    y2 = jnp.zeros((seq_len, d2p), f32)
    rows2 = lax.broadcasted_iota(jnp.int32, (seq_len, d2p), 0)
    for t in range(seq_len):
        z = (g2_ref[pl.ds(t, 1), :]
             + jnp.dot(h2.astype(bf16), w2h_v[...], preferred_element_type=f32))
        th = jnp.tanh(z)
        sg = 0.5 * th + 0.5
        i = sg[:, 0 * d2p:1 * d2p]
        f = sg[:, 1 * d2p:2 * d2p]
        g = th[:, 2 * d2p:3 * d2p]
        o = sg[:, 3 * d2p:4 * d2p]
        c2 = f * c2 + i * g
        h2 = o * jnp.tanh(c2)
        y2 = jnp.where(rows2 == t, jnp.broadcast_to(h2, (seq_len, d2p)), y2)

    # ---- phase 4: final dense, lane-dense (seq_len, out_p) output -----------
    cp_wd.wait()
    out_ref[...] = (jnp.dot(y2, wd_v[...], preferred_element_type=f32)
                    + bd_ref[...]).astype(out_ref.dtype)


def _pad_fold_gates(w, hid, hid_p, *, scale_ifo):
    """(rows, 4*hid) -> (rows, 4*hid_p): zero-pad each gate block to hid_p
    lanes; optionally pre-fold the 0.5 sigmoid input scale into i/f/o
    (gate order i, f, g, o — g stays unscaled)."""
    blocks = []
    for gi in range(4):
        blk = w[:, gi * hid:(gi + 1) * hid]
        if scale_ifo and gi != 2:
            blk = blk * 0.5                 # exact in f32 and bf16
        blocks.append(jnp.pad(blk, ((0, 0), (0, hid_p - hid))))
    return jnp.concatenate(blocks, axis=1)


def _pad_rows(w, rows_p):
    return jnp.pad(w, ((0, rows_p - w.shape[0]), (0, 0)))


def decoder_forward(x, params, *, seq_len, input_dim, output_dim):
    d1 = input_dim
    d2 = 2 * input_dim                      # hidden_dim
    d1p = _round_up(d1, 128)
    d2p = _round_up(d2, 128)
    out_p = _round_up(output_dim, 128)      # lane-dense output block

    (w1i, w1h, b1, w2i, w2h, b2, wd, bd) = params
    bf16 = jnp.bfloat16

    # LSTM weights: gate-pad + fold 0.5 into i/f/o + row-pad + bf16 cast
    # (f32 accumulation is kept via preferred_element_type in the kernel).
    w1i_p = _pad_rows(_pad_fold_gates(w1i, d1, d1p, scale_ifo=True), d1p).astype(bf16)
    w1h_p = _pad_rows(_pad_fold_gates(w1h, d1, d1p, scale_ifo=True), d1p).astype(bf16)
    b1_p = _pad_fold_gates(b1, d1, d1p, scale_ifo=True)             # f32
    w2i_p = _pad_rows(_pad_fold_gates(w2i, d2, d2p, scale_ifo=True), d1p).astype(bf16)
    w2h_p = _pad_rows(_pad_fold_gates(w2h, d2, d2p, scale_ifo=True), d2p).astype(bf16)
    b2_p = _pad_fold_gates(b2, d2, d2p, scale_ifo=True)             # f32

    # Dense stays f32 (one-shot matmul, negligible) and is padded to 128
    # output lanes so the final store is lane-dense.
    wd_p = jnp.pad(wd, ((0, d2p - d2), (0, out_p - output_dim)))
    bd_p = jnp.pad(bd, ((0, 0), (0, out_p - output_dim)))

    # Single (1, d1p) latent row, zero-padded lanes, bf16 matmul operand.
    x_p = jnp.pad(x.reshape(1, d1), ((0, 0), (0, d1p - d1))).astype(bf16)

    kernel = functools.partial(decoder_kernel, seq_len=seq_len,
                               d1p=d1p, d2p=d2p, out_p=out_p)

    def vmem_spec(shape):
        return pl.BlockSpec(shape, lambda i: (0,) * len(shape))

    out = pl.pallas_call(
        kernel,
        out_shape=jax.ShapeDtypeStruct((seq_len, out_p), jnp.float32),
        grid_spec=pltpu.PrefetchScalarGridSpec(
            num_scalar_prefetch=0,
            grid=(1,),
            in_specs=[
                vmem_spec((1, d1p)),                 # x (bf16)
                vmem_spec((d1p, 4 * d1p)),           # rnn1 W_ih^T (bf16)
                vmem_spec((d1p, 4 * d1p)),           # rnn1 W_hh^T (bf16)
                vmem_spec((1, 4 * d1p)),             # rnn1 bias (f32, folded)
                vmem_spec((1, 4 * d2p)),             # rnn2 bias (f32, folded)
                vmem_spec((1, out_p)),               # dense bias (f32)
                pl.BlockSpec(memory_space=pl.ANY),   # rnn2 W_ih^T (HBM, manual DMA)
                pl.BlockSpec(memory_space=pl.ANY),   # rnn2 W_hh^T (HBM, manual DMA)
                pl.BlockSpec(memory_space=pl.ANY),   # dense W      (HBM, manual DMA)
            ],
            out_specs=vmem_spec((seq_len, out_p)),
            scratch_shapes=[
                pltpu.VMEM((seq_len, 4 * d2p), jnp.float32),  # g2 (batched proj)
                pltpu.VMEM((d1p, 4 * d2p), bf16),             # w2i landing buffer
                pltpu.VMEM((d2p, 4 * d2p), bf16),             # w2h landing buffer
                pltpu.VMEM((d2p, out_p), jnp.float32),        # wd landing buffer
                pltpu.SemaphoreType.DMA((3,)),
            ],
        ),
        compiler_params=pltpu.CompilerParams(
            dimension_semantics=("arbitrary",)),
    )(x_p, w1i_p, w1h_p, b1_p, b2_p, bd_p, w2i_p, w2h_p, wd_p)
    return out[:, :output_dim]


def init_params(key, input_dim, output_dim):
    """Deterministic params matching nn.LSTM / nn.Linear shapes (pre-transposed)."""
    d1 = input_dim
    d2 = 2 * input_dim
    ks = jax.random.split(key, 10)

    def unif(k, shape, fan):
        bound = 1.0 / jnp.sqrt(jnp.float32(fan))
        return jax.random.uniform(k, shape, jnp.float32, -bound, bound)

    # rnn1: hidden = d1 (gate order i, f, g, o)
    w1i = unif(ks[0], (d1, 4 * d1), d1)          # W_ih^T
    w1h = unif(ks[1], (d1, 4 * d1), d1)          # W_hh^T
    b1 = unif(ks[2], (1, 4 * d1), d1) + unif(ks[3], (1, 4 * d1), d1)  # b_ih + b_hh
    # rnn2: hidden = d2
    w2i = unif(ks[4], (d1, 4 * d2), d2)
    w2h = unif(ks[5], (d2, 4 * d2), d2)
    b2 = unif(ks[6], (1, 4 * d2), d2) + unif(ks[7], (1, 4 * d2), d2)
    # dense
    wd = unif(ks[8], (d2, output_dim), d2)
    bd = unif(ks[9], (1, output_dim), d2)
    return (w1i, w1h, b1, w2i, w2h, b2, wd, bd)


def decoder_reference(x, params, *, seq_len, input_dim, output_dim,
                      lstm_matmul_dtype=jnp.float32):
    """Pure-JAX reference mirroring the PyTorch forward.

    With lstm_matmul_dtype=float32 this is the exact PyTorch-equivalent math;
    with bfloat16 it mirrors the kernel's matmul-operand rounding (f32 accum).
    """
    d1 = input_dim
    d2 = 2 * input_dim
    (w1i, w1h, b1, w2i, w2h, b2, wd, bd) = params
    xs = jnp.tile(x.reshape(1, d1), (seq_len, 1))
    mmdt = lstm_matmul_dtype

    def lstm(xs, w_i, w_h, b, hidden):
        def step(carry, xt):
            h, c = carry
            gates = (jnp.dot(xt.astype(mmdt), w_i.astype(mmdt),
                             preferred_element_type=jnp.float32)
                     + jnp.dot(h.astype(mmdt), w_h.astype(mmdt),
                               preferred_element_type=jnp.float32)
                     + b[0])
            i, f, g, o = jnp.split(gates, 4)
            c_new = jax.nn.sigmoid(f) * c + jax.nn.sigmoid(i) * jnp.tanh(g)
            h_new = jax.nn.sigmoid(o) * jnp.tanh(c_new)
            return (h_new, c_new), h_new
        init = (jnp.zeros((hidden,), jnp.float32),
                jnp.zeros((hidden,), jnp.float32))
        _, ys = lax.scan(step, init, xs)
        return ys

    y1 = lstm(xs, w1i, w1h, b1, d1)
    y2 = lstm(y1, w2i, w2h, b2, d2)
    return y2 @ wd + bd[0]


if __name__ == "__main__":
    SEQ_LEN = 8
    INPUT_DIM = 64   # module default
    OUTPUT_DIM = 1

    key = jax.random.PRNGKey(0)
    k_x, k_p = jax.random.split(key)
    params = init_params(k_p, INPUT_DIM, OUTPUT_DIM)
    x = jax.random.normal(k_x, (1, INPUT_DIM), jnp.float32)  # encoder latent

    out = decoder_forward(x, params, seq_len=SEQ_LEN,
                          input_dim=INPUT_DIM, output_dim=OUTPUT_DIM)
    out = jax.block_until_ready(out)
    assert out.shape == (SEQ_LEN, OUTPUT_DIM)

    # Tight check against a reference with the same bf16-operand matmul
    # numerics (verifies the kernel logic: gates, folding, padding, recurrence).
    ref_bf16 = decoder_reference(x, params, seq_len=SEQ_LEN,
                                 input_dim=INPUT_DIM, output_dim=OUTPUT_DIM,
                                 lstm_matmul_dtype=jnp.bfloat16)
    assert jnp.allclose(out, ref_bf16, atol=2e-3, rtol=2e-3), (
        float(jnp.max(jnp.abs(out - ref_bf16))))

    # Looser check against the exact f32 (PyTorch-equivalent) reference — the
    # only deviation is bf16 rounding of the LSTM matmul operands.
    ref_f32 = decoder_reference(x, params, seq_len=SEQ_LEN,
                                input_dim=INPUT_DIM, output_dim=OUTPUT_DIM,
                                lstm_matmul_dtype=jnp.float32)
    assert jnp.allclose(out, ref_f32, atol=1e-2, rtol=1e-2), (
        float(jnp.max(jnp.abs(out - ref_f32))))

    print("KERNEL_OK")
</pallas_src>

<mosaic_0001>
module attributes {stable_mosaic.version = 11 : i64} {
  func.func @decoder_kernel(%arg0: i32, %arg1: memref<1x128xbf16, #tpu.memory_space<vmem>>, %arg2: memref<128x512xbf16, #tpu.memory_space<vmem>>, %arg3: memref<128x512xbf16, #tpu.memory_space<vmem>>, %arg4: memref<1x512xf32, #tpu.memory_space<vmem>>, %arg5: memref<1x512xf32, #tpu.memory_space<vmem>>, %arg6: memref<1x128xf32, #tpu.memory_space<vmem>>, %arg7: memref<128x512xbf16, #tpu.memory_space<any>>, %arg8: memref<128x512xbf16, #tpu.memory_space<any>>, %arg9: memref<128x128xf32, #tpu.memory_space<any>>, %arg10: memref<8x128xf32, #tpu.memory_space<vmem>>, %arg11: memref<8x512xf32, #tpu.memory_space<vmem>>, %arg12: memref<128x512xbf16, #tpu.memory_space<vmem>>, %arg13: memref<128x512xbf16, #tpu.memory_space<vmem>>, %arg14: memref<128x128xf32, #tpu.memory_space<vmem>>, %arg15: memref<3x!tpu.dma_semaphore, #tpu.memory_space<semaphore_mem>>) attributes {dimension_semantics = [#tpu.dimension_semantics<arbitrary>], iteration_bounds = array<i64: 1>, scalar_prefetch = 0 : i64, scratch_operands = 5 : i64, tpu.core_type = #tpu.core_type<tc>, window_params = [{pipeline_mode = #tpu.pipeline_mode<synchronous>, transform_indices = @transform_0, window_bounds = array<i64: 1, 128>}, {pipeline_mode = #tpu.pipeline_mode<synchronous>, transform_indices = @transform_1, window_bounds = array<i64: 128, 512>}, {pipeline_mode = #tpu.pipeline_mode<synchronous>, transform_indices = @transform_2, window_bounds = array<i64: 128, 512>}, {pipeline_mode = #tpu.pipeline_mode<synchronous>, transform_indices = @transform_3, window_bounds = array<i64: 1, 512>}, {pipeline_mode = #tpu.pipeline_mode<synchronous>, transform_indices = @transform_4, window_bounds = array<i64: 1, 512>}, {pipeline_mode = #tpu.pipeline_mode<synchronous>, transform_indices = @transform_5, window_bounds = array<i64: 1, 128>}, {}, {}, {}, {pipeline_mode = #tpu.pipeline_mode<synchronous>, transform_indices = @transform_9, window_bounds = array<i64: 8, 128>}]} {
    %c0_i32 = arith.constant 0 : i32
    %0 = tpu.memref_slice %arg15[%c0_i32] : memref<3x!tpu.dma_semaphore, #tpu.memory_space<semaphore_mem>> -> memref<1x!tpu.dma_semaphore, #tpu.memory_space<semaphore_mem>>
    %1 = tpu.memref_squeeze %0 : memref<1x!tpu.dma_semaphore, #tpu.memory_space<semaphore_mem>> -> memref<!tpu.dma_semaphore, #tpu.memory_space<semaphore_mem>>
    tpu.enqueue_dma source(%arg7 : memref<128x512xbf16, #tpu.memory_space<any>>) target(%arg12 : memref<128x512xbf16, #tpu.memory_space<vmem>>) target_semaphore(%1 : memref<!tpu.dma_semaphore, #tpu.memory_space<semaphore_mem>>)
    %c1_i32 = arith.constant 1 : i32
    %2 = tpu.memref_slice %arg15[%c1_i32] : memref<3x!tpu.dma_semaphore, #tpu.memory_space<semaphore_mem>> -> memref<1x!tpu.dma_semaphore, #tpu.memory_space<semaphore_mem>>
    %3 = tpu.memref_squeeze %2 : memref<1x!tpu.dma_semaphore, #tpu.memory_space<semaphore_mem>> -> memref<!tpu.dma_semaphore, #tpu.memory_space<semaphore_mem>>
    tpu.enqueue_dma source(%arg8 : memref<128x512xbf16, #tpu.memory_space<any>>) target(%arg13 : memref<128x512xbf16, #tpu.memory_space<vmem>>) target_semaphore(%3 : memref<!tpu.dma_semaphore, #tpu.memory_space<semaphore_mem>>)
    %c2_i32 = arith.constant 2 : i32
    %4 = tpu.memref_slice %arg15[%c2_i32] : memref<3x!tpu.dma_semaphore, #tpu.memory_space<semaphore_mem>> -> memref<1x!tpu.dma_semaphore, #tpu.memory_space<semaphore_mem>>
    %5 = tpu.memref_squeeze %4 : memref<1x!tpu.dma_semaphore, #tpu.memory_space<semaphore_mem>> -> memref<!tpu.dma_semaphore, #tpu.memory_space<semaphore_mem>>
    tpu.enqueue_dma source(%arg9 : memref<128x128xf32, #tpu.memory_space<any>>) target(%arg14 : memref<128x128xf32, #tpu.memory_space<vmem>>) target_semaphore(%5 : memref<!tpu.dma_semaphore, #tpu.memory_space<semaphore_mem>>)
    %c0 = arith.constant 0 : index
    %c0_0 = arith.constant 0 : index
    %6 = vector.load %arg1[%c0, %c0_0] : memref<1x128xbf16, #tpu.memory_space<vmem>>, vector<1x128xbf16>
    %c0_1 = arith.constant 0 : index
    %c0_2 = arith.constant 0 : index
    %7 = vector.load %arg2[%c0_1, %c0_2] : memref<128x512xbf16, #tpu.memory_space<vmem>>, vector<128x512xbf16>
    %cst = arith.constant dense<0.000000e+00> : vector<1x512xf32>
    %8 = tpu.matmul %6, %7, %cst {dimension_numbers = #tpu.dot_dimension_numbers<[1], [0], [0], [1], [0, 0, 1, 1], [], []>} : vector<1x128xbf16>, vector<128x512xbf16>, vector<1x512xf32> -> vector<1x512xf32>
    %c0_3 = arith.constant 0 : index
    %c0_4 = arith.constant 0 : index
    %9 = vector.load %arg4[%c0_3, %c0_4] : memref<1x512xf32, #tpu.memory_space<vmem>>, vector<1x512xf32>
    %10 = arith.addf %8, %9 : vector<1x512xf32>
    %cst_5 = arith.constant 0.000000e+00 : f32
    %11 = vector.broadcast %cst_5 : f32 to vector<1x128xf32>
    %cst_6 = arith.constant 0.000000e+00 : f32
    %12 = vector.broadcast %cst_6 : f32 to vector<1x128xf32>
    %cst_7 = arith.constant 0.000000e+00 : f32
    %13 = vector.broadcast %cst_7 : f32 to vector<8x128xf32>
    %14 = tpu.iota {dimensions = array<i32: 0>} : vector<8x128xi32>
    %15 = arith.truncf %11 : vector<1x128xf32> to vector<1x128xbf16>
    %c0_8 = arith.constant 0 : index
    %c0_9 = arith.constant 0 : index
    %16 = vector.load %arg3[%c0_8, %c0_9] : memref<128x512xbf16, #tpu.memory_space<vmem>>, vector<128x512xbf16>
    %cst_10 = arith.constant dense<0.000000e+00> : vector<1x512xf32>
    %17 = tpu.matmul %15, %16, %cst_10 {dimension_numbers = #tpu.dot_dimension_numbers<[1], [0], [0], [1], [0, 0, 1, 1], [], []>} : vector<1x128xbf16>, vector<128x512xbf16>, vector<1x512xf32> -> vector<1x512xf32>
    %18 = arith.addf %10, %17 : vector<1x512xf32>
    %19 = math.tanh %18 : vector<1x512xf32>
    %cst_11 = arith.constant 5.000000e-01 : f32
    %20 = vector.broadcast %cst_11 : f32 to vector<1x512xf32>
    %21 = arith.mulf %20, %19 : vector<1x512xf32>
    %cst_12 = arith.constant 5.000000e-01 : f32
    %22 = vector.broadcast %cst_12 : f32 to vector<1x512xf32>
    %23 = arith.addf %21, %22 : vector<1x512xf32>
    %24 = vector.extract_strided_slice %23 {offsets = [0, 0], sizes = [1, 128], strides = [1, 1]} : vector<1x512xf32> to vector<1x128xf32>
    %25 = vector.extract_strided_slice %23 {offsets = [0, 128], sizes = [1, 128], strides = [1, 1]} : vector<1x512xf32> to vector<1x128xf32>
    %26 = vector.extract_strided_slice %19 {offsets = [0, 256], sizes = [1, 128], strides = [1, 1]} : vector<1x512xf32> to vector<1x128xf32>
    %27 = vector.extract_strided_slice %23 {offsets = [0, 384], sizes = [1, 128], strides = [1, 1]} : vector<1x512xf32> to vector<1x128xf32>
    %28 = arith.mulf %25, %12 : vector<1x128xf32>
    %29 = arith.mulf %24, %26 : vector<1x128xf32>
    %30 = arith.addf %28, %29 : vector<1x128xf32>
    %31 = math.tanh %30 : vector<1x128xf32>
    %32 = arith.mulf %27, %31 : vector<1x128xf32>
    %c0_i32_13 = arith.constant 0 : i32
    %33 = vector.broadcast %c0_i32_13 : i32 to vector<8x128xi32>
    %34 = arith.cmpi eq, %14, %33 : vector<8x128xi32>
    %35 = vector.shape_cast %32 : vector<1x128xf32> to vector<1x128xf32>
    %36 = vector.broadcast %35 : vector<1x128xf32> to vector<8x128xf32>
    %37 = arith.select %34, %36, %13 : vector<8x128xi1>, vector<8x128xf32>
    %38 = arith.truncf %32 : vector<1x128xf32> to vector<1x128xbf16>
    %c0_14 = arith.constant 0 : index
    %c0_15 = arith.constant 0 : index
    %39 = vector.load %arg3[%c0_14, %c0_15] : memref<128x512xbf16, #tpu.memory_space<vmem>>, vector<128x512xbf16>
    %cst_16 = arith.constant dense<0.000000e+00> : vector<1x512xf32>
    %40 = tpu.matmul %38, %39, %cst_16 {dimension_numbers = #tpu.dot_dimension_numbers<[1], [0], [0], [1], [0, 0, 1, 1], [], []>} : vector<1x128xbf16>, vector<128x512xbf16>, vector<1x512xf32> -> vector<1x512xf32>
    %41 = arith.addf %10, %40 : vector<1x512xf32>
    %42 = math.tanh %41 : vector<1x512xf32>
    %cst_17 = arith.constant 5.000000e-01 : f32
    %43 = vector.broadcast %cst_17 : f32 to vector<1x512xf32>
    %44 = arith.mulf %43, %42 : vector<1x512xf32>
    %cst_18 = arith.constant 5.000000e-01 : f32
    %45 = vector.broadcast %cst_18 : f32 to vector<1x512xf32>
    %46 = arith.addf %44, %45 : vector<1x512xf32>
    %47 = vector.extract_strided_slice %46 {offsets = [0, 0], sizes = [1, 128], strides = [1, 1]} : vector<1x512xf32> to vector<1x128xf32>
    %48 = vector.extract_strided_slice %46 {offsets = [0, 128], sizes = [1, 128], strides = [1, 1]} : vector<1x512xf32> to vector<1x128xf32>
    %49 = vector.extract_strided_slice %42 {offsets = [0, 256], sizes = [1, 128], strides = [1, 1]} : vector<1x512xf32> to vector<1x128xf32>
    %50 = vector.extract_strided_slice %46 {offsets = [0, 384], sizes = [1, 128], strides = [1, 1]} : vector<1x512xf32> to vector<1x128xf32>
    %51 = arith.mulf %48, %30 : vector<1x128xf32>
    %52 = arith.mulf %47, %49 : vector<1x128xf32>
    %53 = arith.addf %51, %52 : vector<1x128xf32>
    %54 = math.tanh %53 : vector<1x128xf32>
    %55 = arith.mulf %50, %54 : vector<1x128xf32>
    %c1_i32_19 = arith.constant 1 : i32
    %56 = vector.broadcast %c1_i32_19 : i32 to vector<8x128xi32>
    %57 = arith.cmpi eq, %14, %56 : vector<8x128xi32>
    %58 = vector.shape_cast %55 : vector<1x128xf32> to vector<1x128xf32>
    %59 = vector.broadcast %58 : vector<1x128xf32> to vector<8x128xf32>
    %60 = arith.select %57, %59, %37 : vector<8x128xi1>, vector<8x128xf32>
    %61 = arith.truncf %55 : vector<1x128xf32> to vector<1x128xbf16>
    %c0_20 = arith.constant 0 : index
    %c0_21 = arith.constant 0 : index
    %62 = vector.load %arg3[%c0_20, %c0_21] : memref<128x512xbf16, #tpu.memory_space<vmem>>, vector<128x512xbf16>
    %cst_22 = arith.constant dense<0.000000e+00> : vector<1x512xf32>
    %63 = tpu.matmul %61, %62, %cst_22 {dimension_numbers = #tpu.dot_dimension_numbers<[1], [0], [0], [1], [0, 0, 1, 1], [], []>} : vector<1x128xbf16>, vector<128x512xbf16>, vector<1x512xf32> -> vector<1x512xf32>
    %64 = arith.addf %10, %63 : vector<1x512xf32>
    %65 = math.tanh %64 : vector<1x512xf32>
    %cst_23 = arith.constant 5.000000e-01 : f32
    %66 = vector.broadcast %cst_23 : f32 to vector<1x512xf32>
    %67 = arith.mulf %66, %65 : vector<1x512xf32>
    %cst_24 = arith.constant 5.000000e-01 : f32
    %68 = vector.broadcast %cst_24 : f32 to vector<1x512xf32>
    %69 = arith.addf %67, %68 : vector<1x512xf32>
    %70 = vector.extract_strided_slice %69 {offsets = [0, 0], sizes = [1, 128], strides = [1, 1]} : vector<1x512xf32> to vector<1x128xf32>
    %71 = vector.extract_strided_slice %69 {offsets = [0, 128], sizes = [1, 128], strides = [1, 1]} : vector<1x512xf32> to vector<1x128xf32>
    %72 = vector.extract_strided_slice %65 {offsets = [0, 256], sizes = [1, 128], strides = [1, 1]} : vector<1x512xf32> to vector<1x128xf32>
    %73 = vector.extract_strided_slice %69 {offsets = [0, 384], sizes = [1, 128], strides = [1, 1]} : vector<1x512xf32> to vector<1x128xf32>
    %74 = arith.mulf %71, %53 : vector<1x128xf32>
    %75 = arith.mulf %70, %72 : vector<1x128xf32>
    %76 = arith.addf %74, %75 : vector<1x128xf32>
    %77 = math.tanh %76 : vector<1x128xf32>
    %78 = arith.mulf %73, %77 : vector<1x128xf32>
    %c2_i32_25 = arith.constant 2 : i32
    %79 = vector.broadcast %c2_i32_25 : i32 to vector<8x128xi32>
    %80 = arith.cmpi eq, %14, %79 : vector<8x128xi32>
    %81 = vector.shape_cast %78 : vector<1x128xf32> to vector<1x128xf32>
    %82 = vector.broadcast %81 : vector<1x128xf32> to vector<8x128xf32>
    %83 = arith.select %80, %82, %60 : vector<8x128xi1>, vector<8x128xf32>
    %84 = arith.truncf %78 : vector<1x128xf32> to vector<1x128xbf16>
    %c0_26 = arith.constant 0 : index
    %c0_27 = arith.constant 0 : index
    %85 = vector.load %arg3[%c0_26, %c0_27] : memref<128x512xbf16, #tpu.memory_space<vmem>>, vector<128x512xbf16>
    %cst_28 = arith.constant dense<0.000000e+00> : vector<1x512xf32>
    %86 = tpu.matmul %84, %85, %cst_28 {dimension_numbers = #tpu.dot_dimension_numbers<[1], [0], [0], [1], [0, 0, 1, 1], [], []>} : vector<1x128xbf16>, vector<128x512xbf16>, vector<1x512xf32> -> vector<1x512xf32>
    %87 = arith.addf %10, %86 : vector<1x512xf32>
    %88 = math.tanh %87 : vector<1x512xf32>
    %cst_29 = arith.constant 5.000000e-01 : f32
    %89 = vector.broadcast %cst_29 : f32 to vector<1x512xf32>
    %90 = arith.mulf %89, %88 : vector<1x512xf32>
    %cst_30 = arith.constant 5.000000e-01 : f32
    %91 = vector.broadcast %cst_30 : f32 to vector<1x512xf32>
    %92 = arith.addf %90, %91 : vector<1x512xf32>
    %93 = vector.extract_strided_slice %92 {offsets = [0, 0], sizes = [1, 128], strides = [1, 1]} : vector<1x512xf32> to vector<1x128xf32>
    %94 = vector.extract_strided_slice %92 {offsets = [0, 128], sizes = [1, 128], strides = [1, 1]} : vector<1x512xf32> to vector<1x128xf32>
    %95 = vector.extract_strided_slice %88 {offsets = [0, 256], sizes = [1, 128], strides = [1, 1]} : vector<1x512xf32> to vector<1x128xf32>
    %96 = vector.extract_strided_slice %92 {offsets = [0, 384], sizes = [1, 128], strides = [1, 1]} : vector<1x512xf32> to vector<1x128xf32>
    %97 = arith.mulf %94, %76 : vector<1x128xf32>
    %98 = arith.mulf %93, %95 : vector<1x128xf32>
    %99 = arith.addf %97, %98 : vector<1x128xf32>
    %100 = math.tanh %99 : vector<1x128xf32>
    %101 = arith.mulf %96, %100 : vector<1x128xf32>
    %c3_i32 = arith.constant 3 : i32
    %102 = vector.broadcast %c3_i32 : i32 to vector<8x128xi32>
    %103 = arith.cmpi eq, %14, %102 : vector<8x128xi32>
    %104 = vector.shape_cast %101 : vector<1x128xf32> to vector<1x128xf32>
    %105 = vector.broadcast %104 : vector<1x128xf32> to vector<8x128xf32>
    %106 = arith.select %103, %105, %83 : vector<8x128xi1>, vector<8x128xf32>
    %107 = arith.truncf %101 : vector<1x128xf32> to vector<1x128xbf16>
    %c0_31 = arith.constant 0 : index
    %c0_32 = arith.constant 0 : index
    %108 = vector.load %arg3[%c0_31, %c0_32] : memref<128x512xbf16, #tpu.memory_space<vmem>>, vector<128x512xbf16>
    %cst_33 = arith.constant dense<0.000000e+00> : vector<1x512xf32>
    %109 = tpu.matmul %107, %108, %cst_33 {dimension_numbers = #tpu.dot_dimension_numbers<[1], [0], [0], [1], [0, 0, 1, 1], [], []>} : vector<1x128xbf16>, vector<128x512xbf16>, vector<1x512xf32> -> vector<1x512xf32>
    %110 = arith.addf %10, %109 : vector<1x512xf32>
    %111 = math.tanh %110 : vector<1x512xf32>
    %cst_34 = arith.constant 5.000000e-01 : f32
    %112 = vector.broadcast %cst_34 : f32 to vector<1x512xf32>
    %113 = arith.mulf %112, %111 : vector<1x512xf32>
    %cst_35 = arith.constant 5.000000e-01 : f32
    %114 = vector.broadcast %cst_35 : f32 to vector<1x512xf32>
    %115 = arith.addf %113, %114 : vector<1x512xf32>
    %116 = vector.extract_strided_slice %115 {offsets = [0, 0], sizes = [1, 128], strides = [1, 1]} : vector<1x512xf32> to vector<1x128xf32>
    %117 = vector.extract_strided_slice %115 {offsets = [0, 128], sizes = [1, 128], strides = [1, 1]} : vector<1x512xf32> to vector<1x128xf32>
    %118 = vector.extract_strided_slice %111 {offsets = [0, 256], sizes = [1, 128], strides = [1, 1]} : vector<1x512xf32> to vector<1x128xf32>
    %119 = vector.extract_strided_slice %115 {offsets = [0, 384], sizes = [1, 128], strides = [1, 1]} : vector<1x512xf32> to vector<1x128xf32>
    %120 = arith.mulf %117, %99 : vector<1x128xf32>
    %121 = arith.mulf %116, %118 : vector<1x128xf32>
    %122 = arith.addf %120, %121 : vector<1x128xf32>
    %123 = math.tanh %122 : vector<1x128xf32>
    %124 = arith.mulf %119, %123 : vector<1x128xf32>
    %c4_i32 = arith.constant 4 : i32
    %125 = vector.broadcast %c4_i32 : i32 to vector<8x128xi32>
    %126 = arith.cmpi eq, %14, %125 : vector<8x128xi32>
    %127 = vector.shape_cast %124 : vector<1x128xf32> to vector<1x128xf32>
    %128 = vector.broadcast %127 : vector<1x128xf32> to vector<8x128xf32>
    %129 = arith.select %126, %128, %106 : vector<8x128xi1>, vector<8x128xf32>
    %130 = arith.truncf %124 : vector<1x128xf32> to vector<1x128xbf16>
    %c0_36 = arith.constant 0 : index
    %c0_37 = arith.constant 0 : index
    %131 = vector.load %arg3[%c0_36, %c0_37] : memref<128x512xbf16, #tpu.memory_space<vmem>>, vector<128x512xbf16>
    %cst_38 = arith.constant dense<0.000000e+00> : vector<1x512xf32>
    %132 = tpu.matmul %130, %131, %cst_38 {dimension_numbers = #tpu.dot_dimension_numbers<[1], [0], [0], [1], [0, 0, 1, 1], [], []>} : vector<1x128xbf16>, vector<128x512xbf16>, vector<1x512xf32> -> vector<1x512xf32>
    %133 = arith.addf %10, %132 : vector<1x512xf32>
    %134 = math.tanh %133 : vector<1x512xf32>
    %cst_39 = arith.constant 5.000000e-01 : f32
    %135 = vector.broadcast %cst_39 : f32 to vector<1x512xf32>
    %136 = arith.mulf %135, %134 : vector<1x512xf32>
    %cst_40 = arith.constant 5.000000e-01 : f32
    %137 = vector.broadcast %cst_40 : f32 to vector<1x512xf32>
    %138 = arith.addf %136, %137 : vector<1x512xf32>
    %139 = vector.extract_strided_slice %138 {offsets = [0, 0], sizes = [1, 128], strides = [1, 1]} : vector<1x512xf32> to vector<1x128xf32>
    %140 = vector.extract_strided_slice %138 {offsets = [0, 128], sizes = [1, 128], strides = [1, 1]} : vector<1x512xf32> to vector<1x128xf32>
    %141 = vector.extract_strided_slice %134 {offsets = [0, 256], sizes = [1, 128], strides = [1, 1]} : vector<1x512xf32> to vector<1x128xf32>
    %142 = vector.extract_strided_slice %138 {offsets = [0, 384], sizes = [1, 128], strides = [1, 1]} : vector<1x512xf32> to vector<1x128xf32>
    %143 = arith.mulf %140, %122 : vector<1x128xf32>
    %144 = arith.mulf %139, %141 : vector<1x128xf32>
    %145 = arith.addf %143, %144 : vector<1x128xf32>
    %146 = math.tanh %145 : vector<1x128xf32>
    %147 = arith.mulf %142, %146 : vector<1x128xf32>
    %c5_i32 = arith.constant 5 : i32
    %148 = vector.broadcast %c5_i32 : i32 to vector<8x128xi32>
    %149 = arith.cmpi eq, %14, %148 : vector<8x128xi32>
    %150 = vector.shape_cast %147 : vector<1x128xf32> to vector<1x128xf32>
    %151 = vector.broadcast %150 : vector<1x128xf32> to vector<8x128xf32>
    %152 = arith.select %149, %151, %129 : vector<8x128xi1>, vector<8x128xf32>
    %153 = arith.truncf %147 : vector<1x128xf32> to vector<1x128xbf16>
    %c0_41 = arith.constant 0 : index
    %c0_42 = arith.constant 0 : index
    %154 = vector.load %arg3[%c0_41, %c0_42] : memref<128x512xbf16, #tpu.memory_space<vmem>>, vector<128x512xbf16>
    %cst_43 = arith.constant dense<0.000000e+00> : vector<1x512xf32>
    %155 = tpu.matmul %153, %154, %cst_43 {dimension_numbers = #tpu.dot_dimension_numbers<[1], [0], [0], [1], [0, 0, 1, 1], [], []>} : vector<1x128xbf16>, vector<128x512xbf16>, vector<1x512xf32> -> vector<1x512xf32>
    %156 = arith.addf %10, %155 : vector<1x512xf32>
    %157 = math.tanh %156 : vector<1x512xf32>
    %cst_44 = arith.constant 5.000000e-01 : f32
    %158 = vector.broadcast %cst_44 : f32 to vector<1x512xf32>
    %159 = arith.mulf %158, %157 : vector<1x512xf32>
    %cst_45 = arith.constant 5.000000e-01 : f32
    %160 = vector.broadcast %cst_45 : f32 to vector<1x512xf32>
    %161 = arith.addf %159, %160 : vector<1x512xf32>
    %162 = vector.extract_strided_slice %161 {offsets = [0, 0], sizes = [1, 128], strides = [1, 1]} : vector<1x512xf32> to vector<1x128xf32>
    %163 = vector.extract_strided_slice %161 {offsets = [0, 128], sizes = [1, 128], strides = [1, 1]} : vector<1x512xf32> to vector<1x128xf32>
    %164 = vector.extract_strided_slice %157 {offsets = [0, 256], sizes = [1, 128], strides = [1, 1]} : vector<1x512xf32> to vector<1x128xf32>
    %165 = vector.extract_strided_slice %161 {offsets = [0, 384], sizes = [1, 128], strides = [1, 1]} : vector<1x512xf32> to vector<1x128xf32>
    %166 = arith.mulf %163, %145 : vector<1x128xf32>
    %167 = arith.mulf %162, %164 : vector<1x128xf32>
    %168 = arith.addf %166, %167 : vector<1x128xf32>
    %169 = math.tanh %168 : vector<1x128xf32>
    %170 = arith.mulf %165, %169 : vector<1x128xf32>
    %c6_i32 = arith.constant 6 : i32
    %171 = vector.broadcast %c6_i32 : i32 to vector<8x128xi32>
    %172 = arith.cmpi eq, %14, %171 : vector<8x128xi32>
    %173 = vector.shape_cast %170 : vector<1x128xf32> to vector<1x128xf32>
    %174 = vector.broadcast %173 : vector<1x128xf32> to vector<8x128xf32>
    %175 = arith.select %172, %174, %152 : vector<8x128xi1>, vector<8x128xf32>
    %176 = arith.truncf %170 : vector<1x128xf32> to vector<1x128xbf16>
    %c0_46 = arith.constant 0 : index
    %c0_47 = arith.constant 0 : index
    %177 = vector.load %arg3[%c0_46, %c0_47] : memref<128x512xbf16, #tpu.memory_space<vmem>>, vector<128x512xbf16>
    %cst_48 = arith.constant dense<0.000000e+00> : vector<1x512xf32>
    %178 = tpu.matmul %176, %177, %cst_48 {dimension_numbers = #tpu.dot_dimension_numbers<[1], [0], [0], [1], [0, 0, 1, 1], [], []>} : vector<1x128xbf16>, vector<128x512xbf16>, vector<1x512xf32> -> vector<1x512xf32>
    %179 = arith.addf %10, %178 : vector<1x512xf32>
    %180 = math.tanh %179 : vector<1x512xf32>
    %cst_49 = arith.constant 5.000000e-01 : f32
    %181 = vector.broadcast %cst_49 : f32 to vector<1x512xf32>
    %182 = arith.mulf %181, %180 : vector<1x512xf32>
    %cst_50 = arith.constant 5.000000e-01 : f32
    %183 = vector.broadcast %cst_50 : f32 to vector<1x512xf32>
    %184 = arith.addf %182, %183 : vector<1x512xf32>
    %185 = vector.extract_strided_slice %184 {offsets = [0, 0], sizes = [1, 128], strides = [1, 1]} : vector<1x512xf32> to vector<1x128xf32>
    %186 = vector.extract_strided_slice %184 {offsets = [0, 128], sizes = [1, 128], strides = [1, 1]} : vector<1x512xf32> to vector<1x128xf32>
    %187 = vector.extract_strided_slice %180 {offsets = [0, 256], sizes = [1, 128], strides = [1, 1]} : vector<1x512xf32> to vector<1x128xf32>
    %188 = vector.extract_strided_slice %184 {offsets = [0, 384], sizes = [1, 128], strides = [1, 1]} : vector<1x512xf32> to vector<1x128xf32>
    %189 = arith.mulf %186, %168 : vector<1x128xf32>
    %190 = arith.mulf %185, %187 : vector<1x128xf32>
    %191 = arith.addf %189, %190 : vector<1x128xf32>
    %192 = math.tanh %191 : vector<1x128xf32>
    %193 = arith.mulf %188, %192 : vector<1x128xf32>
    %c7_i32 = arith.constant 7 : i32
    %194 = vector.broadcast %c7_i32 : i32 to vector<8x128xi32>
    %195 = arith.cmpi eq, %14, %194 : vector<8x128xi32>
    %196 = vector.shape_cast %193 : vector<1x128xf32> to vector<1x128xf32>
    %197 = vector.broadcast %196 : vector<1x128xf32> to vector<8x128xf32>
    %198 = arith.select %195, %197, %175 : vector<8x128xi1>, vector<8x128xf32>
    %c0_i32_51 = arith.constant 0 : i32
    %199 = tpu.memref_slice %arg15[%c0_i32_51] : memref<3x!tpu.dma_semaphore, #tpu.memory_space<semaphore_mem>> -> memref<1x!tpu.dma_semaphore, #tpu.memory_space<semaphore_mem>>
    %200 = tpu.memref_squeeze %199 : memref<1x!tpu.dma_semaphore, #tpu.memory_space<semaphore_mem>> -> memref<!tpu.dma_semaphore, #tpu.memory_space<semaphore_mem>>
    tpu.wait_dma2 semaphore(%200 : memref<!tpu.dma_semaphore, #tpu.memory_space<semaphore_mem>>) src(%arg7 : memref<128x512xbf16, #tpu.memory_space<any>>) dst(%arg12 : memref<128x512xbf16, #tpu.memory_space<vmem>>)
    %c1_i32_52 = arith.constant 1 : i32
    %201 = tpu.memref_slice %arg15[%c1_i32_52] : memref<3x!tpu.dma_semaphore, #tpu.memory_space<semaphore_mem>> -> memref<1x!tpu.dma_semaphore, #tpu.memory_space<semaphore_mem>>
    %202 = tpu.memref_squeeze %201 : memref<1x!tpu.dma_semaphore, #tpu.memory_space<semaphore_mem>> -> memref<!tpu.dma_semaphore, #tpu.memory_space<semaphore_mem>>
    tpu.wait_dma2 semaphore(%202 : memref<!tpu.dma_semaphore, #tpu.memory_space<semaphore_mem>>) src(%arg8 : memref<128x512xbf16, #tpu.memory_space<any>>) dst(%arg13 : memref<128x512xbf16, #tpu.memory_space<vmem>>)
    %203 = arith.truncf %198 : vector<8x128xf32> to vector<8x128xbf16>
    %c0_53 = arith.constant 0 : index
    %c0_54 = arith.constant 0 : index
    %204 = vector.load %arg12[%c0_53, %c0_54] : memref<128x512xbf16, #tpu.memory_space<vmem>>, vector<128x512xbf16>
    %cst_55 = arith.constant dense<0.000000e+00> : vector<8x512xf32>
    %205 = tpu.matmul %203, %204, %cst_55 {dimension_numbers = #tpu.dot_dimension_numbers<[1], [0], [0], [1], [0, 0, 1, 1], [], []>} : vector<8x128xbf16>, vector<128x512xbf16>, vector<8x512xf32> -> vector<8x512xf32>
    %c0_56 = arith.constant 0 : index
    %c0_57 = arith.constant 0 : index
    %206 = vector.load %arg5[%c0_56, %c0_57] : memref<1x512xf32, #tpu.memory_space<vmem>>, vector<1x512xf32>
    %207 = vector.broadcast %206 : vector<1x512xf32> to vector<8x512xf32>
    %208 = arith.addf %205, %207 : vector<8x512xf32>
    %c0_58 = arith.constant 0 : index
    %c0_59 = arith.constant 0 : index
    %209 = vector.load %arg11[%c0_58, %c0_59] : memref<8x512xf32, #tpu.memory_space<vmem>>, vector<8x512xf32>
    tpu.vector_store %arg11[%c0_58, %c0_59], %208 {strides = array<i32>} : memref<8x512xf32, #tpu.memory_space<vmem>>, vector<8x512xf32>,
    %cst_60 = arith.constant 0.000000e+00 : f32
    %210 = vector.broadcast %cst_60 : f32 to vector<1x128xf32>
    %cst_61 = arith.constant 0.000000e+00 : f32
    %211 = vector.broadcast %cst_61 : f32 to vector<1x128xf32>
    %cst_62 = arith.constant 0.000000e+00 : f32
    %212 = vector.broadcast %cst_62 : f32 to vector<8x128xf32>
    %213 = tpu.iota {dimensions = array<i32: 0>} : vector<8x128xi32>
    %c0_63 = arith.constant 0 : index
    %c0_64 = arith.constant 0 : index
    %214 = vector.load %arg11[%c0_63, %c0_64] : memref<8x512xf32, #tpu.memory_space<vmem>>, vector<1x512xf32>
    %215 = arith.truncf %210 : vector<1x128xf32> to vector<1x128xbf16>
    %c0_65 = arith.constant 0 : index
    %c0_66 = arith.constant 0 : index
    %216 = vector.load %arg13[%c0_65, %c0_66] : memref<128x512xbf16, #tpu.memory_space<vmem>>, vector<128x512xbf16>
    %cst_67 = arith.constant dense<0.000000e+00> : vector<1x512xf32>
    %217 = tpu.matmul %215, %216, %cst_67 {dimension_numbers = #tpu.dot_dimension_numbers<[1], [0], [0], [1], [0, 0, 1, 1], [], []>} : vector<1x128xbf16>, vector<128x512xbf16>, vector<1x512xf32> -> vector<1x512xf32>
    %218 = arith.addf %214, %217 : vector<1x512xf32>
    %219 = math.tanh %218 : vector<1x512xf32>
    %cst_68 = arith.constant 5.000000e-01 : f32
    %220 = vector.broadcast %cst_68 : f32 to vector<1x512xf32>
    %221 = arith.mulf %220, %219 : vector<1x512xf32>
    %cst_69 = arith.constant 5.000000e-01 : f32
    %222 = vector.broadcast %cst_69 : f32 to vector<1x512xf32>
    %223 = arith.addf %221, %222 : vector<1x512xf32>
    %224 = vector.extract_strided_slice %223 {offsets = [0, 0], sizes = [1, 128], strides = [1, 1]} : vector<1x512xf32> to vector<1x128xf32>
    %225 = vector.extract_strided_slice %223 {offsets = [0, 128], sizes = [1, 128], strides = [1, 1]} : vector<1x512xf32> to vector<1x128xf32>
    %226 = vector.extract_strided_slice %219 {offsets = [0, 256], sizes = [1, 128], strides = [1, 1]} : vector<1x512xf32> to vector<1x128xf32>
    %227 = vector.extract_strided_slice %223 {offsets = [0, 384], sizes = [1, 128], strides = [1, 1]} : vector<1x512xf32> to vector<1x128xf32>
    %228 = arith.mulf %225, %211 : vector<1x128xf32>
    %229 = arith.mulf %224, %226 : vector<1x128xf32>
    %230 = arith.addf %228, %229 : vector<1x128xf32>
    %231 = math.tanh %230 : vector<1x128xf32>
    %232 = arith.mulf %227, %231 : vector<1x128xf32>
    %c0_i32_70 = arith.constant 0 : i32
    %233 = vector.broadcast %c0_i32_70 : i32 to vector<8x128xi32>
    %234 = arith.cmpi eq, %213, %233 : vector<8x128xi32>
    %235 = vector.shape_cast %232 : vector<1x128xf32> to vector<1x128xf32>
    %236 = vector.broadcast %235 : vector<1x128xf32> to vector<8x128xf32>
    %237 = arith.select %234, %236, %212 : vector<8x128xi1>, vector<8x128xf32>
    %c1 = arith.constant 1 : index
    %c0_71 = arith.constant 0 : index
    %238 = vector.load %arg11[%c1, %c0_71] : memref<8x512xf32, #tpu.memory_space<vmem>>, vector<1x512xf32>
    %239 = arith.truncf %232 : vector<1x128xf32> to vector<1x128xbf16>
    %c0_72 = arith.constant 0 : index
    %c0_73 = arith.constant 0 : index
    %240 = vector.load %arg13[%c0_72, %c0_73] : memref<128x512xbf16, #tpu.memory_space<vmem>>, vector<128x512xbf16>
    %cst_74 = arith.constant dense<0.000000e+00> : vector<1x512xf32>
    %241 = tpu.matmul %239, %240, %cst_74 {dimension_numbers = #tpu.dot_dimension_numbers<[1], [0], [0], [1], [0, 0, 1, 1], [], []>} : vector<1x128xbf16>, vector<128x512xbf16>, vector<1x512xf32> -> vector<1x512xf32>
    %242 = arith.addf %238, %241 : vector<1x512xf32>
    %243 = math.tanh %242 : vector<1x512xf32>
    %cst_75 = arith.constant 5.000000e-01 : f32
    %244 = vector.broadcast %cst_75 : f32 to vector<1x512xf32>
    %245 = arith.mulf %244, %243 : vector<1x512xf32>
    %cst_76 = arith.constant 5.000000e-01 : f32
    %246 = vector.broadcast %cst_76 : f32 to vector<1x512xf32>
    %247 = arith.addf %245, %246 : vector<1x512xf32>
    %248 = vector.extract_strided_slice %247 {offsets = [0, 0], sizes = [1, 128], strides = [1, 1]} : vector<1x512xf32> to vector<1x128xf32>
    %249 = vector.extract_strided_slice %247 {offsets = [0, 128], sizes = [1, 128], strides = [1, 1]} : vector<1x512xf32> to vector<1x128xf32>
    %250 = vector.extract_strided_slice %243 {offsets = [0, 256], sizes = [1, 128], strides = [1, 1]} : vector<1x512xf32> to vector<1x128xf32>
    %251 = vector.extract_strided_slice %247 {offsets = [0, 384], sizes = [1, 128], strides = [1, 1]} : vector<1x512xf32> to vector<1x128xf32>
    %252 = arith.mulf %249, %230 : vector<1x128xf32>
    %253 = arith.mulf %248, %250 : vector<1x128xf32>
    %254 = arith.addf %252, %253 : vector<1x128xf32>
    %255 = math.tanh %254 : vector<1x128xf32>
    %256 = arith.mulf %251, %255 : vector<1x128xf32>
    %c1_i32_77 = arith.constant 1 : i32
    %257 = vector.broadcast %c1_i32_77 : i32 to vector<8x128xi32>
    %258 = arith.cmpi eq, %213, %257 : vector<8x128xi32>
    %259 = vector.shape_cast %256 : vector<1x128xf32> to vector<1x128xf32>
    %260 = vector.broadcast %259 : vector<1x128xf32> to vector<8x128xf32>
    %261 = arith.select %258, %260, %237 : vector<8x128xi1>, vector<8x128xf32>
    %c2 = arith.constant 2 : index
    %c0_78 = arith.constant 0 : index
    %262 = vector.load %arg11[%c2, %c0_78] : memref<8x512xf32, #tpu.memory_space<vmem>>, vector<1x512xf32>
    %263 = arith.truncf %256 : vector<1x128xf32> to vector<1x128xbf16>
    %c0_79 = arith.constant 0 : index
    %c0_80 = arith.constant 0 : index
    %264 = vector.load %arg13[%c0_79, %c0_80] : memref<128x512xbf16, #tpu.memory_space<vmem>>, vector<128x512xbf16>
    %cst_81 = arith.constant dense<0.000000e+00> : vector<1x512xf32>
    %265 = tpu.matmul %263, %264, %cst_81 {dimension_numbers = #tpu.dot_dimension_numbers<[1], [0], [0], [1], [0, 0, 1, 1], [], []>} : vector<1x128xbf16>, vector<128x512xbf16>, vector<1x512xf32> -> vector<1x512xf32>
    %266 = arith.addf %262, %265 : vector<1x512xf32>
    %267 = math.tanh %266 : vector<1x512xf32>
    %cst_82 = arith.constant 5.000000e-01 : f32
    %268 = vector.broadcast %cst_82 : f32 to vector<1x512xf32>
    %269 = arith.mulf %268, %267 : vector<1x512xf32>
    %cst_83 = arith.constant 5.000000e-01 : f32
    %270 = vector.broadcast %cst_83 : f32 to vector<1x512xf32>
    %271 = arith.addf %269, %270 : vector<1x512xf32>
    %272 = vector.extract_strided_slice %271 {offsets = [0, 0], sizes = [1, 128], strides = [1, 1]} : vector<1x512xf32> to vector<1x128xf32>
    %273 = vector.extract_strided_slice %271 {offsets = [0, 128], sizes = [1, 128], strides = [1, 1]} : vector<1x512xf32> to vector<1x128xf32>
    %274 = vector.extract_strided_slice %267 {offsets = [0, 256], sizes = [1, 128], strides = [1, 1]} : vector<1x512xf32> to vector<1x128xf32>
    %275 = vector.extract_strided_slice %271 {offsets = [0, 384], sizes = [1, 128], strides = [1, 1]} : vector<1x512xf32> to vector<1x128xf32>
    %276 = arith.mulf %273, %254 : vector<1x128xf32>
    %277 = arith.mulf %272, %274 : vector<1x128xf32>
    %278 = arith.addf %276, %277 : vector<1x128xf32>
    %279 = math.tanh %278 : vector<1x128xf32>
    %280 = arith.mulf %275, %279 : vector<1x128xf32>
    %c2_i32_84 = arith.constant 2 : i32
    %281 = vector.broadcast %c2_i32_84 : i32 to vector<8x128xi32>
    %282 = arith.cmpi eq, %213, %281 : vector<8x128xi32>
    %283 = vector.shape_cast %280 : vector<1x128xf32> to vector<1x128xf32>
    %284 = vector.broadcast %283 : vector<1x128xf32> to vector<8x128xf32>
    %285 = arith.select %282, %284, %261 : vector<8x128xi1>, vector<8x128xf32>
    %c3 = arith.constant 3 : index
    %c0_85 = arith.constant 0 : index
    %286 = vector.load %arg11[%c3, %c0_85] : memref<8x512xf32, #tpu.memory_space<vmem>>, vector<1x512xf32>
    %287 = arith.truncf %280 : vector<1x128xf32> to vector<1x128xbf16>
    %c0_86 = arith.constant 0 : index
    %c0_87 = arith.constant 0 : index
    %288 = vector.load %arg13[%c0_86, %c0_87] : memref<128x512xbf16, #tpu.memory_space<vmem>>, vector<128x512xbf16>
    %cst_88 = arith.constant dense<0.000000e+00> : vector<1x512xf32>
    %289 = tpu.matmul %287, %288, %cst_88 {dimension_numbers = #tpu.dot_dimension_numbers<[1], [0], [0], [1], [0, 0, 1, 1], [], []>} : vector<1x128xbf16>, vector<128x512xbf16>, vector<1x512xf32> -> vector<1x512xf32>
    %290 = arith.addf %286, %289 : vector<1x512xf32>
    %291 = math.tanh %290 : vector<1x512xf32>
    %cst_89 = arith.constant 5.000000e-01 : f32
    %292 = vector.broadcast %cst_89 : f32 to vector<1x512xf32>
    %293 = arith.mulf %292, %291 : vector<1x512xf32>
    %cst_90 = arith.constant 5.000000e-01 : f32
    %294 = vector.broadcast %cst_90 : f32 to vector<1x512xf32>
    %295 = arith.addf %293, %294 : vector<1x512xf32>
    %296 = vector.extract_strided_slice %295 {offsets = [0, 0], sizes = [1, 128], strides = [1, 1]} : vector<1x512xf32> to vector<1x128xf32>
    %297 = vector.extract_strided_slice %295 {offsets = [0, 128], sizes = [1, 128], strides = [1, 1]} : vector<1x512xf32> to vector<1x128xf32>
    %298 = vector.extract_strided_slice %291 {offsets = [0, 256], sizes = [1, 128], strides = [1, 1]} : vector<1x512xf32> to vector<1x128xf32>
    %299 = vector.extract_strided_slice %295 {offsets = [0, 384], sizes = [1, 128], strides = [1, 1]} : vector<1x512xf32> to vector<1x128xf32>
    %300 = arith.mulf %297, %278 : vector<1x128xf32>
    %301 = arith.mulf %296, %298 : vector<1x128xf32>
    %302 = arith.addf %300, %301 : vector<1x128xf32>
    %303 = math.tanh %302 : vector<1x128xf32>
    %304 = arith.mulf %299, %303 : vector<1x128xf32>
    %c3_i32_91 = arith.constant 3 : i32
    %305 = vector.broadcast %c3_i32_91 : i32 to vector<8x128xi32>
    %306 = arith.cmpi eq, %213, %305 : vector<8x128xi32>
    %307 = vector.shape_cast %304 : vector<1x128xf32> to vector<1x128xf32>
    %308 = vector.broadcast %307 : vector<1x128xf32> to vector<8x128xf32>
    %309 = arith.select %306, %308, %285 : vector<8x128xi1>, vector<8x128xf32>
    %c4 = arith.constant 4 : index
    %c0_92 = arith.constant 0 : index
    %310 = vector.load %arg11[%c4, %c0_92] : memref<8x512xf32, #tpu.memory_space<vmem>>, vector<1x512xf32>
    %311 = arith.truncf %304 : vector<1x128xf32> to vector<1x128xbf16>
    %c0_93 = arith.constant 0 : index
    %c0_94 = arith.constant 0 : index
    %312 = vector.load %arg13[%c0_93, %c0_94] : memref<128x512xbf16, #tpu.memory_space<vmem>>, vector<128x512xbf16>
    %cst_95 = arith.constant dense<0.000000e+00> : vector<1x512xf32>
    %313 = tpu.matmul %311, %312, %cst_95 {dimension_numbers = #tpu.dot_dimension_numbers<[1], [0], [0], [1], [0, 0, 1, 1], [], []>} : vector<1x128xbf16>, vector<128x512xbf16>, vector<1x512xf32> -> vector<1x512xf32>
    %314 = arith.addf %310, %313 : vector<1x512xf32>
    %315 = math.tanh %314 : vector<1x512xf32>
    %cst_96 = arith.constant 5.000000e-01 : f32
    %316 = vector.broadcast %cst_96 : f32 to vector<1x512xf32>
    %317 = arith.mulf %316, %315 : vector<1x512xf32>
    %cst_97 = arith.constant 5.000000e-01 : f32
    %318 = vector.broadcast %cst_97 : f32 to vector<1x512xf32>
    %319 = arith.addf %317, %318 : vector<1x512xf32>
    %320 = vector.extract_strided_slice %319 {offsets = [0, 0], sizes = [1, 128], strides = [1, 1]} : vector<1x512xf32> to vector<1x128xf32>
    %321 = vector.extract_strided_slice %319 {offsets = [0, 128], sizes = [1, 128], strides = [1, 1]} : vector<1x512xf32> to vector<1x128xf32>
    %322 = vector.extract_strided_slice %315 {offsets = [0, 256], sizes = [1, 128], strides = [1, 1]} : vector<1x512xf32> to vector<1x128xf32>
    %323 = vector.extract_strided_slice %319 {offsets = [0, 384], sizes = [1, 128], strides = [1, 1]} : vector<1x512xf32> to vector<1x128xf32>
    %324 = arith.mulf %321, %302 : vector<1x128xf32>
    %325 = arith.mulf %320, %322 : vector<1x128xf32>
    %326 = arith.addf %324, %325 : vector<1x128xf32>
    %327 = math.tanh %326 : vector<1x128xf32>
    %328 = arith.mulf %323, %327 : vector<1x128xf32>
    %c4_i32_98 = arith.constant 4 : i32
    %329 = vector.broadcast %c4_i32_98 : i32 to vector<8x128xi32>
    %330 = arith.cmpi eq, %213, %329 : vector<8x128xi32>
    %331 = vector.shape_cast %328 : vector<1x128xf32> to vector<1x128xf32>
    %332 = vector.broadcast %331 : vector<1x128xf32> to vector<8x128xf32>
    %333 = arith.select %330, %332, %309 : vector<8x128xi1>, vector<8x128xf32>
    %c5 = arith.constant 5 : index
    %c0_99 = arith.constant 0 : index
    %334 = vector.load %arg11[%c5, %c0_99] : memref<8x512xf32, #tpu.memory_space<vmem>>, vector<1x512xf32>
    %335 = arith.truncf %328 : vector<1x128xf32> to vector<1x128xbf16>
    %c0_100 = arith.constant 0 : index
    %c0_101 = arith.constant 0 : index
    %336 = vector.load %arg13[%c0_100, %c0_101] : memref<128x512xbf16, #tpu.memory_space<vmem>>, vector<128x512xbf16>
    %cst_102 = arith.constant dense<0.000000e+00> : vector<1x512xf32>
    %337 = tpu.matmul %335, %336, %cst_102 {dimension_numbers = #tpu.dot_dimension_numbers<[1], [0], [0], [1], [0, 0, 1, 1], [], []>} : vector<1x128xbf16>, vector<128x512xbf16>, vector<1x512xf32> -> vector<1x512xf32>
    %338 = arith.addf %334, %337 : vector<1x512xf32>
    %339 = math.tanh %338 : vector<1x512xf32>
    %cst_103 = arith.constant 5.000000e-01 : f32
    %340 = vector.broadcast %cst_103 : f32 to vector<1x512xf32>
    %341 = arith.mulf %340, %339 : vector<1x512xf32>
    %cst_104 = arith.constant 5.000000e-01 : f32
    %342 = vector.broadcast %cst_104 : f32 to vector<1x512xf32>
    %343 = arith.addf %341, %342 : vector<1x512xf32>
    %344 = vector.extract_strided_slice %343 {offsets = [0, 0], sizes = [1, 128], strides = [1, 1]} : vector<1x512xf32> to vector<1x128xf32>
    %345 = vector.extract_strided_slice %343 {offsets = [0, 128], sizes = [1, 128], strides = [1, 1]} : vector<1x512xf32> to vector<1x128xf32>
    %346 = vector.extract_strided_slice %339 {offsets = [0, 256], sizes = [1, 128], strides = [1, 1]} : vector<1x512xf32> to vector<1x128xf32>
    %347 = vector.extract_strided_slice %343 {offsets = [0, 384], sizes = [1, 128], strides = [1, 1]} : vector<1x512xf32> to vector<1x128xf32>
    %348 = arith.mulf %345, %326 : vector<1x128xf32>
    %349 = arith.mulf %344, %346 : vector<1x128xf32>
    %350 = arith.addf %348, %349 : vector<1x128xf32>
    %351 = math.tanh %350 : vector<1x128xf32>
    %352 = arith.mulf %347, %351 : vector<1x128xf32>
    %c5_i32_105 = arith.constant 5 : i32
    %353 = vector.broadcast %c5_i32_105 : i32 to vector<8x128xi32>
    %354 = arith.cmpi eq, %213, %353 : vector<8x128xi32>
    %355 = vector.shape_cast %352 : vector<1x128xf32> to vector<1x128xf32>
    %356 = vector.broadcast %355 : vector<1x128xf32> to vector<8x128xf32>
    %357 = arith.select %354, %356, %333 : vector<8x128xi1>, vector<8x128xf32>
    %c6 = arith.constant 6 : index
    %c0_106 = arith.constant 0 : index
    %358 = vector.load %arg11[%c6, %c0_106] : memref<8x512xf32, #tpu.memory_space<vmem>>, vector<1x512xf32>
    %359 = arith.truncf %352 : vector<1x128xf32> to vector<1x128xbf16>
    %c0_107 = arith.constant 0 : index
    %c0_108 = arith.constant 0 : index
    %360 = vector.load %arg13[%c0_107, %c0_108] : memref<128x512xbf16, #tpu.memory_space<vmem>>, vector<128x512xbf16>
    %cst_109 = arith.constant dense<0.000000e+00> : vector<1x512xf32>
    %361 = tpu.matmul %359, %360, %cst_109 {dimension_numbers = #tpu.dot_dimension_numbers<[1], [0], [0], [1], [0, 0, 1, 1], [], []>} : vector<1x128xbf16>, vector<128x512xbf16>, vector<1x512xf32> -> vector<1x512xf32>
    %362 = arith.addf %358, %361 : vector<1x512xf32>
    %363 = math.tanh %362 : vector<1x512xf32>
    %cst_110 = arith.constant 5.000000e-01 : f32
    %364 = vector.broadcast %cst_110 : f32 to vector<1x512xf32>
    %365 = arith.mulf %364, %363 : vector<1x512xf32>
    %cst_111 = arith.constant 5.000000e-01 : f32
    %366 = vector.broadcast %cst_111 : f32 to vector<1x512xf32>
    %367 = arith.addf %365, %366 : vector<1x512xf32>
    %368 = vector.extract_strided_slice %367 {offsets = [0, 0], sizes = [1, 128], strides = [1, 1]} : vector<1x512xf32> to vector<1x128xf32>
    %369 = vector.extract_strided_slice %367 {offsets = [0, 128], sizes = [1, 128], strides = [1, 1]} : vector<1x512xf32> to vector<1x128xf32>
    %370 = vector.extract_strided_slice %363 {offsets = [0, 256], sizes = [1, 128], strides = [1, 1]} : vector<1x512xf32> to vector<1x128xf32>
    %371 = vector.extract_strided_slice %367 {offsets = [0, 384], sizes = [1, 128], strides = [1, 1]} : vector<1x512xf32> to vector<1x128xf32>
    %372 = arith.mulf %369, %350 : vector<1x128xf32>
    %373 = arith.mulf %368, %370 : vector<1x128xf32>
    %374 = arith.addf %372, %373 : vector<1x128xf32>
    %375 = math.tanh %374 : vector<1x128xf32>
    %376 = arith.mulf %371, %375 : vector<1x128xf32>
    %c6_i32_112 = arith.constant 6 : i32
    %377 = vector.broadcast %c6_i32_112 : i32 to vector<8x128xi32>
    %378 = arith.cmpi eq, %213, %377 : vector<8x128xi32>
    %379 = vector.shape_cast %376 : vector<1x128xf32> to vector<1x128xf32>
    %380 = vector.broadcast %379 : vector<1x128xf32> to vector<8x128xf32>
    %381 = arith.select %378, %380, %357 : vector<8x128xi1>, vector<8x128xf32>
    %c7 = arith.constant 7 : index
    %c0_113 = arith.constant 0 : index
    %382 = vector.load %arg11[%c7, %c0_113] : memref<8x512xf32, #tpu.memory_space<vmem>>, vector<1x512xf32>
    %383 = arith.truncf %376 : vector<1x128xf32> to vector<1x128xbf16>
    %c0_114 = arith.constant 0 : index
    %c0_115 = arith.constant 0 : index
    %384 = vector.load %arg13[%c0_114, %c0_115] : memref<128x512xbf16, #tpu.memory_space<vmem>>, vector<128x512xbf16>
    %cst_116 = arith.constant dense<0.000000e+00> : vector<1x512xf32>
    %385 = tpu.matmul %383, %384, %cst_116 {dimension_numbers = #tpu.dot_dimension_numbers<[1], [0], [0], [1], [0, 0, 1, 1], [], []>} : vector<1x128xbf16>, vector<128x512xbf16>, vector<1x512xf32> -> vector<1x512xf32>
    %386 = arith.addf %382, %385 : vector<1x512xf32>
    %387 = math.tanh %386 : vector<1x512xf32>
    %cst_117 = arith.constant 5.000000e-01 : f32
    %388 = vector.broadcast %cst_117 : f32 to vector<1x512xf32>
    %389 = arith.mulf %388, %387 : vector<1x512xf32>
    %cst_118 = arith.constant 5.000000e-01 : f32
    %390 = vector.broadcast %cst_118 : f32 to vector<1x512xf32>
    %391 = arith.addf %389, %390 : vector<1x512xf32>
    %392 = vector.extract_strided_slice %391 {offsets = [0, 0], sizes = [1, 128], strides = [1, 1]} : vector<1x512xf32> to vector<1x128xf32>
    %393 = vector.extract_strided_slice %391 {offsets = [0, 128], sizes = [1, 128], strides = [1, 1]} : vector<1x512xf32> to vector<1x128xf32>
    %394 = vector.extract_strided_slice %387 {offsets = [0, 256], sizes = [1, 128], strides = [1, 1]} : vector<1x512xf32> to vector<1x128xf32>
    %395 = vector.extract_strided_slice %391 {offsets = [0, 384], sizes = [1, 128], strides = [1, 1]} : vector<1x512xf32> to vector<1x128xf32>
    %396 = arith.mulf %393, %374 : vector<1x128xf32>
    %397 = arith.mulf %392, %394 : vector<1x128xf32>
    %398 = arith.addf %396, %397 : vector<1x128xf32>
    %399 = math.tanh %398 : vector<1x128xf32>
    %400 = arith.mulf %395, %399 : vector<1x128xf32>
    %c7_i32_119 = arith.constant 7 : i32
    %401 = vector.broadcast %c7_i32_119 : i32 to vector<8x128xi32>
    %402 = arith.cmpi eq, %213, %401 : vector<8x128xi32>
    %403 = vector.shape_cast %400 : vector<1x128xf32> to vector<1x128xf32>
    %404 = vector.broadcast %403 : vector<1x128xf32> to vector<8x128xf32>
    %405 = arith.select %402, %404, %381 : vector<8x128xi1>, vector<8x128xf32>
    %c2_i32_120 = arith.constant 2 : i32
    %406 = tpu.memref_slice %arg15[%c2_i32_120] : memref<3x!tpu.dma_semaphore, #tpu.memory_space<semaphore_mem>> -> memref<1x!tpu.dma_semaphore, #tpu.memory_space<semaphore_mem>>
    %407 = tpu.memref_squeeze %406 : memref<1x!tpu.dma_semaphore, #tpu.memory_space<semaphore_mem>> -> memref<!tpu.dma_semaphore, #tpu.memory_space<semaphore_mem>>
    tpu.wait_dma2 semaphore(%407 : memref<!tpu.dma_semaphore, #tpu.memory_space<semaphore_mem>>) src(%arg9 : memref<128x128xf32, #tpu.memory_space<any>>) dst(%arg14 : memref<128x128xf32, #tpu.memory_space<vmem>>)
    %c0_121 = arith.constant 0 : index
    %c0_122 = arith.constant 0 : index
    %408 = vector.load %arg14[%c0_121, %c0_122] : memref<128x128xf32, #tpu.memory_space<vmem>>, vector<128x128xf32>
    %cst_123 = arith.constant dense<0.000000e+00> : vector<8x128xf32>
    %409 = tpu.matmul %405, %408, %cst_123 {dimension_numbers = #tpu.dot_dimension_numbers<[1], [0], [0], [1], [0, 0, 1, 1], [], []>} : vector<8x128xf32>, vector<128x128xf32>, vector<8x128xf32> -> vector<8x128xf32>
    %c0_124 = arith.constant 0 : index
    %c0_125 = arith.constant 0 : index
    %410 = vector.load %arg6[%c0_124, %c0_125] : memref<1x128xf32, #tpu.memory_space<vmem>>, vector<1x128xf32>
    %411 = vector.broadcast %410 : vector<1x128xf32> to vector<8x128xf32>
    %412 = arith.addf %409, %411 : vector<8x128xf32>
    %c0_126 = arith.constant 0 : index
    %c0_127 = arith.constant 0 : index
    %413 = vector.load %arg10[%c0_126, %c0_127] : memref<8x128xf32, #tpu.memory_space<vmem>>, vector<8x128xf32>
    tpu.vector_store %arg10[%c0_126, %c0_127], %412 {strides = array<i32>} : memref<8x128xf32, #tpu.memory_space<vmem>>, vector<8x128xf32>,
    return
  }
  func.func @transform_0(%arg0: i32) -> (i32, i32) {
    %c0_i32 = arith.constant 0 : i32
    %c0_i32_0 = arith.constant 0 : i32
    %c0_i32_1 = arith.constant 0 : i32
    return %c0_i32, %c0_i32_0 : i32, i32
  }
  func.func @transform_1(%arg0: i32) -> (i32, i32) {
    %c0_i32 = arith.constant 0 : i32
    %c0_i32_0 = arith.constant 0 : i32
    %c0_i32_1 = arith.constant 0 : i32
    return %c0_i32, %c0_i32_0 : i32, i32
  }
  func.func @transform_2(%arg0: i32) -> (i32, i32) {
    %c0_i32 = arith.constant 0 : i32
    %c0_i32_0 = arith.constant 0 : i32
    %c0_i32_1 = arith.constant 0 : i32
    return %c0_i32, %c0_i32_0 : i32, i32
  }
  func.func @transform_3(%arg0: i32) -> (i32, i32) {
    %c0_i32 = arith.constant 0 : i32
    %c0_i32_0 = arith.constant 0 : i32
    %c0_i32_1 = arith.constant 0 : i32
    return %c0_i32, %c0_i32_0 : i32, i32
  }
  func.func @transform_4(%arg0: i32) -> (i32, i32) {
    %c0_i32 = arith.constant 0 : i32
    %c0_i32_0 = arith.constant 0 : i32
    %c0_i32_1 = arith.constant 0 : i32
    return %c0_i32, %c0_i32_0 : i32, i32
  }
  func.func @transform_5(%arg0: i32) -> (i32, i32) {
    %c0_i32 = arith.constant 0 : i32
    %c0_i32_0 = arith.constant 0 : i32
    %c0_i32_1 = arith.constant 0 : i32
    return %c0_i32, %c0_i32_0 : i32, i32
  }
  func.func @transform_9(%arg0: i32) -> (i32, i32) {
    %c0_i32 = arith.constant 0 : i32
    %c0_i32_0 = arith.constant 0 : i32
    %c0_i32_1 = arith.constant 0 : i32
    return %c0_i32, %c0_i32_0 : i32, i32
  }
}

</mosaic_0001>

<bundles_post_ra>
// kernel: tpu_custom_call.1
= control target key start
LH: loop header
LB: loop body
LE: loop exit
PB: predicated region body
PF: predicated region fallthrough
CT: control target
= control target key end

     0   :  { %14 = vsyncpa [#allocation8], 0  ;;  %s4348_s0 = inlined_call_operand.hbm [shape: bf16[1,128], index: 0, kind: input, shape index: {}]   ;;  %s4349_s1 = inlined_call_operand.hbm [shape: bf16[128,512], index: 1, kind: input, shape index: {}]   ;;  %s4350_s2 = inlined_call_operand.hbm [shape: bf16[128,512], index: 2, kind: input, shape index: {}]   ;;  %s4351_s3 = inlined_call_operand.hbm [shape: f32[1,512], index: 3, kind: input, shape index: {}]   ;;  %s4352_s4 = inlined_call_operand.hbm [shape: f32[1,512], index: 4, kind: input, shape index: {}]   ;;  %s4353_s5 = inlined_call_operand.vmem [shape: f32[1,128], index: 5, kind: input, shape index: {}]   ;;  %s4354_s6 = inlined_call_operand.hbm [shape: bf16[128,512], index: 6, kind: input, shape index: {}]   ;;  %s4355_s7 = inlined_call_operand.hbm [shape: bf16[128,512], index: 7, kind: input, shape index: {}]   ;;  %s4356_s8 = inlined_call_operand.hbm [shape: f32[128,128], index: 8, kind: input, shape index: {}]   ;;  %s4357_s9 = inlined_call_operand.hbm [shape: f32[8,128], index: 9, kind: output, shape index: {}]  }
   0x1   :  { %15 = vsyncpa [#allocation11], 0 }
   0x2   :  { %16 = vsyncpa [#allocation14], 0  ;;  %s33_s11 = sshll.u32 %s4349_s1, 4  ;;  %s34_s11 = int_to_ptr.hbm [resolvable:$true] %s33_s11 }
   0x3   :  { %17 = vsyncpa [#allocation9], 0  ;;  %s3424_s12 = smov [#allocation10]   ;;  %s60_s16 = sshll.u32 %s4351_s3, 4  ;;  %s61_s16 = int_to_ptr.hbm [resolvable:$true] %s60_s16 }
   0x4   :  { %s35_s13 = sshll.u32 %s3424_s12, 4  ;;  %s3425_s17 = smov 256   ;;  %s36_s13 = int_to_ptr.vmem [resolvable:$true] %s35_s13 }
   0x5   :  { %s3426_s18 = smov 16   ;;  %s3427_s19 = smov [#allocation13]  }
   0x6   :  { %41 = dma.hbm_to_vmem [thread:$0]  %s34_s11, 4096, %s36_s13, [#allocation11], %s3425_s17, %s3425_s17, %s3426_s18  }
   0x7   :  { %s62_s20 = sshll.u32 %s3427_s19, 4  ;;  %s23_s23 = sshll.u32 %s4348_s0, 4  ;;  %s63_s20 = int_to_ptr.vmem [resolvable:$true] %s62_s20  ;;  %s24_s23 = int_to_ptr.hbm [resolvable:$true] %s23_s23 }
   0x8   :  { %65 = dma.hbm_to_vmem [thread:$0]  %s61_s16, 64, %s63_s20, [#allocation14]  }
   0x9   :  { %s46_s25 = sshll.u32 %s4350_s2, 4  ;;  %s3428_s26 = smov [#allocation7]   ;;  %s47_s25 = int_to_ptr.hbm [resolvable:$true] %s46_s25 }
   0xa   :  { %s25_s27 = sshll.u32 %s3428_s26, 4  ;;  %s3429_s3 = smov [#allocation12]   ;;  %s26_s27 = int_to_ptr.vmem [resolvable:$true] %s25_s27 }
   0xb   :  { %28 = dma.hbm_to_vmem [thread:$0]  %s24_s23, 16, %s26_s27, [#allocation8]  }
   0xc   :  { %s48_s28 = sshll.u32 %s3429_s3, 4  ;;  %s71_s10 = sshll.u32 %s4352_s4, 4  ;;  %s49_s28 = int_to_ptr.vmem [resolvable:$true] %s48_s28  ;;  %s72_s10 = int_to_ptr.hbm [resolvable:$true] %s71_s10 }
   0xd   :  { %54 = dma.hbm_to_vmem [thread:$0]  %s47_s25, 4096, %s49_s28, [#allocation11], %s3425_s17, %s3425_s17, %s3426_s18  }
   0xe   :  { %s3430_s0 = smov [#allocation15]  }
   0xf   :  { %s73_s11 = sshll.u32 %s3430_s0, 4  ;;  %s74_s11 = int_to_ptr.vmem [resolvable:$true] %s73_s11 }
  0x10   :  { %76 = dma.hbm_to_vmem [thread:$0]  %s72_s10, 64, %s74_s11, [#allocation14]  }
  0x11   :  { %3410 = dma.done.wait [#allocation8], 16  }
  0x12   :  { %3411 = vsyncadd [#allocation8], 4294967280 }
  0x13   :  { %3412 = dma.done.wait [#allocation11], 8192  }
  0x14   :  { %3413 = vsyncadd [#allocation11], 4294959104 }
  0x15   :  { %3414 = dma.done.wait [#allocation14], 128  }
  0x16   :  { %3415 = vsyncadd [#allocation14], 4294967168  ;;  %v2540_v0 = vld [vmem:[#allocation10 + $0xe0] sm:$0xf]  ;;  %v2971_v1 = vld [vmem:[#allocation10 + $0xec] sm:$0xf0] }
  0x17   :  { %v2969_v2 = vld [vmem:[#allocation10 + $0xe4] sm:$0xf]  ;;  %v2541_v3 = vor.u32 %v2971_v1, %v2540_v0  ;;  %v2542_v4 = vld [vmem:[#allocation10 + $0xf0] sm:$0xf0]  ;;  %v2548_v5 = vld [vmem:[#allocation10 + $0xe8] sm:$0xf] }
  0x18   :  { %v2972_v6 = vld [vmem:[#allocation10 + $0xf4] sm:$0xf0]  ;;  %v2545_v7 = vor.u32 %v2969_v2, %v2542_v4  ;;  %v2970_v9 = vld [vmem:[#allocation10 + $0xec] sm:$0xf]  ;;  %v2550_v10 = vld [vmem:[#allocation10 + $0xf8] sm:$0xf0] }
  0x19   :  { %v2549_v8 = vor.u32 %v2972_v6, %v2548_v5  ;;  %v2524_v11 = vld [vmem:[#allocation10 + $0xc0] sm:$0xf]  ;;  %344 = vmatpush.bf16.msra.mxu0 %v2541_v3  ;;  %v2553_v12 = vor.u32 %v2970_v9, %v2550_v10  ;;  %v2967_v13 = vld [vmem:[#allocation10 + $0xcc] sm:$0xf0]  ;;  %v2965_v14 = vld [vmem:[#allocation10 + $0xc4] sm:$0xf] }
  0x1a   :  { %v2526_v15 = vld [vmem:[#allocation10 + $0xd0] sm:$0xf0]  ;;  %357 = vmatpush.bf16.msra.mxu1 %v2545_v7  ;;  %v2525_v16 = vor.u32 %v2967_v13, %v2524_v11  ;;  %v2532_v18 = vld [vmem:[#allocation10 + $0xc8] sm:$0xf]  ;;  %v2968_v19 = vld [vmem:[#allocation10 + $0xd4] sm:$0xf0] }
  0x1b   :  { %370 = vmatpush.bf16.msra.mxu2 %v2549_v8  ;;  %v2529_v17 = vor.u32 %v2965_v14, %v2526_v15  ;;  %v2966_v20 = vld [vmem:[#allocation10 + $0xcc] sm:$0xf]  ;;  %383 = vmatpush.bf16.msra.mxu3 %v2553_v12  ;;  %v2533_v21 = vor.u32 %v2968_v19, %v2532_v18  ;;  %v2534_v22 = vld [vmem:[#allocation10 + $0xd8] sm:$0xf0]  ;;  %v2508_v23 = vld [vmem:[#allocation10 + $0xa0] sm:$0xf] }
  0x1c   :  { %v2963_v24 = vld [vmem:[#allocation10 + $0xac] sm:$0xf0]  ;;  %v2537_v25 = vor.u32 %v2966_v20, %v2534_v22  ;;  %v2961_v26 = vld [vmem:[#allocation10 + $0xa4] sm:$0xf]  ;;  %v2510_v27 = vld [vmem:[#allocation10 + $0xb0] sm:$0xf0] }
  0x1d   :  { %v2516_v28 = vld [vmem:[#allocation10 + $0xa8] sm:$0xf]  ;;  %345 = vmatpush.bf16.msra.mxu0 %v2525_v16  ;;  %v2509_v29 = vor.u32 %v2963_v24, %v2508_v23  ;;  %v2964_v30 = vld [vmem:[#allocation10 + $0xb4] sm:$0xf0]  ;;  %v2962_v31 = vld [vmem:[#allocation10 + $0xac] sm:$0xf]  ;;  %v2513_v33 = vor.u32 %v2961_v26, %v2510_v27 }
  0x1e   :  { %v2518_v32 = vld [vmem:[#allocation10 + $0xb8] sm:$0xf0]  ;;  %358 = vmatpush.bf16.msra.mxu1 %v2529_v17  ;;  %v2517_v34 = vor.u32 %v2964_v30, %v2516_v28  ;;  %v2492_v35 = vld [vmem:[#allocation10 + $0x80] sm:$0xf]  ;;  %v2959_v36 = vld [vmem:[#allocation10 + $0x8c] sm:$0xf0] }
  0x1f   :  { %371 = vmatpush.bf16.msra.mxu2 %v2533_v21  ;;  %v2957_v37 = vld [vmem:[#allocation10 + $0x84] sm:$0xf]  ;;  %384 = vmatpush.bf16.msra.mxu3 %v2537_v25  ;;  %v2521_v38 = vor.u32 %v2962_v31, %v2518_v32  ;;  %v2494_v39 = vld [vmem:[#allocation10 + $0x90] sm:$0xf0]  ;;  %v2500_v40 = vld [vmem:[#allocation10 + $0x88] sm:$0xf]  ;;  %v2493_v44 = vor.u32 %v2959_v36, %v2492_v35 }
  0x20   :  { %v2960_v41 = vld [vmem:[#allocation10 + $0x94] sm:$0xf0]  ;;  %v2958_v42 = vld [vmem:[#allocation10 + $0x8c] sm:$0xf]  ;;  %v2502_v43 = vld [vmem:[#allocation10 + $0x98] sm:$0xf0]  ;;  %v2497_v45 = vor.u32 %v2957_v37, %v2494_v39 }
  0x21   :  { %346 = vmatpush.bf16.msra.mxu0 %v2509_v29  ;;  %v2501_v46 = vor.u32 %v2960_v41, %v2500_v40  ;;  %v2476_v47 = vld [vmem:[#allocation10 + $0x60] sm:$0xf]  ;;  %v2955_v48 = vld [vmem:[#allocation10 + $0x6c] sm:$0xf0]  ;;  %v2953_v49 = vld [vmem:[#allocation10 + $0x64] sm:$0xf]  ;;  %v2505_v50 = vor.u32 %v2958_v42, %v2502_v43 }
  0x22   :  { %359 = vmatpush.bf16.msra.mxu1 %v2513_v33  ;;  %v2478_v51 = vld [vmem:[#allocation10 + $0x70] sm:$0xf0]  ;;  %v2484_v52 = vld [vmem:[#allocation10 + $0x68] sm:$0xf]  ;;  %v2956_v53 = vld [vmem:[#allocation10 + $0x74] sm:$0xf0]  ;;  %v2477_v56 = vor.u32 %v2955_v48, %v2476_v47 }
  0x23   :  { %372 = vmatpush.bf16.msra.mxu2 %v2517_v34  ;;  %385 = vmatpush.bf16.msra.mxu3 %v2521_v38  ;;  %v2954_v54 = vld [vmem:[#allocation10 + $0x6c] sm:$0xf]  ;;  %v2486_v55 = vld [vmem:[#allocation10 + $0x78] sm:$0xf0]  ;;  %v2481_v57 = vor.u32 %v2953_v49, %v2478_v51  ;;  %v2485_v58 = vor.u32 %v2956_v53, %v2484_v52  ;;  %v2460_v59 = vld [vmem:[#allocation10 + $0x40] sm:$0xf] }
  0x24   :  { %v2951_v60 = vld [vmem:[#allocation10 + $0x4c] sm:$0xf0]  ;;  %v2949_v61 = vld [vmem:[#allocation10 + $0x44] sm:$0xf]  ;;  %v2489_v62 = vor.u32 %v2954_v54, %v2486_v55  ;;  %v2462_v63 = vld [vmem:[#allocation10 + $0x50] sm:$0xf0] }
  0x25   :  { %347 = vmatpush.bf16.msra.mxu0 %v2493_v44  ;;  %v2468_v0 = vld [vmem:[#allocation10 + $0x48] sm:$0xf]  ;;  %v2952_v1 = vld [vmem:[#allocation10 + $0x54] sm:$0xf0]  ;;  %v2950_v2 = vld [vmem:[#allocation10 + $0x4c] sm:$0xf]  ;;  %v2461_v4 = vor.u32 %v2951_v60, %v2460_v59  ;;  %v2465_v5 = vor.u32 %v2949_v61, %v2462_v63 }
  0x26   :  { %360 = vmatpush.bf16.msra.mxu1 %v2497_v45  ;;  %v2470_v3 = vld [vmem:[#allocation10 + $0x58] sm:$0xf0]  ;;  %v2469_v6 = vor.u32 %v2952_v1, %v2468_v0  ;;  %v2444_v7 = vld [vmem:[#allocation10 + $0x20] sm:$0xf]  ;;  %v2947_v8 = vld [vmem:[#allocation10 + $0x2c] sm:$0xf0] }
  0x27   :  { %373 = vmatpush.bf16.msra.mxu2 %v2501_v46  ;;  %386 = vmatpush.bf16.msra.mxu3 %v2505_v50  ;;  %v2945_v9 = vld [vmem:[#allocation10 + $0x24] sm:$0xf]  ;;  %v2473_v10 = vor.u32 %v2950_v2, %v2470_v3  ;;  %v2446_v11 = vld [vmem:[#allocation10 + $0x30] sm:$0xf0]  ;;  %v2452_v12 = vld [vmem:[#allocation10 + $0x28] sm:$0xf]  ;;  %v2445_v16 = vor.u32 %v2947_v8, %v2444_v7 }
  0x28   :  { %v2948_v13 = vld [vmem:[#allocation10 + $0x34] sm:$0xf0]  ;;  %v2946_v14 = vld [vmem:[#allocation10 + $0x2c] sm:$0xf]  ;;  %v2454_v15 = vld [vmem:[#allocation10 + $0x38] sm:$0xf0]  ;;  %v2449_v19 = vor.u32 %v2945_v9, %v2446_v11 }
  0x29   :  { %348 = vmatpush.bf16.msra.mxu0 %v2477_v56  ;;  %v2428_v17 = vld [vmem:[#allocation10] sm:$0xf]  ;;  %v2943_v18 = vld [vmem:[#allocation10 + $0xc] sm:$0xf0]  ;;  %v2453_v20 = vor.u32 %v2948_v13, %v2452_v12  ;;  %v2941_v21 = vld [vmem:[#allocation10 + $0x4] sm:$0xf]  ;;  %v2457_v24 = vor.u32 %v2946_v14, %v2454_v15 }
  0x2a   :  { %361 = vmatpush.bf16.msra.mxu1 %v2481_v57  ;;  %v2430_v22 = vld [vmem:[#allocation10 + $0x10] sm:$0xf0]  ;;  %v2436_v23 = vld [vmem:[#allocation10 + $0x8] sm:$0xf]  ;;  %v2944_v25 = vld [vmem:[#allocation10 + $0x14] sm:$0xf0]  ;;  %v2429_v31 = vor.u32 %v2943_v18, %v2428_v17 }
  0x2b   :  { %374 = vmatpush.bf16.msra.mxu2 %v2485_v58  ;;  %387 = vmatpush.bf16.msra.mxu3 %v2489_v62  ;;  %v2942_v26 = vld [vmem:[#allocation10 + $0xc] sm:$0xf]  ;;  %v2438_v27 = vld [vmem:[#allocation10 + $0x18] sm:$0xf0]  ;;  %v2668_v28 = vld [vmem:[#allocation12 + $0xe0] sm:$0xf]  ;;  %v2433_v35 = vor.u32 %v2941_v21, %v2430_v22  ;;  %v2437_v36 = vor.u32 %v2944_v25, %v2436_v23 }
  0x2c   :  { %v3003_v29 = vld [vmem:[#allocation12 + $0xec] sm:$0xf0]  ;;  %v3001_v30 = vld [vmem:[#allocation12 + $0xe4] sm:$0xf]  ;;  %v2670_v32 = vld [vmem:[#allocation12 + $0xf0] sm:$0xf0]  ;;  %v2441_v39 = vor.u32 %v2942_v26, %v2438_v27 }
  0x2d   :  { %349 = vmatpush.bf16.msra.mxu0 %v2461_v4  ;;  %v2676_v33 = vld [vmem:[#allocation12 + $0xe8] sm:$0xf]  ;;  %v3004_v34 = vld [vmem:[#allocation12 + $0xf4] sm:$0xf0]  ;;  %v3002_v37 = vld [vmem:[#allocation12 + $0xec] sm:$0xf]  ;;  %v3501_v40 = vor.u32 %v3003_v29, %v2668_v28  ;;  %v3503_v41 = vor.u32 %v3001_v30, %v2670_v32 }
  0x2e   :  { %362 = vmatpush.bf16.msra.mxu1 %v2465_v5  ;;  %v2678_v38 = vld [vmem:[#allocation12 + $0xf8] sm:$0xf0]  ;;  %v3505_v42 = vor.u32 %v3004_v34, %v2676_v33  ;;  %v2652_v43 = vld [vmem:[#allocation12 + $0xc0] sm:$0xf]  ;;  %v2999_v44 = vld [vmem:[#allocation12 + $0xcc] sm:$0xf0] }
  0x2f   :  { %375 = vmatpush.bf16.msra.mxu2 %v2469_v6  ;;  %388 = vmatpush.bf16.msra.mxu3 %v2473_v10  ;;  %v2997_v45 = vld [vmem:[#allocation12 + $0xc4] sm:$0xf]  ;;  %v3507_v46 = vor.u32 %v3002_v37, %v2678_v38  ;;  %v2654_v47 = vld [vmem:[#allocation12 + $0xd0] sm:$0xf0]  ;;  %v2660_v48 = vld [vmem:[#allocation12 + $0xc8] sm:$0xf]  ;;  %v3510_v53 = vor.u32 %v2999_v44, %v2652_v43 }
  0x30   :  { %v3000_v49 = vld [vmem:[#allocation12 + $0xd4] sm:$0xf0]  ;;  %v2998_v50 = vld [vmem:[#allocation12 + $0xcc] sm:$0xf]  ;;  %v2662_v51 = vld [vmem:[#allocation12 + $0xd8] sm:$0xf0]  ;;  %v3514_v54 = vor.u32 %v2997_v45, %v2654_v47 }
  0x31   :  { %350 = vmatpush.bf16.msra.mxu0 %v2445_v16  ;;  %v141_v52 = vld [vmem:[#allocation7] sm:$0x1]  ;;  %v3516_v55 = vor.u32 %v3000_v49, %v2660_v48  ;;  %v2636_v56 = vld [vmem:[#allocation12 + $0xa0] sm:$0xf]  ;;  %v2995_v57 = vld [vmem:[#allocation12 + $0xac] sm:$0xf0]  ;;  %v3519_v59 = vor.u32 %v2998_v50, %v2662_v51 }
  0x32   :  { %363 = vmatpush.bf16.msra.mxu1 %v2449_v19  ;;  %v2993_v58 = vld [vmem:[#allocation12 + $0xa4] sm:$0xf]  ;;  %v2638_v60 = vld [vmem:[#allocation12 + $0xb0] sm:$0xf0]  ;;  %v2644_v61 = vld [vmem:[#allocation12 + $0xa8] sm:$0xf]  ;;  %v3522_v1 = vor.u32 %v2995_v57, %v2636_v56 }
  0x33   :  { %376 = vmatpush.bf16.msra.mxu2 %v2453_v20  ;;  %389 = vmatpush.bf16.msra.mxu3 %v2457_v24  ;;  %v2996_v62 = vld [vmem:[#allocation12 + $0xb4] sm:$0xf0]  ;;  %v2994_v63 = vld [vmem:[#allocation12 + $0xac] sm:$0xf]  ;;  %v2646_v0 = vld [vmem:[#allocation12 + $0xb8] sm:$0xf0]  ;;  %v3526_v2 = vor.u32 %v2993_v58, %v2638_v60 }
  0x34   :  { %v3528_v3 = vor.u32 %v2996_v62, %v2644_v61  ;;  %v2620_v4 = vld [vmem:[#allocation12 + $0x80] sm:$0xf]  ;;  %v2991_v5 = vld [vmem:[#allocation12 + $0x8c] sm:$0xf0]  ;;  %v2989_v6 = vld [vmem:[#allocation12 + $0x84] sm:$0xf]  ;;  %v3531_v7 = vor.u32 %v2994_v63, %v2646_v0 }
  0x35   :  { %351 = vmatpush.bf16.msra.mxu0 %v2429_v31  ;;  %v2622_v8 = vld [vmem:[#allocation12 + $0x90] sm:$0xf0]  ;;  %v2628_v9 = vld [vmem:[#allocation12 + $0x88] sm:$0xf]  ;;  %v2992_v10 = vld [vmem:[#allocation12 + $0x94] sm:$0xf0]  ;;  %v3534_v13 = vor.u32 %v2991_v5, %v2620_v4 }
  0x36   :  { %364 = vmatpush.bf16.msra.mxu1 %v2433_v35  ;;  %v2990_v11 = vld [vmem:[#allocation12 + $0x8c] sm:$0xf]  ;;  %v2630_v12 = vld [vmem:[#allocation12 + $0x98] sm:$0xf0]  ;;  %v3538_v14 = vor.u32 %v2989_v6, %v2622_v8  ;;  %v3540_v15 = vor.u32 %v2992_v10, %v2628_v9  ;;  %v2604_v16 = vld [vmem:[#allocation12 + $0x60] sm:$0xf] }
  0x37   :  { %377 = vmatpush.bf16.msra.mxu2 %v2437_v36  ;;  %390 = vmatpush.bf16.msra.mxu3 %v2441_v39  ;;  %v2987_v17 = vld [vmem:[#allocation12 + $0x6c] sm:$0xf0]  ;;  %v2985_v18 = vld [vmem:[#allocation12 + $0x64] sm:$0xf]  ;;  %v3543_v19 = vor.u32 %v2990_v11, %v2630_v12  ;;  %v2606_v20 = vld [vmem:[#allocation12 + $0x70] sm:$0xf0] }
  0x38   :  { %352 = vmatmul.bf16.vlgmr.msra.gmra.mxu0 %v141_v52  ;;  %v2612_v21 = vld [vmem:[#allocation12 + $0x68] sm:$0xf]  ;;  %v2988_v22 = vld [vmem:[#allocation12 + $0x74] sm:$0xf0]  ;;  %v2986_v23 = vld [vmem:[#allocation12 + $0x6c] sm:$0xf]  ;;  %v3546_v25 = vor.u32 %v2987_v17, %v2604_v16  ;;  %v3550_v26 = vor.u32 %v2985_v18, %v2606_v20 }
  0x39   :  { %590 = vmatpush.bf16.msrb.mxu0 %v3501_v40  ;;  %365 = vmatmul.bf16.vlgmr.msra.gmra.mxu1 %v141_v52  ;;  %v2614_v24 = vld [vmem:[#allocation12 + $0x78] sm:$0xf0]  ;;  %v3552_v27 = vor.u32 %v2988_v22, %v2612_v21  ;;  %v2588_v28 = vld [vmem:[#allocation12 + $0x40] sm:$0xf]  ;;  %v2983_v29 = vld [vmem:[#allocation12 + $0x4c] sm:$0xf0] }
  0x3a   :  { %603 = vmatpush.bf16.msrb.mxu1 %v3503_v41  ;;  %378 = vmatmul.bf16.vlgmr.msra.gmra.mxu2 %v141_v52  ;;  %v2981_v30 = vld [vmem:[#allocation12 + $0x44] sm:$0xf]  ;;  %v3555_v31 = vor.u32 %v2986_v23, %v2614_v24  ;;  %v2590_v32 = vld [vmem:[#allocation12 + $0x50] sm:$0xf0]  ;;  %v2596_v33 = vld [vmem:[#allocation12 + $0x48] sm:$0xf]  ;;  %v3558_v37 = vor.u32 %v2983_v29, %v2588_v28 }
  0x3b   :  { %616 = vmatpush.bf16.msrb.mxu2 %v3505_v42  ;;  %629 = vmatpush.bf16.msrb.mxu3 %v3507_v46  ;;  %v2984_v34 = vld [vmem:[#allocation12 + $0x54] sm:$0xf0]  ;;  %v2982_v35 = vld [vmem:[#allocation12 + $0x4c] sm:$0xf]  ;;  %v2598_v36 = vld [vmem:[#allocation12 + $0x58] sm:$0xf0]  ;;  %v3562_v38 = vor.u32 %v2981_v30, %v2590_v32 }
  0x3c   :  { %391 = vmatmul.bf16.vlgmr.msra.gmra.mxu3 %v141_v52  ;;  %v3564_v39 = vor.u32 %v2984_v34, %v2596_v33  ;;  %v2572_v43 = vld [vmem:[#allocation12 + $0x20] sm:$0xf]  ;;  %v2979_v44 = vld [vmem:[#allocation12 + $0x2c] sm:$0xf0]  ;;  %v2977_v45 = vld [vmem:[#allocation12 + $0x24] sm:$0xf]  ;;  %v3567_v47 = vor.u32 %v2982_v35, %v2598_v36 }
  0x3d   :  { %591 = vmatpush.bf16.msrb.mxu0 %v3510_v53  ;;  %v2574_v48 = vld [vmem:[#allocation12 + $0x30] sm:$0xf0]  ;;  %v2580_v49 = vld [vmem:[#allocation12 + $0x28] sm:$0xf]  ;;  %v2980_v50 = vld [vmem:[#allocation12 + $0x34] sm:$0xf0]  ;;  %v3570_v56 = vor.u32 %v2979_v44, %v2572_v43 }
  0x3e   :  { %604 = vmatpush.bf16.msrb.mxu1 %v3514_v54  ;;  %v2978_v51 = vld [vmem:[#allocation12 + $0x2c] sm:$0xf]  ;;  %v2582_v52 = vld [vmem:[#allocation12 + $0x38] sm:$0xf0]  ;;  %v3574_v57 = vor.u32 %v2977_v45, %v2574_v48  ;;  %v3576_v58 = vor.u32 %v2980_v50, %v2580_v49  ;;  %v2556_v60 = vld [vmem:[#allocation12] sm:$0xf] }
  0x3f   :  { %617 = vmatpush.bf16.msrb.mxu2 %v3516_v55  ;;  %630 = vmatpush.bf16.msrb.mxu3 %v3519_v59  ;;  %v2975_v61 = vld [vmem:[#allocation12 + $0xc] sm:$0xf0]  ;;  %v2973_v62 = vld [vmem:[#allocation12 + $0x4] sm:$0xf]  ;;  %v3579_v63 = vor.u32 %v2978_v51, %v2582_v52  ;;  %v2558_v0 = vld [vmem:[#allocation12 + $0x10] sm:$0xf0] }
  0x40   :  { %v2564_v4 = vld [vmem:[#allocation12 + $0x8] sm:$0xf]  ;;  %v2976_v5 = vld [vmem:[#allocation12 + $0x14] sm:$0xf0]  ;;  %v2974_v6 = vld [vmem:[#allocation12 + $0xc] sm:$0xf]  ;;  %v3582_v9 = vor.u32 %v2975_v61, %v2556_v60  ;;  %v3586_v10 = vor.u32 %v2973_v62, %v2558_v0 }
  0x41   :  { %592 = vmatpush.bf16.msrb.mxu0 %v3522_v1  ;;  %v2566_v8 = vld [vmem:[#allocation12 + $0x18] sm:$0xf0]  ;;  %v3588_v11 = vor.u32 %v2976_v5, %v2564_v4  ;;  %v3431_v16 = vmov 0   ;;  %v174_v29 = vld [vmem:[#allocation13] sm:$0xf]  ;;  %s107_s12 = sshll.u32 %s4354_s6, 4  ;;  %s108_s12 = int_to_ptr.hbm [resolvable:$true] %s107_s12 }
  0x42   :  { %605 = vmatpush.bf16.msrb.mxu1 %v3526_v2  ;;  %v3591_v12 = vor.u32 %v2974_v6, %v2566_v8  ;;  %v336_v30 = vperm.slane %v174_v29, 0  ;;  %v337_v32 = vperm.slane %v174_v29, 1  ;;  %v338_v44 = vperm.slane %v174_v29, 2  ;;  %s3432_s13 = smov [#allocation3]   ;;  %s121_s17 = sshll.u32 %s4355_s7, 4  ;;  %s122_s17 = int_to_ptr.hbm [resolvable:$true] %s121_s17 }
  0x43   :  { %618 = vmatpush.bf16.msrb.mxu2 %v3528_v3  ;;  %631 = vmatpush.bf16.msrb.mxu3 %v3531_v7  ;;  %v339_v48 = vperm.slane %v174_v29, 3  ;;  %s109_s14 = sshll.u32 %s3432_s13, 4  ;;  %s3433_s18 = smov [#allocation4]   ;;  %s110_s14 = int_to_ptr.vmem [resolvable:$true] %s109_s14 }
  0x44   :  { %112 = dma.hbm_to_vmem [thread:$0]  %s108_s12, 4096, %s110_s14, [#allocation6] }
  0x45   :  { %593 = vmatpush.bf16.msrb.mxu0 %v3534_v13  ;;  %s123_s19 = sshll.u32 %s3433_s18, 4  ;;  %s135_s22 = sshll.u32 %s4356_s8, 4  ;;  %s124_s19 = int_to_ptr.vmem [resolvable:$true] %s123_s19  ;;  %s136_s22 = int_to_ptr.hbm [resolvable:$true] %s135_s22 }
  0x46   :  { %606 = vmatpush.bf16.msrb.mxu1 %v3538_v14  ;;  %126 = dma.hbm_to_vmem [thread:$0]  %s122_s17, 4096, %s124_s19, [#allocation6 + $0x1] }
  0x47   :  { %619 = vmatpush.bf16.msrb.mxu2 %v3540_v15  ;;  %632 = vmatpush.bf16.msrb.mxu3 %v3543_v19  ;;  %s3434_s6 = smov [#allocation5]  }
  0x48   :  { %s137_s23 = sshll.u32 %s3434_s6, 4  ;;  %s138_s23 = int_to_ptr.vmem [resolvable:$true] %s137_s23 }
  0x49   :  { %594 = vmatpush.bf16.msrb.mxu0 %v3546_v25  ;;  %140 = dma.hbm_to_vmem [thread:$0]  %s136_s22, 2048, %s138_s23, [#allocation6 + $0x2] }
  0x4a   :  { %607 = vmatpush.bf16.msrb.mxu1 %v3550_v26 }
  0x4b   :  { %620 = vmatpush.bf16.msrb.mxu2 %v3552_v27  ;;  %633 = vmatpush.bf16.msrb.mxu3 %v3555_v31 }
  0x4d   :  { %595 = vmatpush.bf16.msrb.mxu0 %v3558_v37 }
  0x4e   :  { %608 = vmatpush.bf16.msrb.mxu1 %v3562_v38 }
  0x4f   :  { %621 = vmatpush.bf16.msrb.mxu2 %v3564_v39  ;;  %634 = vmatpush.bf16.msrb.mxu3 %v3567_v47 }
  0x51   :  { %596 = vmatpush.bf16.msrb.mxu0 %v3570_v56 }
  0x52   :  { %609 = vmatpush.bf16.msrb.mxu1 %v3574_v57 }
  0x53   :  { %622 = vmatpush.bf16.msrb.mxu2 %v3576_v58  ;;  %635 = vmatpush.bf16.msrb.mxu3 %v3579_v63 }
  0x55   :  { %597 = vmatpush.bf16.msrb.mxu0 %v3582_v9 }
  0x56   :  { %610 = vmatpush.bf16.msrb.mxu1 %v3586_v10 }
  0x57   :  { %623 = vmatpush.bf16.msrb.mxu2 %v3588_v11  ;;  %636 = vmatpush.bf16.msrb.mxu3 %v3591_v12 }
  0x58   :  { %598 = vmatmul.bf16.vlgmr.msrb.gmra.mxu0 %v3431_v16 }
  0x59   :  { %665 = vmatpush.bf16.msra.mxu0 %v3501_v40  ;;  %611 = vmatmul.bf16.vlgmr.msrb.gmra.mxu1 %v3431_v16 }
  0x5a   :  { %678 = vmatpush.bf16.msra.mxu1 %v3503_v41  ;;  %624 = vmatmul.bf16.vlgmr.msrb.gmra.mxu2 %v3431_v16 }
  0x5b   :  { %637 = vmatmul.bf16.vlgmr.msrb.gmra.mxu3 %v3431_v16  ;;  %691 = vmatpush.bf16.msra.mxu2 %v3505_v42 }
  0x5c   :  { %704 = vmatpush.bf16.msra.mxu3 %v3507_v46 }
  0x5d   :  { %666 = vmatpush.bf16.msra.mxu0 %v3510_v53 }
  0x5e   :  { %679 = vmatpush.bf16.msra.mxu1 %v3514_v54 }
  0x5f   :  { %692 = vmatpush.bf16.msra.mxu2 %v3516_v55 }
  0x60   :  { %705 = vmatpush.bf16.msra.mxu3 %v3519_v59 }
  0x61   :  { %667 = vmatpush.bf16.msra.mxu0 %v3522_v1 }
  0x62   :  { %680 = vmatpush.bf16.msra.mxu1 %v3526_v2 }
  0x63   :  { %693 = vmatpush.bf16.msra.mxu2 %v3528_v3 }
  0x64   :  { %706 = vmatpush.bf16.msra.mxu3 %v3531_v7 }
  0x65   :  { %668 = vmatpush.bf16.msra.mxu0 %v3534_v13 }
  0x66   :  { %681 = vmatpush.bf16.msra.mxu1 %v3538_v14 }
  0x67   :  { %694 = vmatpush.bf16.msra.mxu2 %v3540_v15 }
  0x68   :  { %707 = vmatpush.bf16.msra.mxu3 %v3543_v19 }
  0x69   :  { %669 = vmatpush.bf16.msra.mxu0 %v3546_v25 }
  0x6a   :  { %682 = vmatpush.bf16.msra.mxu1 %v3550_v26 }
  0x6b   :  { %695 = vmatpush.bf16.msra.mxu2 %v3552_v27 }
  0x6c   :  { %708 = vmatpush.bf16.msra.mxu3 %v3555_v31 }
  0x6d   :  { %670 = vmatpush.bf16.msra.mxu0 %v3558_v37 }
  0x6e   :  { %683 = vmatpush.bf16.msra.mxu1 %v3562_v38 }
  0x6f   :  { %696 = vmatpush.bf16.msra.mxu2 %v3564_v39 }
  0x70   :  { %709 = vmatpush.bf16.msra.mxu3 %v3567_v47 }
  0x71   :  { %671 = vmatpush.bf16.msra.mxu0 %v3570_v56 }
  0x72   :  { %684 = vmatpush.bf16.msra.mxu1 %v3574_v57 }
  0x73   :  { %697 = vmatpush.bf16.msra.mxu2 %v3576_v58 }
  0x74   :  { %710 = vmatpush.bf16.msra.mxu3 %v3579_v63 }
  0x75   :  { %672 = vmatpush.bf16.msra.mxu0 %v3582_v9 }
  0x76   :  { %685 = vmatpush.bf16.msra.mxu1 %v3586_v10 }
  0x77   :  { %698 = vmatpush.bf16.msra.mxu2 %v3588_v11 }
  0x78   :  { %711 = vmatpush.bf16.msra.mxu3 %v3591_v12 }
  0x79   :  { %740 = vmatpush.bf16.msrb.mxu0 %v3501_v40 }
  0x7a   :  { %753 = vmatpush.bf16.msrb.mxu1 %v3503_v41 }
  0x7b   :  { %766 = vmatpush.bf16.msrb.mxu2 %v3505_v42 }
  0x7c   :  { %779 = vmatpush.bf16.msrb.mxu3 %v3507_v46 }
  0x7d   :  { %741 = vmatpush.bf16.msrb.mxu0 %v3510_v53 }
  0x7e   :  { %754 = vmatpush.bf16.msrb.mxu1 %v3514_v54 }
  0x7f   :  { %767 = vmatpush.bf16.msrb.mxu2 %v3516_v55 }
  0x80   :  { %780 = vmatpush.bf16.msrb.mxu3 %v3519_v59 }
  0x81   :  { %742 = vmatpush.bf16.msrb.mxu0 %v3522_v1 }
  0x82   :  { %755 = vmatpush.bf16.msrb.mxu1 %v3526_v2 }
  0x83   :  { %768 = vmatpush.bf16.msrb.mxu2 %v3528_v3 }
  0x84   :  { %781 = vmatpush.bf16.msrb.mxu3 %v3531_v7 }
  0x85   :  { %743 = vmatpush.bf16.msrb.mxu0 %v3534_v13 }
  0x86   :  { %756 = vmatpush.bf16.msrb.mxu1 %v3538_v14 }
  0x87   :  { %769 = vmatpush.bf16.msrb.mxu2 %v3540_v15 }
  0x88   :  { %782 = vmatpush.bf16.msrb.mxu3 %v3543_v19 }
  0x89   :  { %744 = vmatpush.bf16.msrb.mxu0 %v3546_v25 }
  0x8a   :  { %757 = vmatpush.bf16.msrb.mxu1 %v3550_v26 }
  0x8b   :  { %770 = vmatpush.bf16.msrb.mxu2 %v3552_v27 }
  0x8c   :  { %783 = vmatpush.bf16.msrb.mxu3 %v3555_v31 }
  0x8d   :  { %745 = vmatpush.bf16.msrb.mxu0 %v3558_v37 }
  0x8e   :  { %758 = vmatpush.bf16.msrb.mxu1 %v3562_v38 }
  0x8f   :  { %771 = vmatpush.bf16.msrb.mxu2 %v3564_v39 }
  0x90   :  { %784 = vmatpush.bf16.msrb.mxu3 %v3567_v47 }
  0x91   :  { %746 = vmatpush.bf16.msrb.mxu0 %v3570_v56 }
  0x92   :  { %759 = vmatpush.bf16.msrb.mxu1 %v3574_v57 }
  0x93   :  { %772 = vmatpush.bf16.msrb.mxu2 %v3576_v58 }
  0x94   :  { %785 = vmatpush.bf16.msrb.mxu3 %v3579_v63 }
  0x95   :  { %747 = vmatpush.bf16.msrb.mxu0 %v3582_v9 }
  0x96   :  { %760 = vmatpush.bf16.msrb.mxu1 %v3586_v10 }
  0x97   :  { %773 = vmatpush.bf16.msrb.mxu2 %v3588_v11 }
  0x98   :  { %786 = vmatpush.bf16.msrb.mxu3 %v3591_v12 }
  0xb5   :  { %v353_v17 = vpop.f32.mrf.mxu0 }
  0xb6   :  { %v366_v18 = vpop.f32.mrf.mxu1  ;;  %v3665_v33 = vadd.f32 %v353_v17, %v336_v30 }
  0xb7   :  { %v3667_v34 = vadd.f32 %v366_v18, %v337_v32 }
  0xbd   :  { %v379_v20 = vpop.f32.mrf.mxu2  ;;  %v355_v22 = vpop.f32.mrf.mxu0 }
  0xbe   :  { %v368_v23 = vpop.f32.mrf.mxu1  ;;  %v3671_v49 = vadd.f32 %v379_v20, %v338_v44 }
  0xbf   :  { %v392_v21 = vpop.f32.mrf.mxu3 }
  0xc0   :  { %v3673_v50 = vadd.f32 %v392_v21, %v339_v48 }
  0xc5   :  { %v381_v24 = vpop.f32.mrf.mxu2 }
  0xc7   :  { %v394_v28 = vpop.f32.mrf.mxu3 }
  0xd5   :  { %v599_v35 = vpop.f32.mrf.mxu0 }
  0xd6   :  { %v642_v36 = vadd.f32 %v599_v35, %v3665_v33  ;;  %v612_v43 = vpop.f32.mrf.mxu1 }
  0xd7   :  { %v643_v45 = vadd.f32 %v612_v43, %v3667_v34 }
  0xd8   :  { %3081 = vtanh.f32 %v642_v36 }
  0xd9   :  { %3083 = vtanh.f32 %v643_v45 }
  0xdd   :  { %v625_v51 = vpop.f32.mrf.mxu2  ;;  %v601_v61 = vpop.f32.mrf.mxu0 }
  0xde   :  { %v644_v52 = vadd.f32 %v625_v51, %v3671_v49  ;;  %v638_v60 = vpop.f32.mrf.mxu3  ;;  %v3082_v62 = vpop.eup %3081 }
  0xdf   :  { %v645_v0 = vadd.f32 %v638_v60, %v3673_v50  ;;  %v614_v4 = vpop.f32.mrf.mxu1  ;;  %v3084_v5 = vpop.eup %3083  ;;  %v650_v6 = vmul.f32 0.5, %v3082_v62 }
  0xe0   :  { %3085 = vtanh.f32 %v644_v52  ;;  %v651_v8 = vmul.f32 0.5, %v3084_v5 }
  0xe1   :  { %3087 = vtanh.f32 %v645_v0  ;;  %v653_v18 = vadd.f32 0.5, %v650_v6 }
  0xe2   :  { %v654_v17 = vadd.f32 0.5, %v651_v8 }
  0xe4   :  { %v656_v23 = vmul.f32 0.0, %v654_v17 }
  0xe5   :  { %v627_v20 = vpop.f32.mrf.mxu2 }
  0xe6   :  { %v3086_v22 = vpop.eup %3085  ;;  %v640_v21 = vpop.f32.mrf.mxu3 }
  0xe7   :  { %v657_v24 = vmul.f32 %v3086_v22, %v653_v18  ;;  %v3088_v28 = vpop.eup %3087 }
  0xe8   :  { %v652_v30 = vmul.f32 0.5, %v3088_v28 }
  0xe9   :  { %v3677_v29 = vadd.f32 %v657_v24, %v656_v23 }
  0xea   :  { %v655_v32 = vadd.f32 0.5, %v652_v30 }
  0xeb   :  { %3089 = vtanh.f32 %v3677_v29 }
  0xf1   :  { %v3090_v35 = vpop.eup %3089 }
  0xf2   :  { %v3680_v36 = vmul.f32 %v3090_v35, %v655_v32  ;;  %v396_v35 = vlaneseq }
  0xf4   :  { %v664_v43 = vpack.c.bf16 %v3680_v36, %v3680_v36 }
  0xf6   :  { %673 = vmatmul.bf16.vlgmr.msra.gmra.mxu0 %v664_v43  ;;  %686 = vmatmul.bf16.vlgmr.msra.gmra.mxu1 %v664_v43 }
  0xf7   :  { %699 = vmatmul.bf16.vlgmr.msra.gmra.mxu2 %v664_v43  ;;  %712 = vmatmul.bf16.vlgmr.msra.gmra.mxu3 %v664_v43 }
  0xf8   :  { %815 = vmatpush.bf16.msra.mxu0 %v3501_v40  ;;  %828 = vmatpush.bf16.msra.mxu1 %v3503_v41 }
  0xf9   :  { %841 = vmatpush.bf16.msra.mxu2 %v3505_v42  ;;  %854 = vmatpush.bf16.msra.mxu3 %v3507_v46 }
  0xfc   :  { %816 = vmatpush.bf16.msra.mxu0 %v3510_v53  ;;  %829 = vmatpush.bf16.msra.mxu1 %v3514_v54 }
  0xfd   :  { %842 = vmatpush.bf16.msra.mxu2 %v3516_v55  ;;  %855 = vmatpush.bf16.msra.mxu3 %v3519_v59 }
 0x100   :  { %817 = vmatpush.bf16.msra.mxu0 %v3522_v1  ;;  %830 = vmatpush.bf16.msra.mxu1 %v3526_v2 }
 0x101   :  { %843 = vmatpush.bf16.msra.mxu2 %v3528_v3  ;;  %856 = vmatpush.bf16.msra.mxu3 %v3531_v7 }
 0x104   :  { %818 = vmatpush.bf16.msra.mxu0 %v3534_v13  ;;  %831 = vmatpush.bf16.msra.mxu1 %v3538_v14 }
 0x105   :  { %844 = vmatpush.bf16.msra.mxu2 %v3540_v15  ;;  %857 = vmatpush.bf16.msra.mxu3 %v3543_v19 }
 0x108   :  { %819 = vmatpush.bf16.msra.mxu0 %v3546_v25  ;;  %832 = vmatpush.bf16.msra.mxu1 %v3550_v26 }
 0x109   :  { %845 = vmatpush.bf16.msra.mxu2 %v3552_v27  ;;  %858 = vmatpush.bf16.msra.mxu3 %v3555_v31 }
 0x10c   :  { %820 = vmatpush.bf16.msra.mxu0 %v3558_v37  ;;  %833 = vmatpush.bf16.msra.mxu1 %v3562_v38 }
 0x10d   :  { %846 = vmatpush.bf16.msra.mxu2 %v3564_v39  ;;  %859 = vmatpush.bf16.msra.mxu3 %v3567_v47 }
 0x110   :  { %821 = vmatpush.bf16.msra.mxu0 %v3570_v56  ;;  %834 = vmatpush.bf16.msra.mxu1 %v3574_v57 }
 0x111   :  { %847 = vmatpush.bf16.msra.mxu2 %v3576_v58  ;;  %860 = vmatpush.bf16.msra.mxu3 %v3579_v63 }
 0x114   :  { %822 = vmatpush.bf16.msra.mxu0 %v3582_v9  ;;  %835 = vmatpush.bf16.msra.mxu1 %v3586_v10 }
 0x115   :  { %848 = vmatpush.bf16.msra.mxu2 %v3588_v11  ;;  %861 = vmatpush.bf16.msra.mxu3 %v3591_v12 }
 0x173   :  { %v674_v44 = vpop.f32.mrf.mxu0  ;;  %v687_v45 = vpop.f32.mrf.mxu1 }
 0x174   :  { %v717_v48 = vadd.f32 %v674_v44, %v3665_v33  ;;  %v718_v51 = vadd.f32 %v687_v45, %v3667_v34  ;;  %v3724_v44 = vshrl.u32 %v396_v35, 7 }
 0x176   :  { %3091 = vtanh.f32 %v717_v48  ;;  %vm661_vm0 = vcmp.eq.s32.totalorder %v3724_v44, 0  ;;  %vm736_vm1 = vcmp.eq.s32.totalorder %v3724_v44, 1  ;;  %vm811_vm2 = vcmp.eq.s32.totalorder %v3724_v44, 2 }
 0x177   :  { %3093 = vtanh.f32 %v718_v51  ;;  %v662_v51 = vperm.slane %v3680_v36, 0  ;;  %vm886_vm3 = vcmp.eq.s32.totalorder %v3724_v44, 3  ;;  %vm961_vm4 = vcmp.eq.s32.totalorder %v3724_v44, 4 }
 0x178   :  { %vm1036_vm5 = vcmp.eq.s32.totalorder %v3724_v44, 5  ;;  %vm1111_vm6 = vcmp.eq.s32.totalorder %v3724_v44, 6  ;;  %vm1186_vm7 = vcmp.eq.s32.totalorder %v3724_v44, 7 }
 0x17a   :  { %v700_v52 = vpop.f32.mrf.mxu2  ;;  %v713_v60 = vpop.f32.mrf.mxu3 }
 0x17b   :  { %v719_v61 = vadd.f32 %v700_v52, %v3671_v49  ;;  %v676_v62 = vpop.f32.mrf.mxu0  ;;  %v689_v0 = vpop.f32.mrf.mxu1  ;;  %v720_v5 = vadd.f32 %v713_v60, %v3673_v50 }
 0x17c   :  { %v3092_v4 = vpop.eup %3091 }
 0x17d   :  { %v3094_v6 = vpop.eup %3093  ;;  %3095 = vtanh.f32 %v719_v61  ;;  %v725_v8 = vmul.f32 0.5, %v3092_v4  ;;  %v663_v61 = vsel %vm661_vm0, %v662_v51, 0.0 }
 0x17e   :  { %v726_v17 = vmul.f32 0.5, %v3094_v6  ;;  %3097 = vtanh.f32 %v720_v5 }
 0x17f   :  { %v728_v20 = vadd.f32 0.5, %v725_v8 }
 0x180   :  { %v729_v18 = vadd.f32 0.5, %v726_v17 }
 0x182   :  { %v702_v22 = vpop.f32.mrf.mxu2  ;;  %v715_v21 = vpop.f32.mrf.mxu3  ;;  %v731_v24 = vmul.f32 %v729_v18, %v3677_v29 }
 0x183   :  { %v3096_v23 = vpop.eup %3095 }
 0x184   :  { %v732_v28 = vmul.f32 %v3096_v23, %v728_v20  ;;  %v3098_v30 = vpop.eup %3097 }
 0x185   :  { %v727_v43 = vmul.f32 0.5, %v3098_v30 }
 0x186   :  { %v3721_v32 = vadd.f32 %v732_v28, %v731_v24 }
 0x187   :  { %v730_v45 = vadd.f32 0.5, %v727_v43 }
 0x188   :  { %3099 = vtanh.f32 %v3721_v32 }
 0x18e   :  { %v3100_v48 = vpop.eup %3099 }
 0x18f   :  { %v735_v52 = vmul.f32 %v3100_v48, %v730_v45 }
 0x191   :  { %v737_v29 = vperm.slane %v735_v52, 0  ;;  %v739_v60 = vpack.c.bf16 %v735_v52, %v735_v52 }
 0x193   :  { %v3733_v62 = vsel %vm736_vm1, %v737_v29, %v663_v61  ;;  %748 = vmatmul.bf16.vlgmr.msrb.gmra.mxu0 %v739_v60  ;;  %761 = vmatmul.bf16.vlgmr.msrb.gmra.mxu1 %v739_v60 }
 0x194   :  { %774 = vmatmul.bf16.vlgmr.msrb.gmra.mxu2 %v739_v60  ;;  %787 = vmatmul.bf16.vlgmr.msrb.gmra.mxu3 %v739_v60 }
 0x195   :  { %890 = vmatpush.bf16.msrb.mxu0 %v3501_v40  ;;  %903 = vmatpush.bf16.msrb.mxu1 %v3503_v41 }
 0x196   :  { %916 = vmatpush.bf16.msrb.mxu2 %v3505_v42  ;;  %929 = vmatpush.bf16.msrb.mxu3 %v3507_v46 }
 0x199   :  { %891 = vmatpush.bf16.msrb.mxu0 %v3510_v53  ;;  %904 = vmatpush.bf16.msrb.mxu1 %v3514_v54 }
 0x19a   :  { %917 = vmatpush.bf16.msrb.mxu2 %v3516_v55  ;;  %930 = vmatpush.bf16.msrb.mxu3 %v3519_v59 }
 0x19d   :  { %892 = vmatpush.bf16.msrb.mxu0 %v3522_v1  ;;  %905 = vmatpush.bf16.msrb.mxu1 %v3526_v2 }
 0x19e   :  { %918 = vmatpush.bf16.msrb.mxu2 %v3528_v3  ;;  %931 = vmatpush.bf16.msrb.mxu3 %v3531_v7 }
 0x1a1   :  { %893 = vmatpush.bf16.msrb.mxu0 %v3534_v13  ;;  %906 = vmatpush.bf16.msrb.mxu1 %v3538_v14 }
 0x1a2   :  { %919 = vmatpush.bf16.msrb.mxu2 %v3540_v15  ;;  %932 = vmatpush.bf16.msrb.mxu3 %v3543_v19 }
 0x1a5   :  { %894 = vmatpush.bf16.msrb.mxu0 %v3546_v25  ;;  %907 = vmatpush.bf16.msrb.mxu1 %v3550_v26 }
 0x1a6   :  { %920 = vmatpush.bf16.msrb.mxu2 %v3552_v27  ;;  %933 = vmatpush.bf16.msrb.mxu3 %v3555_v31 }
 0x1a9   :  { %895 = vmatpush.bf16.msrb.mxu0 %v3558_v37  ;;  %908 = vmatpush.bf16.msrb.mxu1 %v3562_v38 }
 0x1aa   :  { %921 = vmatpush.bf16.msrb.mxu2 %v3564_v39  ;;  %934 = vmatpush.bf16.msrb.mxu3 %v3567_v47 }
 0x1ad   :  { %896 = vmatpush.bf16.msrb.mxu0 %v3570_v56  ;;  %909 = vmatpush.bf16.msrb.mxu1 %v3574_v57 }
 0x1ae   :  { %922 = vmatpush.bf16.msrb.mxu2 %v3576_v58  ;;  %935 = vmatpush.bf16.msrb.mxu3 %v3579_v63 }
 0x1b1   :  { %897 = vmatpush.bf16.msrb.mxu0 %v3582_v9  ;;  %910 = vmatpush.bf16.msrb.mxu1 %v3586_v10 }
 0x1b2   :  { %923 = vmatpush.bf16.msrb.mxu2 %v3588_v11  ;;  %936 = vmatpush.bf16.msrb.mxu3 %v3591_v12 }
 0x210   :  { %v749_v36 = vpop.f32.mrf.mxu0  ;;  %v762_v0 = vpop.f32.mrf.mxu1 }
 0x211   :  { %v792_v4 = vadd.f32 %v749_v36, %v3665_v33  ;;  %v793_v5 = vadd.f32 %v762_v0, %v3667_v34 }
 0x213   :  { %3101 = vtanh.f32 %v792_v4 }
 0x214   :  { %3103 = vtanh.f32 %v793_v5 }
 0x217   :  { %v775_v6 = vpop.f32.mrf.mxu2  ;;  %v788_v8 = vpop.f32.mrf.mxu3 }
 0x218   :  { %v794_v17 = vadd.f32 %v775_v6, %v3671_v49  ;;  %v751_v18 = vpop.f32.mrf.mxu0  ;;  %v764_v20 = vpop.f32.mrf.mxu1  ;;  %v795_v21 = vadd.f32 %v788_v8, %v3673_v50 }
 0x219   :  { %v3102_v22 = vpop.eup %3101 }
 0x21a   :  { %v3104_v23 = vpop.eup %3103  ;;  %3105 = vtanh.f32 %v794_v17  ;;  %v800_v24 = vmul.f32 0.5, %v3102_v22 }
 0x21b   :  { %v801_v28 = vmul.f32 0.5, %v3104_v23  ;;  %3107 = vtanh.f32 %v795_v21 }
 0x21c   :  { %v803_v35 = vadd.f32 0.5, %v800_v24 }
 0x21d   :  { %v804_v30 = vadd.f32 0.5, %v801_v28 }
 0x21f   :  { %v777_v43 = vpop.f32.mrf.mxu2  ;;  %v790_v45 = vpop.f32.mrf.mxu3  ;;  %v806_v51 = vmul.f32 %v804_v30, %v3721_v32 }
 0x220   :  { %v3106_v48 = vpop.eup %3105 }
 0x221   :  { %v807_v52 = vmul.f32 %v3106_v48, %v803_v35  ;;  %v3108_v29 = vpop.eup %3107 }
 0x222   :  { %v802_v61 = vmul.f32 0.5, %v3108_v29 }
 0x223   :  { %v3772_v60 = vadd.f32 %v807_v52, %v806_v51 }
 0x224   :  { %v805_v36 = vadd.f32 0.5, %v802_v61 }
 0x225   :  { %3109 = vtanh.f32 %v3772_v60 }
 0x22b   :  { %v3110_v0 = vpop.eup %3109 }
 0x22c   :  { %v810_v4 = vmul.f32 %v3110_v0, %v805_v36 }
 0x22e   :  { %v812_v5 = vperm.slane %v810_v4, 0  ;;  %v814_v6 = vpack.c.bf16 %v810_v4, %v810_v4 }
 0x230   :  { %v3779_v8 = vsel %vm811_vm2, %v812_v5, %v3733_v62  ;;  %823 = vmatmul.bf16.vlgmr.msra.gmra.mxu0 %v814_v6  ;;  %836 = vmatmul.bf16.vlgmr.msra.gmra.mxu1 %v814_v6 }
 0x231   :  { %849 = vmatmul.bf16.vlgmr.msra.gmra.mxu2 %v814_v6  ;;  %862 = vmatmul.bf16.vlgmr.msra.gmra.mxu3 %v814_v6 }
 0x232   :  { %965 = vmatpush.bf16.msra.mxu0 %v3501_v40  ;;  %978 = vmatpush.bf16.msra.mxu1 %v3503_v41 }
 0x233   :  { %991 = vmatpush.bf16.msra.mxu2 %v3505_v42  ;;  %1004 = vmatpush.bf16.msra.mxu3 %v3507_v46 }
 0x236   :  { %966 = vmatpush.bf16.msra.mxu0 %v3510_v53  ;;  %979 = vmatpush.bf16.msra.mxu1 %v3514_v54 }
 0x237   :  { %992 = vmatpush.bf16.msra.mxu2 %v3516_v55  ;;  %1005 = vmatpush.bf16.msra.mxu3 %v3519_v59 }
 0x23a   :  { %967 = vmatpush.bf16.msra.mxu0 %v3522_v1  ;;  %980 = vmatpush.bf16.msra.mxu1 %v3526_v2 }
 0x23b   :  { %993 = vmatpush.bf16.msra.mxu2 %v3528_v3  ;;  %1006 = vmatpush.bf16.msra.mxu3 %v3531_v7 }
 0x23e   :  { %968 = vmatpush.bf16.msra.mxu0 %v3534_v13  ;;  %981 = vmatpush.bf16.msra.mxu1 %v3538_v14 }
 0x23f   :  { %994 = vmatpush.bf16.msra.mxu2 %v3540_v15  ;;  %1007 = vmatpush.bf16.msra.mxu3 %v3543_v19 }
 0x242   :  { %969 = vmatpush.bf16.msra.mxu0 %v3546_v25  ;;  %982 = vmatpush.bf16.msra.mxu1 %v3550_v26 }
 0x243   :  { %995 = vmatpush.bf16.msra.mxu2 %v3552_v27  ;;  %1008 = vmatpush.bf16.msra.mxu3 %v3555_v31 }
 0x246   :  { %970 = vmatpush.bf16.msra.mxu0 %v3558_v37  ;;  %983 = vmatpush.bf16.msra.mxu1 %v3562_v38 }
 0x247   :  { %996 = vmatpush.bf16.msra.mxu2 %v3564_v39  ;;  %1009 = vmatpush.bf16.msra.mxu3 %v3567_v47 }
 0x24a   :  { %971 = vmatpush.bf16.msra.mxu0 %v3570_v56  ;;  %984 = vmatpush.bf16.msra.mxu1 %v3574_v57 }
 0x24b   :  { %997 = vmatpush.bf16.msra.mxu2 %v3576_v58  ;;  %1010 = vmatpush.bf16.msra.mxu3 %v3579_v63 }
 0x24e   :  { %972 = vmatpush.bf16.msra.mxu0 %v3582_v9  ;;  %985 = vmatpush.bf16.msra.mxu1 %v3586_v10 }
 0x24f   :  { %998 = vmatpush.bf16.msra.mxu2 %v3588_v11  ;;  %1011 = vmatpush.bf16.msra.mxu3 %v3591_v12 }
 0x2ad   :  { %v824_v32 = vpop.f32.mrf.mxu0  ;;  %v837_v62 = vpop.f32.mrf.mxu1 }
 0x2ae   :  { %v867_v17 = vadd.f32 %v824_v32, %v3665_v33  ;;  %v868_v18 = vadd.f32 %v837_v62, %v3667_v34 }
 0x2b0   :  { %3111 = vtanh.f32 %v867_v17 }
 0x2b1   :  { %3113 = vtanh.f32 %v868_v18 }
 0x2b4   :  { %v850_v20 = vpop.f32.mrf.mxu2  ;;  %v863_v22 = vpop.f32.mrf.mxu3 }
 0x2b5   :  { %v869_v21 = vadd.f32 %v850_v20, %v3671_v49  ;;  %v826_v23 = vpop.f32.mrf.mxu0  ;;  %v839_v24 = vpop.f32.mrf.mxu1  ;;  %v870_v30 = vadd.f32 %v863_v22, %v3673_v50 }
 0x2b6   :  { %v3112_v28 = vpop.eup %3111 }
 0x2b7   :  { %v3114_v35 = vpop.eup %3113  ;;  %3115 = vtanh.f32 %v869_v21  ;;  %v875_v43 = vmul.f32 0.5, %v3112_v28 }
 0x2b8   :  { %v876_v45 = vmul.f32 0.5, %v3114_v35  ;;  %3117 = vtanh.f32 %v870_v30 }
 0x2b9   :  { %v878_v51 = vadd.f32 0.5, %v875_v43 }
 0x2ba   :  { %v879_v48 = vadd.f32 0.5, %v876_v45 }
 0x2bc   :  { %v852_v52 = vpop.f32.mrf.mxu2  ;;  %v865_v29 = vpop.f32.mrf.mxu3  ;;  %v881_v36 = vmul.f32 %v879_v48, %v3772_v60 }
 0x2bd   :  { %v3116_v61 = vpop.eup %3115 }
 0x2be   :  { %v882_v0 = vmul.f32 %v3116_v61, %v878_v51  ;;  %v3118_v4 = vpop.eup %3117 }
 0x2bf   :  { %v877_v6 = vmul.f32 0.5, %v3118_v4 }
 0x2c0   :  { %v3818_v5 = vadd.f32 %v882_v0, %v881_v36 }
 0x2c1   :  { %v880_v32 = vadd.f32 0.5, %v877_v6 }
 0x2c2   :  { %3119 = vtanh.f32 %v3818_v5 }
 0x2c8   :  { %v3120_v62 = vpop.eup %3119 }
 0x2c9   :  { %v885_v17 = vmul.f32 %v3120_v62, %v880_v32 }
 0x2cb   :  { %v887_v18 = vperm.slane %v885_v17, 0  ;;  %v889_v20 = vpack.c.bf16 %v885_v17, %v885_v17 }
 0x2cd   :  { %v3825_v22 = vsel %vm886_vm3, %v887_v18, %v3779_v8  ;;  %898 = vmatmul.bf16.vlgmr.msrb.gmra.mxu0 %v889_v20  ;;  %911 = vmatmul.bf16.vlgmr.msrb.gmra.mxu1 %v889_v20 }
 0x2ce   :  { %924 = vmatmul.bf16.vlgmr.msrb.gmra.mxu2 %v889_v20  ;;  %937 = vmatmul.bf16.vlgmr.msrb.gmra.mxu3 %v889_v20 }
 0x2cf   :  { %1040 = vmatpush.bf16.msrb.mxu0 %v3501_v40  ;;  %1053 = vmatpush.bf16.msrb.mxu1 %v3503_v41 }
 0x2d0   :  { %1066 = vmatpush.bf16.msrb.mxu2 %v3505_v42  ;;  %1079 = vmatpush.bf16.msrb.mxu3 %v3507_v46 }
 0x2d3   :  { %1041 = vmatpush.bf16.msrb.mxu0 %v3510_v53  ;;  %1054 = vmatpush.bf16.msrb.mxu1 %v3514_v54 }
 0x2d4   :  { %1067 = vmatpush.bf16.msrb.mxu2 %v3516_v55  ;;  %1080 = vmatpush.bf16.msrb.mxu3 %v3519_v59 }
 0x2d7   :  { %1042 = vmatpush.bf16.msrb.mxu0 %v3522_v1  ;;  %1055 = vmatpush.bf16.msrb.mxu1 %v3526_v2 }
 0x2d8   :  { %1068 = vmatpush.bf16.msrb.mxu2 %v3528_v3  ;;  %1081 = vmatpush.bf16.msrb.mxu3 %v3531_v7 }
 0x2db   :  { %1043 = vmatpush.bf16.msrb.mxu0 %v3534_v13  ;;  %1056 = vmatpush.bf16.msrb.mxu1 %v3538_v14 }
 0x2dc   :  { %1069 = vmatpush.bf16.msrb.mxu2 %v3540_v15  ;;  %1082 = vmatpush.bf16.msrb.mxu3 %v3543_v19 }
 0x2df   :  { %1044 = vmatpush.bf16.msrb.mxu0 %v3546_v25  ;;  %1057 = vmatpush.bf16.msrb.mxu1 %v3550_v26 }
 0x2e0   :  { %1070 = vmatpush.bf16.msrb.mxu2 %v3552_v27  ;;  %1083 = vmatpush.bf16.msrb.mxu3 %v3555_v31 }
 0x2e3   :  { %1045 = vmatpush.bf16.msrb.mxu0 %v3558_v37  ;;  %1058 = vmatpush.bf16.msrb.mxu1 %v3562_v38 }
 0x2e4   :  { %1071 = vmatpush.bf16.msrb.mxu2 %v3564_v39  ;;  %1084 = vmatpush.bf16.msrb.mxu3 %v3567_v47 }
 0x2e7   :  { %1046 = vmatpush.bf16.msrb.mxu0 %v3570_v56  ;;  %1059 = vmatpush.bf16.msrb.mxu1 %v3574_v57 }
 0x2e8   :  { %1072 = vmatpush.bf16.msrb.mxu2 %v3576_v58  ;;  %1085 = vmatpush.bf16.msrb.mxu3 %v3579_v63 }
 0x2eb   :  { %1047 = vmatpush.bf16.msrb.mxu0 %v3582_v9  ;;  %1060 = vmatpush.bf16.msrb.mxu1 %v3586_v10 }
 0x2ec   :  { %1073 = vmatpush.bf16.msrb.mxu2 %v3588_v11  ;;  %1086 = vmatpush.bf16.msrb.mxu3 %v3591_v12 }
 0x34a   :  { %v899_v60 = vpop.f32.mrf.mxu0  ;;  %v912_v8 = vpop.f32.mrf.mxu1 }
 0x34b   :  { %v942_v21 = vadd.f32 %v899_v60, %v3665_v33  ;;  %v943_v23 = vadd.f32 %v912_v8, %v3667_v34 }
 0x34d   :  { %3121 = vtanh.f32 %v942_v21 }
 0x34e   :  { %3123 = vtanh.f32 %v943_v23 }
 0x351   :  { %v925_v24 = vpop.f32.mrf.mxu2  ;;  %v938_v28 = vpop.f32.mrf.mxu3 }
 0x352   :  { %v944_v30 = vadd.f32 %v925_v24, %v3671_v49  ;;  %v901_v35 = vpop.f32.mrf.mxu0  ;;  %v914_v43 = vpop.f32.mrf.mxu1  ;;  %v945_v48 = vadd.f32 %v938_v28, %v3673_v50 }
 0x353   :  { %v3122_v45 = vpop.eup %3121 }
 0x354   :  { %v3124_v51 = vpop.eup %3123  ;;  %3125 = vtanh.f32 %v944_v30  ;;  %v950_v52 = vmul.f32 0.5, %v3122_v45 }
 0x355   :  { %v951_v29 = vmul.f32 0.5, %v3124_v51  ;;  %3127 = vtanh.f32 %v945_v48 }
 0x356   :  { %v953_v36 = vadd.f32 0.5, %v950_v52 }
 0x357   :  { %v954_v61 = vadd.f32 0.5, %v951_v29 }
 0x359   :  { %v927_v0 = vpop.f32.mrf.mxu2  ;;  %v940_v4 = vpop.f32.mrf.mxu3  ;;  %v956_v32 = vmul.f32 %v954_v61, %v3818_v5 }
 0x35a   :  { %v3126_v6 = vpop.eup %3125 }
 0x35b   :  { %v957_v62 = vmul.f32 %v3126_v6, %v953_v36  ;;  %v3128_v17 = vpop.eup %3127 }
 0x35c   :  { %v952_v20 = vmul.f32 0.5, %v3128_v17 }
 0x35d   :  { %v3864_v18 = vadd.f32 %v957_v62, %v956_v32 }
 0x35e   :  { %v955_v60 = vadd.f32 0.5, %v952_v20 }
 0x35f   :  { %3129 = vtanh.f32 %v3864_v18 }
 0x365   :  { %v3130_v8 = vpop.eup %3129 }
 0x366   :  { %v960_v21 = vmul.f32 %v3130_v8, %v955_v60 }
 0x368   :  { %v962_v23 = vperm.slane %v960_v21, 0  ;;  %v964_v24 = vpack.c.bf16 %v960_v21, %v960_v21 }
 0x36a   :  { %v3871_v28 = vsel %vm961_vm4, %v962_v23, %v3825_v22  ;;  %973 = vmatmul.bf16.vlgmr.msra.gmra.mxu0 %v964_v24  ;;  %986 = vmatmul.bf16.vlgmr.msra.gmra.mxu1 %v964_v24 }
 0x36b   :  { %999 = vmatmul.bf16.vlgmr.msra.gmra.mxu2 %v964_v24  ;;  %1012 = vmatmul.bf16.vlgmr.msra.gmra.mxu3 %v964_v24 }
 0x36c   :  { %1115 = vmatpush.bf16.msra.mxu0 %v3501_v40  ;;  %1128 = vmatpush.bf16.msra.mxu1 %v3503_v41 }
 0x36d   :  { %1141 = vmatpush.bf16.msra.mxu2 %v3505_v42  ;;  %1154 = vmatpush.bf16.msra.mxu3 %v3507_v46 }
 0x370   :  { %1116 = vmatpush.bf16.msra.mxu0 %v3510_v53  ;;  %1129 = vmatpush.bf16.msra.mxu1 %v3514_v54 }
 0x371   :  { %1142 = vmatpush.bf16.msra.mxu2 %v3516_v55  ;;  %1155 = vmatpush.bf16.msra.mxu3 %v3519_v59 }
 0x374   :  { %1117 = vmatpush.bf16.msra.mxu0 %v3522_v1  ;;  %1130 = vmatpush.bf16.msra.mxu1 %v3526_v2 }
 0x375   :  { %1143 = vmatpush.bf16.msra.mxu2 %v3528_v3  ;;  %1156 = vmatpush.bf16.msra.mxu3 %v3531_v7 }
 0x378   :  { %1118 = vmatpush.bf16.msra.mxu0 %v3534_v13  ;;  %1131 = vmatpush.bf16.msra.mxu1 %v3538_v14 }
 0x379   :  { %1144 = vmatpush.bf16.msra.mxu2 %v3540_v15  ;;  %1157 = vmatpush.bf16.msra.mxu3 %v3543_v19 }
 0x37c   :  { %1119 = vmatpush.bf16.msra.mxu0 %v3546_v25  ;;  %1132 = vmatpush.bf16.msra.mxu1 %v3550_v26 }
 0x37d   :  { %1145 = vmatpush.bf16.msra.mxu2 %v3552_v27  ;;  %1158 = vmatpush.bf16.msra.mxu3 %v3555_v31 }
 0x380   :  { %1120 = vmatpush.bf16.msra.mxu0 %v3558_v37  ;;  %1133 = vmatpush.bf16.msra.mxu1 %v3562_v38 }
 0x381   :  { %1146 = vmatpush.bf16.msra.mxu2 %v3564_v39  ;;  %1159 = vmatpush.bf16.msra.mxu3 %v3567_v47 }
 0x384   :  { %1121 = vmatpush.bf16.msra.mxu0 %v3570_v56  ;;  %1134 = vmatpush.bf16.msra.mxu1 %v3574_v57 }
 0x385   :  { %1147 = vmatpush.bf16.msra.mxu2 %v3576_v58  ;;  %1160 = vmatpush.bf16.msra.mxu3 %v3579_v63 }
 0x388   :  { %1122 = vmatpush.bf16.msra.mxu0 %v3582_v9  ;;  %1135 = vmatpush.bf16.msra.mxu1 %v3586_v10 }
 0x389   :  { %1148 = vmatpush.bf16.msra.mxu2 %v3588_v11  ;;  %1161 = vmatpush.bf16.msra.mxu3 %v3591_v12 }
 0x3e7   :  { %v974_v40 = vpop.f32.mrf.mxu0  ;;  %v987_v41 = vpop.f32.mrf.mxu1 }
 0x3e8   :  { %v1017_v42 = vadd.f32 %v974_v40, %v3665_v33  ;;  %v1018_v46 = vadd.f32 %v987_v41, %v3667_v34 }
 0x3ea   :  { %3131 = vtanh.f32 %v1017_v42 }
 0x3eb   :  { %3133 = vtanh.f32 %v1018_v46 }
 0x3ee   :  { %v1000_v53 = vpop.f32.mrf.mxu2  ;;  %v1013_v54 = vpop.f32.mrf.mxu3 }
 0x3ef   :  { %v1019_v55 = vadd.f32 %v1000_v53, %v3671_v49  ;;  %v976_v59 = vpop.f32.mrf.mxu0  ;;  %v989_v1 = vpop.f32.mrf.mxu1  ;;  %v1020_v3 = vadd.f32 %v1013_v54, %v3673_v50 }
 0x3f0   :  { %v3132_v2 = vpop.eup %3131 }
 0x3f1   :  { %v3134_v7 = vpop.eup %3133  ;;  %3135 = vtanh.f32 %v1019_v55  ;;  %v1025_v13 = vmul.f32 0.5, %v3132_v2 }
 0x3f2   :  { %v1026_v14 = vmul.f32 0.5, %v3134_v7  ;;  %3137 = vtanh.f32 %v1020_v3 }
 0x3f3   :  { %v1028_v19 = vadd.f32 0.5, %v1025_v13 }
 0x3f4   :  { %v1029_v15 = vadd.f32 0.5, %v1026_v14 }
 0x3f6   :  { %v1002_v25 = vpop.f32.mrf.mxu2  ;;  %v1015_v26 = vpop.f32.mrf.mxu3  ;;  %v1031_v31 = vmul.f32 %v1029_v15, %v3864_v18 }
 0x3f7   :  { %v3136_v27 = vpop.eup %3135 }
 0x3f8   :  { %v1032_v37 = vmul.f32 %v3136_v27, %v1028_v19  ;;  %v3138_v38 = vpop.eup %3137 }
 0x3f9   :  { %v1027_v47 = vmul.f32 0.5, %v3138_v38 }
 0x3fa   :  { %v1033_v39 = vadd.f32 %v1032_v37, %v1031_v31 }
 0x3fb   :  { %v1030_v56 = vadd.f32 0.5, %v1027_v47 }
 0x3fc   :  { %3139 = vtanh.f32 %v1033_v39 }
 0x402   :  { %v3140_v57 = vpop.eup %3139 }
 0x403   :  { %v1035_v58 = vmul.f32 %v3140_v57, %v1030_v56 }
 0x405   :  { %v1037_v63 = vperm.slane %v1035_v58, 0  ;;  %v1039_v9 = vpack.c.bf16 %v1035_v58, %v1035_v58 }
 0x407   :  { %v1038_v10 = vsel %vm1036_vm5, %v1037_v63, %v3871_v28  ;;  %1048 = vmatmul.bf16.vlgmr.msrb.gmra.mxu0 %v1039_v9  ;;  %1061 = vmatmul.bf16.vlgmr.msrb.gmra.mxu1 %v1039_v9 }
 0x408   :  { %1074 = vmatmul.bf16.vlgmr.msrb.gmra.mxu2 %v1039_v9  ;;  %1087 = vmatmul.bf16.vlgmr.msrb.gmra.mxu3 %v1039_v9 }
 0x484   :  { %v1049_v11 = vpop.f32.mrf.mxu0  ;;  %v1062_v12 = vpop.f32.mrf.mxu1 }
 0x485   :  { %v1092_v5 = vadd.f32 %v1049_v11, %v3665_v33  ;;  %v1093_v22 = vadd.f32 %v1062_v12, %v3667_v34 }
 0x487   :  { %3141 = vtanh.f32 %v1092_v5 }
 0x488   :  { %3143 = vtanh.f32 %v1093_v22 }
 0x48b   :  { %v1075_v30 = vpop.f32.mrf.mxu2  ;;  %v1088_v35 = vpop.f32.mrf.mxu3 }
 0x48c   :  { %v1094_v43 = vadd.f32 %v1075_v30, %v3671_v49  ;;  %v1051_v45 = vpop.f32.mrf.mxu0  ;;  %v1064_v48 = vpop.f32.mrf.mxu1  ;;  %v1095_v52 = vadd.f32 %v1088_v35, %v3673_v50 }
 0x48d   :  { %v3142_v51 = vpop.eup %3141 }
 0x48e   :  { %v3144_v29 = vpop.eup %3143  ;;  %3145 = vtanh.f32 %v1094_v43  ;;  %v1100_v61 = vmul.f32 0.5, %v3142_v51 }
 0x48f   :  { %v1101_v36 = vmul.f32 0.5, %v3144_v29  ;;  %3147 = vtanh.f32 %v1095_v52 }
 0x490   :  { %v1103_v4 = vadd.f32 0.5, %v1100_v61 }
 0x491   :  { %v1104_v0 = vadd.f32 0.5, %v1101_v36 }
 0x493   :  { %v1077_v6 = vpop.f32.mrf.mxu2  ;;  %v1090_v32 = vpop.f32.mrf.mxu3  ;;  %v1106_v17 = vmul.f32 %v1104_v0, %v1033_v39 }
 0x494   :  { %v3146_v62 = vpop.eup %3145 }
 0x495   :  { %v1107_v18 = vmul.f32 %v3146_v62, %v1103_v4  ;;  %v3148_v20 = vpop.eup %3147 }
 0x496   :  { %v1102_v8 = vmul.f32 0.5, %v3148_v20 }
 0x497   :  { %v1108_v60 = vadd.f32 %v1107_v18, %v1106_v17 }
 0x498   :  { %v1105_v21 = vadd.f32 0.5, %v1102_v8 }
 0x499   :  { %3149 = vtanh.f32 %v1108_v60 }
 0x49f   :  { %v3150_v23 = vpop.eup %3149 }
 0x4a0   :  { %v1110_v24 = vmul.f32 %v3150_v23, %v1105_v21 }
 0x4a2   :  { %v1112_v28 = vperm.slane %v1110_v24, 0  ;;  %v1114_v40 = vpack.c.bf16 %v1110_v24, %v1110_v24 }
 0x4a4   :  { %v1113_v41 = vsel %vm1111_vm6, %v1112_v28, %v1038_v10  ;;  %1123 = vmatmul.bf16.vlgmr.msra.gmra.mxu0 %v1114_v40  ;;  %1136 = vmatmul.bf16.vlgmr.msra.gmra.mxu1 %v1114_v40 }
 0x4a5   :  { %1149 = vmatmul.bf16.vlgmr.msra.gmra.mxu2 %v1114_v40  ;;  %1162 = vmatmul.bf16.vlgmr.msra.gmra.mxu3 %v1114_v40 }
 0x521   :  { %v1124_v42 = vpop.f32.mrf.mxu0  ;;  %v1137_v46 = vpop.f32.mrf.mxu1 }
 0x522   :  { %v1167_v53 = vadd.f32 %v1124_v42, %v3665_v33  ;;  %v1168_v54 = vadd.f32 %v1137_v46, %v3667_v34 }
 0x524   :  { %3151 = vtanh.f32 %v1167_v53 }
 0x525   :  { %3153 = vtanh.f32 %v1168_v54 }
 0x528   :  { %v1150_v55 = vpop.f32.mrf.mxu2  ;;  %v1163_v59 = vpop.f32.mrf.mxu3 }
 0x529   :  { %v1169_v1 = vadd.f32 %v1150_v55, %v3671_v49  ;;  %v1126_v2 = vpop.f32.mrf.mxu0  ;;  %v1139_v3 = vpop.f32.mrf.mxu1  ;;  %v1170_v13 = vadd.f32 %v1163_v59, %v3673_v50 }
 0x52a   :  { %v3152_v7 = vpop.eup %3151 }
 0x52b   :  { %v3154_v14 = vpop.eup %3153  ;;  %3155 = vtanh.f32 %v1169_v1  ;;  %v1175_v15 = vmul.f32 0.5, %v3152_v7 }
 0x52c   :  { %v1176_v19 = vmul.f32 0.5, %v3154_v14  ;;  %3157 = vtanh.f32 %v1170_v13 }
 0x52d   :  { %v1178_v33 = vadd.f32 0.5, %v1175_v15 }
 0x52e   :  { %v1179_v25 = vadd.f32 0.5, %v1176_v19 }
 0x530   :  { %v1152_v26 = vpop.f32.mrf.mxu2  ;;  %v1165_v34 = vpop.f32.mrf.mxu3  ;;  %v1181_v31 = vmul.f32 %v1179_v25, %v1108_v60 }
 0x531   :  { %v3156_v27 = vpop.eup %3155 }
 0x532   :  { %v1182_v37 = vmul.f32 %v3156_v27, %v1178_v33  ;;  %v3158_v38 = vpop.eup %3157 }
 0x533   :  { %v1177_v49 = vmul.f32 0.5, %v3158_v38 }
 0x534   :  { %v1183_v39 = vadd.f32 %v1182_v37, %v1181_v31 }
 0x535   :  { %v1180_v47 = vadd.f32 0.5, %v1177_v49 }
 0x536   :  { %3159 = vtanh.f32 %v1183_v39 }
 0x53c   :  { %v3160_v56 = vpop.eup %3159 }
 0x53d   :  { %v1185_v57 = vmul.f32 %v3160_v56, %v1180_v47 }
 0x53f   :  { %v1187_v50 = vperm.slane %v1185_v57, 0 }
 0x541   :  { %v3937_v58 = vsel %vm1186_vm7, %v1187_v50, %v1113_v41 }
 0x542   :  { %3416 = dma.done.wait [#allocation6], 4096 }
 0x543   :  { %3417 = vsyncadd [#allocation6], 4294963200 }
 0x544   :  { %3418 = dma.done.wait [#allocation6 + $0x1], 4096 }
 0x545   :  { %3419 = vsyncadd [#allocation6 + $0x1], 4294963200  ;;  %v2796_v63 = vld [vmem:[#allocation3 + $0xe0] sm:$0xf]  ;;  %v3035_v9 = vld [vmem:[#allocation3 + $0xec] sm:$0xf0] }
 0x546   :  { %v3033_v10 = vld [vmem:[#allocation3 + $0xe4] sm:$0xf]  ;;  %v2797_v11 = vor.u32 %v3035_v9, %v2796_v63  ;;  %v2798_v12 = vld [vmem:[#allocation3 + $0xf0] sm:$0xf0]  ;;  %v2804_v5 = vld [vmem:[#allocation3 + $0xe8] sm:$0xf] }
 0x547   :  { %v3036_v22 = vld [vmem:[#allocation3 + $0xf4] sm:$0xf0]  ;;  %v2801_v30 = vor.u32 %v3033_v10, %v2798_v12  ;;  %v3034_v43 = vld [vmem:[#allocation3 + $0xec] sm:$0xf]  ;;  %v2806_v45 = vld [vmem:[#allocation3 + $0xf8] sm:$0xf0] }
 0x548   :  { %v2805_v35 = vor.u32 %v3036_v22, %v2804_v5  ;;  %v2780_v48 = vld [vmem:[#allocation3 + $0xc0] sm:$0xf]  ;;  %1398 = vmatpush.bf16.msrb.mxu0 %v2797_v11  ;;  %v2809_v51 = vor.u32 %v3034_v43, %v2806_v45  ;;  %v3031_v52 = vld [vmem:[#allocation3 + $0xcc] sm:$0xf0]  ;;  %v3029_v29 = vld [vmem:[#allocation3 + $0xc4] sm:$0xf] }
 0x549   :  { %v2782_v61 = vld [vmem:[#allocation3 + $0xd0] sm:$0xf0]  ;;  %1411 = vmatpush.bf16.msrb.mxu1 %v2801_v30  ;;  %v2781_v36 = vor.u32 %v3031_v52, %v2780_v48  ;;  %v2788_v4 = vld [vmem:[#allocation3 + $0xc8] sm:$0xf]  ;;  %v3032_v6 = vld [vmem:[#allocation3 + $0xd4] sm:$0xf0] }
 0x54a   :  { %1424 = vmatpush.bf16.msrb.mxu2 %v2805_v35  ;;  %v2785_v0 = vor.u32 %v3029_v29, %v2782_v61  ;;  %v3030_v32 = vld [vmem:[#allocation3 + $0xcc] sm:$0xf]  ;;  %1437 = vmatpush.bf16.msrb.mxu3 %v2809_v51  ;;  %v2789_v62 = vor.u32 %v3032_v6, %v2788_v4  ;;  %v2790_v17 = vld [vmem:[#allocation3 + $0xd8] sm:$0xf0]  ;;  %v2764_v18 = vld [vmem:[#allocation3 + $0xa0] sm:$0xf] }
 0x54b   :  { %v3027_v20 = vld [vmem:[#allocation3 + $0xac] sm:$0xf0]  ;;  %v2793_v60 = vor.u32 %v3030_v32, %v2790_v17  ;;  %v3025_v8 = vld [vmem:[#allocation3 + $0xa4] sm:$0xf]  ;;  %v2766_v21 = vld [vmem:[#allocation3 + $0xb0] sm:$0xf0] }
 0x54c   :  { %v2772_v23 = vld [vmem:[#allocation3 + $0xa8] sm:$0xf]  ;;  %1399 = vmatpush.bf16.msrb.mxu0 %v2781_v36  ;;  %v2765_v24 = vor.u32 %v3027_v20, %v2764_v18  ;;  %v3028_v28 = vld [vmem:[#allocation3 + $0xb4] sm:$0xf0]  ;;  %v3026_v40 = vld [vmem:[#allocation3 + $0xac] sm:$0xf]  ;;  %v2769_v42 = vor.u32 %v3025_v8, %v2766_v21 }
 0x54d   :  { %v2774_v41 = vld [vmem:[#allocation3 + $0xb8] sm:$0xf0]  ;;  %1412 = vmatpush.bf16.msrb.mxu1 %v2785_v0  ;;  %v2773_v46 = vor.u32 %v3028_v28, %v2772_v23  ;;  %v2748_v53 = vld [vmem:[#allocation3 + $0x80] sm:$0xf]  ;;  %v3023_v54 = vld [vmem:[#allocation3 + $0x8c] sm:$0xf0] }
 0x54e   :  { %1425 = vmatpush.bf16.msrb.mxu2 %v2789_v62  ;;  %v3021_v55 = vld [vmem:[#allocation3 + $0x84] sm:$0xf]  ;;  %1438 = vmatpush.bf16.msrb.mxu3 %v2793_v60  ;;  %v2777_v59 = vor.u32 %v3026_v40, %v2774_v41  ;;  %v2750_v1 = vld [vmem:[#allocation3 + $0x90] sm:$0xf0]  ;;  %v2756_v2 = vld [vmem:[#allocation3 + $0x88] sm:$0xf]  ;;  %v2749_v14 = vor.u32 %v3023_v54, %v2748_v53 }
 0x54f   :  { %v3024_v3 = vld [vmem:[#allocation3 + $0x94] sm:$0xf0]  ;;  %v3022_v7 = vld [vmem:[#allocation3 + $0x8c] sm:$0xf]  ;;  %v2758_v13 = vld [vmem:[#allocation3 + $0x98] sm:$0xf0]  ;;  %v2753_v15 = vor.u32 %v3021_v55, %v2750_v1 }
 0x550   :  { %1400 = vmatpush.bf16.msrb.mxu0 %v2765_v24  ;;  %v2757_v19 = vor.u32 %v3024_v3, %v2756_v2  ;;  %v2732_v25 = vld [vmem:[#allocation3 + $0x60] sm:$0xf]  ;;  %v3019_v33 = vld [vmem:[#allocation3 + $0x6c] sm:$0xf0]  ;;  %v3017_v26 = vld [vmem:[#allocation3 + $0x64] sm:$0xf]  ;;  %v2761_v34 = vor.u32 %v3022_v7, %v2758_v13 }
 0x551   :  { %1413 = vmatpush.bf16.msrb.mxu1 %v2769_v42  ;;  %v2734_v27 = vld [vmem:[#allocation3 + $0x70] sm:$0xf0]  ;;  %v2740_v31 = vld [vmem:[#allocation3 + $0x68] sm:$0xf]  ;;  %v3020_v37 = vld [vmem:[#allocation3 + $0x74] sm:$0xf0]  ;;  %v2733_v49 = vor.u32 %v3019_v33, %v2732_v25 }
 0x552   :  { %1426 = vmatpush.bf16.msrb.mxu2 %v2773_v46  ;;  %1439 = vmatpush.bf16.msrb.mxu3 %v2777_v59  ;;  %v3018_v38 = vld [vmem:[#allocation3 + $0x6c] sm:$0xf]  ;;  %v2742_v39 = vld [vmem:[#allocation3 + $0x78] sm:$0xf0]  ;;  %v2737_v47 = vor.u32 %v3017_v26, %v2734_v27  ;;  %v2741_v56 = vor.u32 %v3020_v37, %v2740_v31  ;;  %v2716_v57 = vld [vmem:[#allocation3 + $0x40] sm:$0xf]  ;;  %v1195_v37 = vpack.c.bf16 %v3937_v58, %v3937_v58 }
 0x553   :  { %v3015_v50 = vld [vmem:[#allocation3 + $0x4c] sm:$0xf0]  ;;  %v3013_v63 = vld [vmem:[#allocation3 + $0x44] sm:$0xf]  ;;  %v2745_v9 = vor.u32 %v3018_v38, %v2742_v39  ;;  %v2718_v10 = vld [vmem:[#allocation3 + $0x50] sm:$0xf0] }
 0x554   :  { %1401 = vmatpush.bf16.msrb.mxu0 %v2749_v14  ;;  %v2724_v11 = vld [vmem:[#allocation3 + $0x48] sm:$0xf]  ;;  %v3016_v12 = vld [vmem:[#allocation3 + $0x54] sm:$0xf0]  ;;  %v3014_v5 = vld [vmem:[#allocation3 + $0x4c] sm:$0xf]  ;;  %v2717_v30 = vor.u32 %v3015_v50, %v2716_v57  ;;  %v2721_v35 = vor.u32 %v3013_v63, %v2718_v10 }
 0x555   :  { %1414 = vmatpush.bf16.msrb.mxu1 %v2753_v15  ;;  %v2726_v22 = vld [vmem:[#allocation3 + $0x58] sm:$0xf0]  ;;  %v2725_v43 = vor.u32 %v3016_v12, %v2724_v11  ;;  %v2700_v45 = vld [vmem:[#allocation3 + $0x20] sm:$0xf]  ;;  %v3011_v48 = vld [vmem:[#allocation3 + $0x2c] sm:$0xf0] }
 0x556   :  { %1427 = vmatpush.bf16.msrb.mxu2 %v2757_v19  ;;  %1440 = vmatpush.bf16.msrb.mxu3 %v2761_v34  ;;  %v3009_v51 = vld [vmem:[#allocation3 + $0x24] sm:$0xf]  ;;  %v2729_v52 = vor.u32 %v3014_v5, %v2726_v22  ;;  %v2702_v29 = vld [vmem:[#allocation3 + $0x30] sm:$0xf0]  ;;  %v2708_v61 = vld [vmem:[#allocation3 + $0x28] sm:$0xf]  ;;  %v2701_v6 = vor.u32 %v3011_v48, %v2700_v45 }
 0x557   :  { %v3012_v36 = vld [vmem:[#allocation3 + $0x34] sm:$0xf0]  ;;  %v3010_v0 = vld [vmem:[#allocation3 + $0x2c] sm:$0xf]  ;;  %v2710_v4 = vld [vmem:[#allocation3 + $0x38] sm:$0xf0]  ;;  %v2705_v17 = vor.u32 %v3009_v51, %v2702_v29 }
 0x558   :  { %1402 = vmatpush.bf16.msrb.mxu0 %v2733_v49  ;;  %v2684_v32 = vld [vmem:[#allocation3] sm:$0xf]  ;;  %v3007_v62 = vld [vmem:[#allocation3 + $0xc] sm:$0xf0]  ;;  %v2709_v18 = vor.u32 %v3012_v36, %v2708_v61  ;;  %v3005_v20 = vld [vmem:[#allocation3 + $0x4] sm:$0xf]  ;;  %v2713_v21 = vor.u32 %v3010_v0, %v2710_v4 }
 0x559   :  { %1415 = vmatpush.bf16.msrb.mxu1 %v2737_v47  ;;  %v2686_v60 = vld [vmem:[#allocation3 + $0x10] sm:$0xf0]  ;;  %v2692_v8 = vld [vmem:[#allocation3 + $0x8] sm:$0xf]  ;;  %v3008_v23 = vld [vmem:[#allocation3 + $0x14] sm:$0xf0]  ;;  %v2685_v46 = vor.u32 %v3007_v62, %v2684_v32 }
 0x55a   :  { %1428 = vmatpush.bf16.msrb.mxu2 %v2741_v56  ;;  %1441 = vmatpush.bf16.msrb.mxu3 %v2745_v9  ;;  %v3006_v24 = vld [vmem:[#allocation3 + $0xc] sm:$0xf]  ;;  %v2694_v28 = vld [vmem:[#allocation3 + $0x18] sm:$0xf0]  ;;  %v2924_v40 = vld [vmem:[#allocation4 + $0xe0] sm:$0xf]  ;;  %v2689_v59 = vor.u32 %v3005_v20, %v2686_v60  ;;  %v2693_v1 = vor.u32 %v3008_v23, %v2692_v8 }
 0x55b   :  { %v3067_v41 = vld [vmem:[#allocation4 + $0xec] sm:$0xf0]  ;;  %v3065_v42 = vld [vmem:[#allocation4 + $0xe4] sm:$0xf]  ;;  %v2926_v53 = vld [vmem:[#allocation4 + $0xf0] sm:$0xf0]  ;;  %v2697_v7 = vor.u32 %v3006_v24, %v2694_v28 }
 0x55c   :  { %1403 = vmatpush.bf16.msrb.mxu0 %v2717_v30  ;;  %v2932_v54 = vld [vmem:[#allocation4 + $0xe8] sm:$0xf]  ;;  %v3068_v55 = vld [vmem:[#allocation4 + $0xf4] sm:$0xf0]  ;;  %v3066_v2 = vld [vmem:[#allocation4 + $0xec] sm:$0xf]  ;;  %v3939_v13 = vor.u32 %v3067_v41, %v2924_v40  ;;  %v3941_v14 = vor.u32 %v3065_v42, %v2926_v53 }
 0x55d   :  { %1416 = vmatpush.bf16.msrb.mxu1 %v2721_v35  ;;  %v2934_v3 = vld [vmem:[#allocation4 + $0xf8] sm:$0xf0]  ;;  %v3943_v15 = vor.u32 %v3068_v55, %v2932_v54  ;;  %v2908_v19 = vld [vmem:[#allocation4 + $0xc0] sm:$0xf]  ;;  %v3063_v25 = vld [vmem:[#allocation4 + $0xcc] sm:$0xf0] }
 0x55e   :  { %1429 = vmatpush.bf16.msrb.mxu2 %v2725_v43  ;;  %1442 = vmatpush.bf16.msrb.mxu3 %v2729_v52  ;;  %v3061_v33 = vld [vmem:[#allocation4 + $0xc4] sm:$0xf]  ;;  %v3945_v26 = vor.u32 %v3066_v2, %v2934_v3  ;;  %v2910_v34 = vld [vmem:[#allocation4 + $0xd0] sm:$0xf0]  ;;  %v2916_v27 = vld [vmem:[#allocation4 + $0xc8] sm:$0xf]  ;;  %v3950_v49 = vor.u32 %v3063_v25, %v2908_v19 }
 0x55f   :  { %v3064_v31 = vld [vmem:[#allocation4 + $0xd4] sm:$0xf0]  ;;  %v3062_v38 = vld [vmem:[#allocation4 + $0xcc] sm:$0xf]  ;;  %v2918_v39 = vld [vmem:[#allocation4 + $0xd8] sm:$0xf0]  ;;  %v3954_v47 = vor.u32 %v3061_v33, %v2910_v34 }
 0x560   :  { %1404 = vmatpush.bf16.msrb.mxu0 %v2701_v6  ;;  %v3956_v56 = vor.u32 %v3064_v31, %v2916_v27  ;;  %v2892_v57 = vld [vmem:[#allocation4 + $0xa0] sm:$0xf]  ;;  %v3059_v50 = vld [vmem:[#allocation4 + $0xac] sm:$0xf0]  ;;  %v3057_v58 = vld [vmem:[#allocation4 + $0xa4] sm:$0xf]  ;;  %v3959_v63 = vor.u32 %v3062_v38, %v2918_v39 }
 0x561   :  { %1417 = vmatpush.bf16.msrb.mxu1 %v2705_v17  ;;  %v2894_v9 = vld [vmem:[#allocation4 + $0xb0] sm:$0xf0]  ;;  %v2900_v10 = vld [vmem:[#allocation4 + $0xa8] sm:$0xf]  ;;  %v3060_v11 = vld [vmem:[#allocation4 + $0xb4] sm:$0xf0]  ;;  %v3962_v22 = vor.u32 %v3059_v50, %v2892_v57 }
 0x562   :  { %1430 = vmatpush.bf16.msrb.mxu2 %v2709_v18  ;;  %1443 = vmatpush.bf16.msrb.mxu3 %v2713_v21  ;;  %v3058_v12 = vld [vmem:[#allocation4 + $0xac] sm:$0xf]  ;;  %v2902_v5 = vld [vmem:[#allocation4 + $0xb8] sm:$0xf0]  ;;  %v3966_v30 = vor.u32 %v3057_v58, %v2894_v9  ;;  %v3968_v35 = vor.u32 %v3060_v11, %v2900_v10  ;;  %v2876_v43 = vld [vmem:[#allocation4 + $0x80] sm:$0xf] }
 0x563   :  { %v3055_v45 = vld [vmem:[#allocation4 + $0x8c] sm:$0xf0]  ;;  %v3053_v48 = vld [vmem:[#allocation4 + $0x84] sm:$0xf]  ;;  %v3971_v51 = vor.u32 %v3058_v12, %v2902_v5  ;;  %v2878_v52 = vld [vmem:[#allocation4 + $0x90] sm:$0xf0] }
 0x564   :  { %1405 = vmatpush.bf16.msrb.mxu0 %v2685_v46  ;;  %v2884_v29 = vld [vmem:[#allocation4 + $0x88] sm:$0xf]  ;;  %v3056_v61 = vld [vmem:[#allocation4 + $0x94] sm:$0xf0]  ;;  %v3054_v36 = vld [vmem:[#allocation4 + $0x8c] sm:$0xf]  ;;  %v3974_v4 = vor.u32 %v3055_v45, %v2876_v43  ;;  %v3978_v6 = vor.u32 %v3053_v48, %v2878_v52 }
 0x565   :  { %1418 = vmatpush.bf16.msrb.mxu1 %v2689_v59  ;;  %v2886_v0 = vld [vmem:[#allocation4 + $0x98] sm:$0xf0]  ;;  %v3980_v32 = vor.u32 %v3056_v61, %v2884_v29  ;;  %v2860_v62 = vld [vmem:[#allocation4 + $0x60] sm:$0xf]  ;;  %v3051_v17 = vld [vmem:[#allocation4 + $0x6c] sm:$0xf0] }
 0x566   :  { %1431 = vmatpush.bf16.msrb.mxu2 %v2693_v1  ;;  %1444 = vmatpush.bf16.msrb.mxu3 %v2697_v7  ;;  %v3049_v18 = vld [vmem:[#allocation4 + $0x64] sm:$0xf]  ;;  %v3983_v20 = vor.u32 %v3054_v36, %v2886_v0  ;;  %v2862_v60 = vld [vmem:[#allocation4 + $0x70] sm:$0xf0]  ;;  %v2868_v8 = vld [vmem:[#allocation4 + $0x68] sm:$0xf]  ;;  %v3986_v28 = vor.u32 %v3051_v17, %v2860_v62 }
 0x567   :  { %1406 = vmatmul.bf16.vlgmr.msrb.gmra.mxu0 %v1195_v37  ;;  %v3052_v21 = vld [vmem:[#allocation4 + $0x74] sm:$0xf0]  ;;  %v3050_v23 = vld [vmem:[#allocation4 + $0x6c] sm:$0xf]  ;;  %v2870_v24 = vld [vmem:[#allocation4 + $0x78] sm:$0xf0]  ;;  %v3990_v40 = vor.u32 %v3049_v18, %v2862_v60 }
 0x568   :  { %1647 = vmatpush.bf16.msra.mxu0 %v3939_v13  ;;  %1419 = vmatmul.bf16.vlgmr.msrb.gmra.mxu1 %v1195_v37  ;;  %v3992_v41 = vor.u32 %v3052_v21, %v2868_v8  ;;  %v2844_v42 = vld [vmem:[#allocation4 + $0x40] sm:$0xf]  ;;  %v3047_v46 = vld [vmem:[#allocation4 + $0x4c] sm:$0xf0]  ;;  %v3045_v53 = vld [vmem:[#allocation4 + $0x44] sm:$0xf]  ;;  %v3995_v54 = vor.u32 %v3050_v23, %v2870_v24 }
 0x569   :  { %1660 = vmatpush.bf16.msra.mxu1 %v3941_v14  ;;  %1432 = vmatmul.bf16.vlgmr.msrb.gmra.mxu2 %v1195_v37  ;;  %v2846_v55 = vld [vmem:[#allocation4 + $0x50] sm:$0xf0]  ;;  %v2852_v59 = vld [vmem:[#allocation4 + $0x48] sm:$0xf]  ;;  %v3048_v1 = vld [vmem:[#allocation4 + $0x54] sm:$0xf0]  ;;  %v3998_v7 = vor.u32 %v3047_v46, %v2844_v42 }
 0x56a   :  { %1673 = vmatpush.bf16.msra.mxu2 %v3943_v15  ;;  %1686 = vmatpush.bf16.msra.mxu3 %v3945_v26  ;;  %v3046_v2 = vld [vmem:[#allocation4 + $0x4c] sm:$0xf]  ;;  %v2854_v3 = vld [vmem:[#allocation4 + $0x58] sm:$0xf0]  ;;  %v4002_v19 = vor.u32 %v3045_v53, %v2846_v55  ;;  %v4004_v25 = vor.u32 %v3048_v1, %v2852_v59  ;;  %v2828_v33 = vld [vmem:[#allocation4 + $0x20] sm:$0xf] }
 0x56b   :  { %1445 = vmatmul.bf16.vlgmr.msrb.gmra.mxu3 %v1195_v37  ;;  %v3043_v34 = vld [vmem:[#allocation4 + $0x2c] sm:$0xf0]  ;;  %v3041_v27 = vld [vmem:[#allocation4 + $0x24] sm:$0xf]  ;;  %v4007_v31 = vor.u32 %v3046_v2, %v2854_v3  ;;  %v2830_v37 = vld [vmem:[#allocation4 + $0x30] sm:$0xf0] }
 0x56c   :  { %1648 = vmatpush.bf16.msra.mxu0 %v3950_v49  ;;  %v2836_v38 = vld [vmem:[#allocation4 + $0x28] sm:$0xf]  ;;  %v3044_v39 = vld [vmem:[#allocation4 + $0x34] sm:$0xf0]  ;;  %v3042_v57 = vld [vmem:[#allocation4 + $0x2c] sm:$0xf]  ;;  %v4010_v58 = vor.u32 %v3043_v34, %v2828_v33  ;;  %v4014_v9 = vor.u32 %v3041_v27, %v2830_v37 }
 0x56d   :  { %1661 = vmatpush.bf16.msra.mxu1 %v3954_v47  ;;  %v2838_v50 = vld [vmem:[#allocation4 + $0x38] sm:$0xf0]  ;;  %v4016_v10 = vor.u32 %v3044_v39, %v2836_v38  ;;  %v2812_v11 = vld [vmem:[#allocation4] sm:$0xf]  ;;  %v3039_v12 = vld [vmem:[#allocation4 + $0xc] sm:$0xf0] }
 0x56e   :  { %1674 = vmatpush.bf16.msra.mxu2 %v3956_v56  ;;  %1687 = vmatpush.bf16.msra.mxu3 %v3959_v63  ;;  %v3037_v5 = vld [vmem:[#allocation4 + $0x4] sm:$0xf]  ;;  %v4019_v43 = vor.u32 %v3042_v57, %v2838_v50  ;;  %v2814_v45 = vld [vmem:[#allocation4 + $0x10] sm:$0xf0]  ;;  %v2820_v48 = vld [vmem:[#allocation4 + $0x8] sm:$0xf]  ;;  %v4022_v36 = vor.u32 %v3039_v12, %v2812_v11 }
 0x56f   :  { %v3040_v52 = vld [vmem:[#allocation4 + $0x14] sm:$0xf0]  ;;  %v3038_v29 = vld [vmem:[#allocation4 + $0xc] sm:$0xf]  ;;  %v2822_v61 = vld [vmem:[#allocation4 + $0x18] sm:$0xf0]  ;;  %v4026_v0 = vor.u32 %v3037_v5, %v2814_v45 }
 0x570   :  { %1649 = vmatpush.bf16.msra.mxu0 %v3962_v22  ;;  %v4028_v62 = vor.u32 %v3040_v52, %v2820_v48  ;;  %v4031_v17 = vor.u32 %v3038_v29, %v2822_v61  ;;  %vm1706_vm8 = vcmask 1040384   ;;  %vm1708_vm9 = vcmask 1042434  }
 0x571   :  { %1662 = vmatpush.bf16.msra.mxu1 %v3966_v30  ;;  %vm1710_vm10 = vcmask 1041408  }
 0x572   :  { %1675 = vmatpush.bf16.msra.mxu2 %v3968_v35  ;;  %1688 = vmatpush.bf16.msra.mxu3 %v3971_v51 }
 0x574   :  { %1650 = vmatpush.bf16.msra.mxu0 %v3974_v4 }
 0x575   :  { %1663 = vmatpush.bf16.msra.mxu1 %v3978_v6 }
 0x576   :  { %1676 = vmatpush.bf16.msra.mxu2 %v3980_v32  ;;  %1689 = vmatpush.bf16.msra.mxu3 %v3983_v20 }
 0x578   :  { %1651 = vmatpush.bf16.msra.mxu0 %v3986_v28 }
 0x579   :  { %1664 = vmatpush.bf16.msra.mxu1 %v3990_v40 }
 0x57a   :  { %1677 = vmatpush.bf16.msra.mxu2 %v3992_v41  ;;  %1690 = vmatpush.bf16.msra.mxu3 %v3995_v54 }
 0x57c   :  { %1652 = vmatpush.bf16.msra.mxu0 %v3998_v7 }
 0x57d   :  { %1665 = vmatpush.bf16.msra.mxu1 %v4002_v19 }
 0x57e   :  { %1678 = vmatpush.bf16.msra.mxu2 %v4004_v25  ;;  %1691 = vmatpush.bf16.msra.mxu3 %v4007_v31 }
 0x580   :  { %1653 = vmatpush.bf16.msra.mxu0 %v4010_v58 }
 0x581   :  { %1666 = vmatpush.bf16.msra.mxu1 %v4014_v9 }
 0x582   :  { %1679 = vmatpush.bf16.msra.mxu2 %v4016_v10  ;;  %1692 = vmatpush.bf16.msra.mxu3 %v4019_v43 }
 0x584   :  { %1654 = vmatpush.bf16.msra.mxu0 %v4022_v36 }
 0x585   :  { %1667 = vmatpush.bf16.msra.mxu1 %v4026_v0 }
 0x586   :  { %1680 = vmatpush.bf16.msra.mxu2 %v4028_v62  ;;  %1693 = vmatpush.bf16.msra.mxu3 %v4031_v17 }
 0x587   :  { %1655 = vmatmul.bf16.vlgmr.msra.gmra.mxu0 %v3431_v16 }
 0x588   :  { %1737 = vmatpush.bf16.msrb.mxu0 %v3939_v13  ;;  %1668 = vmatmul.bf16.vlgmr.msra.gmra.mxu1 %v3431_v16 }
 0x589   :  { %1750 = vmatpush.bf16.msrb.mxu1 %v3941_v14  ;;  %1681 = vmatmul.bf16.vlgmr.msra.gmra.mxu2 %v3431_v16 }
 0x58a   :  { %1694 = vmatmul.bf16.vlgmr.msra.gmra.mxu3 %v3431_v16  ;;  %1763 = vmatpush.bf16.msrb.mxu2 %v3943_v15  ;;  %v1228_v16 = vld [vmem:[#allocation15] sm:$0xf] }
 0x58b   :  { %1776 = vmatpush.bf16.msrb.mxu3 %v3945_v26  ;;  %v1231_v18 = vperm.slane %v1228_v16, 1  ;;  %v1230_v8 = vperm.slane %v1228_v16, 0  ;;  %v1232_v23 = vperm.slane %v1228_v16, 2  ;;  %v1233_v24 = vperm.slane %v1228_v16, 3 }
 0x58c   :  { %1738 = vmatpush.bf16.msrb.mxu0 %v3950_v49 }
 0x58d   :  { %1751 = vmatpush.bf16.msrb.mxu1 %v3954_v47 }
 0x58e   :  { %1764 = vmatpush.bf16.msrb.mxu2 %v3956_v56 }
 0x58f   :  { %1777 = vmatpush.bf16.msrb.mxu3 %v3959_v63 }
 0x590   :  { %1739 = vmatpush.bf16.msrb.mxu0 %v3962_v22 }
 0x591   :  { %1752 = vmatpush.bf16.msrb.mxu1 %v3966_v30 }
 0x592   :  { %1765 = vmatpush.bf16.msrb.mxu2 %v3968_v35 }
 0x593   :  { %1778 = vmatpush.bf16.msrb.mxu3 %v3971_v51 }
 0x594   :  { %1740 = vmatpush.bf16.msrb.mxu0 %v3974_v4 }
 0x595   :  { %1753 = vmatpush.bf16.msrb.mxu1 %v3978_v6 }
 0x596   :  { %1766 = vmatpush.bf16.msrb.mxu2 %v3980_v32 }
 0x597   :  { %1779 = vmatpush.bf16.msrb.mxu3 %v3983_v20 }
 0x598   :  { %1741 = vmatpush.bf16.msrb.mxu0 %v3986_v28 }
 0x599   :  { %1754 = vmatpush.bf16.msrb.mxu1 %v3990_v40 }
 0x59a   :  { %1767 = vmatpush.bf16.msrb.mxu2 %v3992_v41 }
 0x59b   :  { %1780 = vmatpush.bf16.msrb.mxu3 %v3995_v54 }
 0x59c   :  { %1742 = vmatpush.bf16.msrb.mxu0 %v3998_v7 }
 0x59d   :  { %1755 = vmatpush.bf16.msrb.mxu1 %v4002_v19 }
 0x59e   :  { %1768 = vmatpush.bf16.msrb.mxu2 %v4004_v25 }
 0x59f   :  { %1781 = vmatpush.bf16.msrb.mxu3 %v4007_v31 }
 0x5a0   :  { %1743 = vmatpush.bf16.msrb.mxu0 %v4010_v58 }
 0x5a1   :  { %1756 = vmatpush.bf16.msrb.mxu1 %v4014_v9 }
 0x5a2   :  { %1769 = vmatpush.bf16.msrb.mxu2 %v4016_v10 }
 0x5a3   :  { %1782 = vmatpush.bf16.msrb.mxu3 %v4019_v43 }
 0x5a4   :  { %1744 = vmatpush.bf16.msrb.mxu0 %v4022_v36 }
 0x5a5   :  { %1757 = vmatpush.bf16.msrb.mxu1 %v4026_v0 }
 0x5a6   :  { %1770 = vmatpush.bf16.msrb.mxu2 %v4028_v62 }
 0x5a7   :  { %1783 = vmatpush.bf16.msrb.mxu3 %v4031_v17 }
 0x5a8   :  { %1824 = vmatpush.bf16.msra.mxu0 %v3939_v13 }
 0x5a9   :  { %1837 = vmatpush.bf16.msra.mxu1 %v3941_v14 }
 0x5aa   :  { %1850 = vmatpush.bf16.msra.mxu2 %v3943_v15 }
 0x5ab   :  { %1863 = vmatpush.bf16.msra.mxu3 %v3945_v26 }
 0x5ac   :  { %1825 = vmatpush.bf16.msra.mxu0 %v3950_v49 }
 0x5ad   :  { %1838 = vmatpush.bf16.msra.mxu1 %v3954_v47 }
 0x5ae   :  { %1851 = vmatpush.bf16.msra.mxu2 %v3956_v56 }
 0x5af   :  { %1864 = vmatpush.bf16.msra.mxu3 %v3959_v63 }
 0x5b0   :  { %1826 = vmatpush.bf16.msra.mxu0 %v3962_v22 }
 0x5b1   :  { %1839 = vmatpush.bf16.msra.mxu1 %v3966_v30 }
 0x5b2   :  { %1852 = vmatpush.bf16.msra.mxu2 %v3968_v35 }
 0x5b3   :  { %1865 = vmatpush.bf16.msra.mxu3 %v3971_v51 }
 0x5b4   :  { %1827 = vmatpush.bf16.msra.mxu0 %v3974_v4 }
 0x5b5   :  { %1840 = vmatpush.bf16.msra.mxu1 %v3978_v6 }
 0x5b6   :  { %1853 = vmatpush.bf16.msra.mxu2 %v3980_v32 }
 0x5b7   :  { %1866 = vmatpush.bf16.msra.mxu3 %v3983_v20 }
 0x5b8   :  { %1828 = vmatpush.bf16.msra.mxu0 %v3986_v28 }
 0x5b9   :  { %1841 = vmatpush.bf16.msra.mxu1 %v3990_v40 }
 0x5ba   :  { %1854 = vmatpush.bf16.msra.mxu2 %v3992_v41 }
 0x5bb   :  { %1867 = vmatpush.bf16.msra.mxu3 %v3995_v54 }
 0x5bc   :  { %1829 = vmatpush.bf16.msra.mxu0 %v3998_v7 }
 0x5bd   :  { %1842 = vmatpush.bf16.msra.mxu1 %v4002_v19 }
 0x5be   :  { %1855 = vmatpush.bf16.msra.mxu2 %v4004_v25 }
 0x5bf   :  { %1868 = vmatpush.bf16.msra.mxu3 %v4007_v31 }
 0x5c0   :  { %1830 = vmatpush.bf16.msra.mxu0 %v4010_v58 }
 0x5c1   :  { %1843 = vmatpush.bf16.msra.mxu1 %v4014_v9 }
 0x5c2   :  { %1856 = vmatpush.bf16.msra.mxu2 %v4016_v10 }
 0x5c3   :  { %1869 = vmatpush.bf16.msra.mxu3 %v4019_v43 }
 0x5c4   :  { %1831 = vmatpush.bf16.msra.mxu0 %v4022_v36 }
 0x5c5   :  { %1844 = vmatpush.bf16.msra.mxu1 %v4026_v0 }
 0x5c6   :  { %1857 = vmatpush.bf16.msra.mxu2 %v4028_v62 }
 0x5c7   :  { %1870 = vmatpush.bf16.msra.mxu3 %v4031_v17 }
 0x5e4   :  { %v1407_v42 = vpop.f32.mrf.mxu0 }
 0x5e5   :  { %v1420_v60 = vpop.f32.mrf.mxu1  ;;  %v1408_v46 = vadd.f32 %v1407_v42, %v1230_v8 }
 0x5e6   :  { %v1421_v21 = vadd.f32 %v1420_v60, %v1231_v18 }
 0x5e7   :  { %1450 = vst [vmem:[#allocation2] sm:$0xff] %v1408_v46 }
 0x5e8   :  { %1451 = vst [vmem:[#allocation2 + $0x8] sm:$0xff] %v1421_v21 }
 0x5ec   :  { %v1433_v53 = vpop.f32.mrf.mxu2  ;;  %v1409_v3 = vpop.f32.mrf.mxu0 }
 0x5ed   :  { %v1434_v55 = vadd.f32 %v1433_v53, %v1232_v23  ;;  %v1422_v2 = vpop.f32.mrf.mxu1 }
 0x5ee   :  { %v1446_v59 = vpop.f32.mrf.mxu3 }
 0x5ef   :  { %v1447_v1 = vadd.f32 %v1446_v59, %v1233_v24  ;;  %1452 = vst [vmem:[#allocation2 + $0x10] sm:$0xff] %v1434_v55 }
 0x5f1   :  { %1453 = vst [vmem:[#allocation2 + $0x18] sm:$0xff] %v1447_v1 }
 0x5f4   :  { %v1435_v33 = vpop.f32.mrf.mxu2 }
 0x5f6   :  { %v1448_v34 = vpop.f32.mrf.mxu3 }
 0x5f8   :  { %v1454_v52 = vld [vmem:[#allocation2] ss:$8 sm:$0xf] }
 0x604   :  { %v1656_v27 = vpop.f32.mrf.mxu0 }
 0x605   :  { %v1669_v37 = vpop.f32.mrf.mxu1 }
 0x606   :  { %v1703_v38 = vrot.slane %v1669_v37, 7 }
 0x608   :  { %v1707_v12 = vsel %vm1706_vm8, %v1656_v27, %v1703_v38 }
 0x60c   :  { %v1682_v39 = vpop.f32.mrf.mxu2  ;;  %v1658_v11 = vpop.f32.mrf.mxu0 }
 0x60d   :  { %v1704_v57 = vrot.slane %v1682_v39, 6  ;;  %v1695_v50 = vpop.f32.mrf.mxu3  ;;  %v1671_v45 = vpop.f32.mrf.mxu1 }
 0x60e   :  { %v1705_v5 = vrot.slane %v1695_v50, 5 }
 0x610   :  { %v1709_v48 = vsel %vm1708_vm9, %v1704_v57, %v1705_v5  ;;  %v1735_v5 = vld [vmem:[#allocation2 + $0x1] ss:$8 sm:$0xf] }
 0x611   :  { %v1711_v29 = vsel %vm1710_vm10, %v1707_v12, %v1709_v48 }
 0x612   :  { %v1713_v61 = vadd.f32 %v1711_v29, %v1454_v52 }
 0x614   :  { %3161 = vtanh.f32 %v1713_v61  ;;  %v1684_v16 = vpop.f32.mrf.mxu2 }
 0x615   :  { %v1697_v18 = vpop.f32.mrf.mxu3 }
 0x61a   :  { %v3162_v60 = vpop.eup %3161 }
 0x61b   :  { %v1715_v8 = vmul.f32 0.5, %v3162_v60  ;;  %v1722_v23 = vrot.slane %v3162_v60, 2 }
 0x61d   :  { %v1716_v21 = vadd.f32 0.5, %v1715_v8 }
 0x61f   :  { %v1718_v24 = vrot.slane %v1716_v21, 1  ;;  %v1724_v46 = vmul.f32 %v1722_v23, %v1716_v21  ;;  %v1727_v55 = vrot.slane %v1716_v21, 3 }
 0x621   :  { %v1720_v42 = vmul.f32 0.0, %v1718_v24 }
 0x623   :  { %v4108_v53 = vadd.f32 %v1724_v46, %v1720_v42 }
 0x625   :  { %3163 = vtanh.f32 %v4108_v53 }
 0x62b   :  { %v3164_v59 = vpop.eup %3163 }
 0x62c   :  { %v4111_v1 = vmul.f32 %v3164_v59, %v1727_v55 }
 0x62e   :  { %v1736_v2 = vpack.c.bf16 %v4111_v1, %v4111_v1  ;;  %v1731_v55 = vperm.slane %v4111_v1, 0 }
 0x630   :  { %1745 = vmatmul.bf16.vlgmr.msrb.gmra.mxu0 %v1736_v2  ;;  %1758 = vmatmul.bf16.vlgmr.msrb.gmra.mxu1 %v1736_v2 }
 0x631   :  { %1771 = vmatmul.bf16.vlgmr.msrb.gmra.mxu2 %v1736_v2  ;;  %1784 = vmatmul.bf16.vlgmr.msrb.gmra.mxu3 %v1736_v2 }
 0x632   :  { %1911 = vmatpush.bf16.msrb.mxu0 %v3939_v13  ;;  %1924 = vmatpush.bf16.msrb.mxu1 %v3941_v14 }
 0x633   :  { %1937 = vmatpush.bf16.msrb.mxu2 %v3943_v15  ;;  %1950 = vmatpush.bf16.msrb.mxu3 %v3945_v26 }
 0x636   :  { %1912 = vmatpush.bf16.msrb.mxu0 %v3950_v49  ;;  %1925 = vmatpush.bf16.msrb.mxu1 %v3954_v47 }
 0x637   :  { %1938 = vmatpush.bf16.msrb.mxu2 %v3956_v56  ;;  %1951 = vmatpush.bf16.msrb.mxu3 %v3959_v63 }
 0x63a   :  { %1913 = vmatpush.bf16.msrb.mxu0 %v3962_v22  ;;  %1926 = vmatpush.bf16.msrb.mxu1 %v3966_v30 }
 0x63b   :  { %1939 = vmatpush.bf16.msrb.mxu2 %v3968_v35  ;;  %1952 = vmatpush.bf16.msrb.mxu3 %v3971_v51 }
 0x63e   :  { %1914 = vmatpush.bf16.msrb.mxu0 %v3974_v4  ;;  %1927 = vmatpush.bf16.msrb.mxu1 %v3978_v6 }
 0x63f   :  { %1940 = vmatpush.bf16.msrb.mxu2 %v3980_v32  ;;  %1953 = vmatpush.bf16.msrb.mxu3 %v3983_v20 }
 0x642   :  { %1915 = vmatpush.bf16.msrb.mxu0 %v3986_v28  ;;  %1928 = vmatpush.bf16.msrb.mxu1 %v3990_v40 }
 0x643   :  { %1941 = vmatpush.bf16.msrb.mxu2 %v3992_v41  ;;  %1954 = vmatpush.bf16.msrb.mxu3 %v3995_v54 }
 0x646   :  { %1916 = vmatpush.bf16.msrb.mxu0 %v3998_v7  ;;  %1929 = vmatpush.bf16.msrb.mxu1 %v4002_v19 }
 0x647   :  { %1942 = vmatpush.bf16.msrb.mxu2 %v4004_v25  ;;  %1955 = vmatpush.bf16.msrb.mxu3 %v4007_v31 }
 0x64a   :  { %1917 = vmatpush.bf16.msrb.mxu0 %v4010_v58  ;;  %1930 = vmatpush.bf16.msrb.mxu1 %v4014_v9 }
 0x64b   :  { %1943 = vmatpush.bf16.msrb.mxu2 %v4016_v10  ;;  %1956 = vmatpush.bf16.msrb.mxu3 %v4019_v43 }
 0x64e   :  { %1918 = vmatpush.bf16.msrb.mxu0 %v4022_v36  ;;  %1931 = vmatpush.bf16.msrb.mxu1 %v4026_v0 }
 0x64f   :  { %1944 = vmatpush.bf16.msrb.mxu2 %v4028_v62  ;;  %1957 = vmatpush.bf16.msrb.mxu3 %v4031_v17 }
 0x6ad   :  { %v1746_v3 = vpop.f32.mrf.mxu0  ;;  %v1759_v33 = vpop.f32.mrf.mxu1 }
 0x6ae   :  { %v1793_v34 = vrot.slane %v1759_v33, 7  ;;  %v1733_v33 = vsel %vm661_vm0, %v1731_v55, 0.0 }
 0x6b0   :  { %v1796_v11 = vsel %vm1706_vm8, %v1746_v3, %v1793_v34 }
 0x6b4   :  { %v1772_v27 = vpop.f32.mrf.mxu2  ;;  %v1785_v37 = vpop.f32.mrf.mxu3 }
 0x6b5   :  { %v1794_v38 = vrot.slane %v1772_v27, 6  ;;  %v1795_v39 = vrot.slane %v1785_v37, 5  ;;  %v1748_v57 = vpop.f32.mrf.mxu0  ;;  %v1761_v50 = vpop.f32.mrf.mxu1 }
 0x6b7   :  { %v1797_v12 = vsel %vm1708_vm9, %v1794_v38, %v1795_v39 }
 0x6b8   :  { %v1798_v45 = vsel %vm1710_vm10, %v1796_v11, %v1797_v12 }
 0x6b9   :  { %v1800_v48 = vadd.f32 %v1798_v45, %v1735_v5  ;;  %v1822_v45 = vld [vmem:[#allocation2 + $0x2] ss:$8 sm:$0xf] }
 0x6bb   :  { %3165 = vtanh.f32 %v1800_v48 }
 0x6bc   :  { %v1774_v52 = vpop.f32.mrf.mxu2  ;;  %v1787_v29 = vpop.f32.mrf.mxu3 }
 0x6c1   :  { %v3166_v61 = vpop.eup %3165 }
 0x6c2   :  { %v1802_v16 = vmul.f32 0.5, %v3166_v61  ;;  %v1809_v60 = vrot.slane %v3166_v61, 2 }
 0x6c4   :  { %v1803_v18 = vadd.f32 0.5, %v1802_v16 }
 0x6c6   :  { %v1805_v8 = vrot.slane %v1803_v18, 1  ;;  %v1811_v23 = vmul.f32 %v1809_v60, %v1803_v18  ;;  %v1814_v42 = vrot.slane %v1803_v18, 3 }
 0x6c8   :  { %v1807_v21 = vmul.f32 %v1805_v8, %v4108_v53 }
 0x6ca   :  { %v4151_v24 = vadd.f32 %v1811_v23, %v1807_v21 }
 0x6cc   :  { %3167 = vtanh.f32 %v4151_v24 }
 0x6d2   :  { %v3168_v46 = vpop.eup %3167 }
 0x6d3   :  { %v1816_v59 = vmul.f32 %v3168_v46, %v1814_v42 }
 0x6d5   :  { %v1818_v2 = vperm.slane %v1816_v59, 0  ;;  %v1823_v3 = vpack.c.bf16 %v1816_v59, %v1816_v59 }
 0x6d7   :  { %v4159_v34 = vsel %vm736_vm1, %v1818_v2, %v1733_v33  ;;  %1832 = vmatmul.bf16.vlgmr.msra.gmra.mxu0 %v1823_v3  ;;  %1845 = vmatmul.bf16.vlgmr.msra.gmra.mxu1 %v1823_v3 }
 0x6d8   :  { %1858 = vmatmul.bf16.vlgmr.msra.gmra.mxu2 %v1823_v3  ;;  %1871 = vmatmul.bf16.vlgmr.msra.gmra.mxu3 %v1823_v3 }
 0x6d9   :  { %1998 = vmatpush.bf16.msra.mxu0 %v3939_v13  ;;  %2011 = vmatpush.bf16.msra.mxu1 %v3941_v14 }
 0x6da   :  { %2024 = vmatpush.bf16.msra.mxu2 %v3943_v15  ;;  %2037 = vmatpush.bf16.msra.mxu3 %v3945_v26 }
 0x6dd   :  { %1999 = vmatpush.bf16.msra.mxu0 %v3950_v49  ;;  %2012 = vmatpush.bf16.msra.mxu1 %v3954_v47 }
 0x6de   :  { %2025 = vmatpush.bf16.msra.mxu2 %v3956_v56  ;;  %2038 = vmatpush.bf16.msra.mxu3 %v3959_v63 }
 0x6e1   :  { %2000 = vmatpush.bf16.msra.mxu0 %v3962_v22  ;;  %2013 = vmatpush.bf16.msra.mxu1 %v3966_v30 }
 0x6e2   :  { %2026 = vmatpush.bf16.msra.mxu2 %v3968_v35  ;;  %2039 = vmatpush.bf16.msra.mxu3 %v3971_v51 }
 0x6e5   :  { %2001 = vmatpush.bf16.msra.mxu0 %v3974_v4  ;;  %2014 = vmatpush.bf16.msra.mxu1 %v3978_v6 }
 0x6e6   :  { %2027 = vmatpush.bf16.msra.mxu2 %v3980_v32  ;;  %2040 = vmatpush.bf16.msra.mxu3 %v3983_v20 }
 0x6e9   :  { %2002 = vmatpush.bf16.msra.mxu0 %v3986_v28  ;;  %2015 = vmatpush.bf16.msra.mxu1 %v3990_v40 }
 0x6ea   :  { %2028 = vmatpush.bf16.msra.mxu2 %v3992_v41  ;;  %2041 = vmatpush.bf16.msra.mxu3 %v3995_v54 }
 0x6ed   :  { %2003 = vmatpush.bf16.msra.mxu0 %v3998_v7  ;;  %2016 = vmatpush.bf16.msra.mxu1 %v4002_v19 }
 0x6ee   :  { %2029 = vmatpush.bf16.msra.mxu2 %v4004_v25  ;;  %2042 = vmatpush.bf16.msra.mxu3 %v4007_v31 }
 0x6f1   :  { %2004 = vmatpush.bf16.msra.mxu0 %v4010_v58  ;;  %2017 = vmatpush.bf16.msra.mxu1 %v4014_v9 }
 0x6f2   :  { %2030 = vmatpush.bf16.msra.mxu2 %v4016_v10  ;;  %2043 = vmatpush.bf16.msra.mxu3 %v4019_v43 }
 0x6f5   :  { %2005 = vmatpush.bf16.msra.mxu0 %v4022_v36  ;;  %2018 = vmatpush.bf16.msra.mxu1 %v4026_v0 }
 0x6f6   :  { %2031 = vmatpush.bf16.msra.mxu2 %v4028_v62  ;;  %2044 = vmatpush.bf16.msra.mxu3 %v4031_v17 }
 0x754   :  { %v1833_v53 = vpop.f32.mrf.mxu0  ;;  %v1846_v1 = vpop.f32.mrf.mxu1 }
 0x755   :  { %v1880_v27 = vrot.slane %v1846_v1, 7 }
 0x757   :  { %v1883_v12 = vsel %vm1706_vm8, %v1833_v53, %v1880_v27 }
 0x75b   :  { %v1859_v37 = vpop.f32.mrf.mxu2  ;;  %v1872_v38 = vpop.f32.mrf.mxu3 }
 0x75c   :  { %v1881_v39 = vrot.slane %v1859_v37, 6  ;;  %v1882_v57 = vrot.slane %v1872_v38, 5  ;;  %v1835_v50 = vpop.f32.mrf.mxu0  ;;  %v1848_v11 = vpop.f32.mrf.mxu1 }
 0x75e   :  { %v1884_v5 = vsel %vm1708_vm9, %v1881_v39, %v1882_v57 }
 0x75f   :  { %v1885_v48 = vsel %vm1710_vm10, %v1883_v12, %v1884_v5  ;;  %v1909_v5 = vld [vmem:[#allocation2 + $0x3] ss:$8 sm:$0xf] }
 0x760   :  { %v1887_v52 = vadd.f32 %v1885_v48, %v1822_v45 }
 0x762   :  { %3169 = vtanh.f32 %v1887_v52 }
 0x763   :  { %v1861_v29 = vpop.f32.mrf.mxu2  ;;  %v1874_v61 = vpop.f32.mrf.mxu3 }
 0x768   :  { %v3170_v16 = vpop.eup %3169 }
 0x769   :  { %v1889_v18 = vmul.f32 0.5, %v3170_v16  ;;  %v1896_v8 = vrot.slane %v3170_v16, 2 }
 0x76b   :  { %v1890_v60 = vadd.f32 0.5, %v1889_v18 }
 0x76d   :  { %v1892_v21 = vrot.slane %v1890_v60, 1  ;;  %v1898_v42 = vmul.f32 %v1896_v8, %v1890_v60  ;;  %v1901_v55 = vrot.slane %v1890_v60, 3 }
 0x76f   :  { %v1894_v23 = vmul.f32 %v1892_v21, %v4151_v24 }
 0x771   :  { %v4197_v46 = vadd.f32 %v1898_v42, %v1894_v23 }
 0x773   :  { %3171 = vtanh.f32 %v4197_v46 }
 0x779   :  { %v3172_v59 = vpop.eup %3171 }
 0x77a   :  { %v1903_v2 = vmul.f32 %v3172_v59, %v1901_v55 }
 0x77c   :  { %v1905_v3 = vperm.slane %v1903_v2, 0  ;;  %v1910_v33 = vpack.c.bf16 %v1903_v2, %v1903_v2 }
 0x77e   :  { %v4203_v53 = vsel %vm811_vm2, %v1905_v3, %v4159_v34  ;;  %1919 = vmatmul.bf16.vlgmr.msrb.gmra.mxu0 %v1910_v33  ;;  %1932 = vmatmul.bf16.vlgmr.msrb.gmra.mxu1 %v1910_v33 }
 0x77f   :  { %1945 = vmatmul.bf16.vlgmr.msrb.gmra.mxu2 %v1910_v33  ;;  %1958 = vmatmul.bf16.vlgmr.msrb.gmra.mxu3 %v1910_v33 }
 0x780   :  { %2085 = vmatpush.bf16.msrb.mxu0 %v3939_v13  ;;  %2098 = vmatpush.bf16.msrb.mxu1 %v3941_v14 }
 0x781   :  { %2111 = vmatpush.bf16.msrb.mxu2 %v3943_v15  ;;  %2124 = vmatpush.bf16.msrb.mxu3 %v3945_v26 }
 0x784   :  { %2086 = vmatpush.bf16.msrb.mxu0 %v3950_v49  ;;  %2099 = vmatpush.bf16.msrb.mxu1 %v3954_v47 }
 0x785   :  { %2112 = vmatpush.bf16.msrb.mxu2 %v3956_v56  ;;  %2125 = vmatpush.bf16.msrb.mxu3 %v3959_v63 }
 0x788   :  { %2087 = vmatpush.bf16.msrb.mxu0 %v3962_v22  ;;  %2100 = vmatpush.bf16.msrb.mxu1 %v3966_v30 }
 0x789   :  { %2113 = vmatpush.bf16.msrb.mxu2 %v3968_v35  ;;  %2126 = vmatpush.bf16.msrb.mxu3 %v3971_v51 }
 0x78c   :  { %2088 = vmatpush.bf16.msrb.mxu0 %v3974_v4  ;;  %2101 = vmatpush.bf16.msrb.mxu1 %v3978_v6 }
 0x78d   :  { %2114 = vmatpush.bf16.msrb.mxu2 %v3980_v32  ;;  %2127 = vmatpush.bf16.msrb.mxu3 %v3983_v20 }
 0x790   :  { %2089 = vmatpush.bf16.msrb.mxu0 %v3986_v28  ;;  %2102 = vmatpush.bf16.msrb.mxu1 %v3990_v40 }
 0x791   :  { %2115 = vmatpush.bf16.msrb.mxu2 %v3992_v41  ;;  %2128 = vmatpush.bf16.msrb.mxu3 %v3995_v54 }
 0x794   :  { %2090 = vmatpush.bf16.msrb.mxu0 %v3998_v7  ;;  %2103 = vmatpush.bf16.msrb.mxu1 %v4002_v19 }
 0x795   :  { %2116 = vmatpush.bf16.msrb.mxu2 %v4004_v25  ;;  %2129 = vmatpush.bf16.msrb.mxu3 %v4007_v31 }
 0x798   :  { %2091 = vmatpush.bf16.msrb.mxu0 %v4010_v58  ;;  %2104 = vmatpush.bf16.msrb.mxu1 %v4014_v9 }
 0x799   :  { %2117 = vmatpush.bf16.msrb.mxu2 %v4016_v10  ;;  %2130 = vmatpush.bf16.msrb.mxu3 %v4019_v43 }
 0x79c   :  { %2092 = vmatpush.bf16.msrb.mxu0 %v4022_v36  ;;  %2105 = vmatpush.bf16.msrb.mxu1 %v4026_v0 }
 0x79d   :  { %2118 = vmatpush.bf16.msrb.mxu2 %v4028_v62  ;;  %2131 = vmatpush.bf16.msrb.mxu3 %v4031_v17 }
 0x7fb   :  { %v1920_v24 = vpop.f32.mrf.mxu0  ;;  %v1933_v34 = vpop.f32.mrf.mxu1 }
 0x7fc   :  { %v1967_v1 = vrot.slane %v1933_v34, 7 }
 0x7fe   :  { %v1970_v11 = vsel %vm1706_vm8, %v1920_v24, %v1967_v1 }
 0x802   :  { %v1946_v27 = vpop.f32.mrf.mxu2  ;;  %v1959_v37 = vpop.f32.mrf.mxu3 }
 0x803   :  { %v1968_v38 = vrot.slane %v1946_v27, 6  ;;  %v1969_v39 = vrot.slane %v1959_v37, 5  ;;  %v1922_v57 = vpop.f32.mrf.mxu0  ;;  %v1935_v50 = vpop.f32.mrf.mxu1 }
 0x805   :  { %v1971_v12 = vsel %vm1708_vm9, %v1968_v38, %v1969_v39 }
 0x806   :  { %v1972_v45 = vsel %vm1710_vm10, %v1970_v11, %v1971_v12  ;;  %v1996_v12 = vld [vmem:[#allocation2 + $0x4] ss:$8 sm:$0xf] }
 0x807   :  { %v1974_v48 = vadd.f32 %v1972_v45, %v1909_v5 }
 0x809   :  { %3173 = vtanh.f32 %v1974_v48 }
 0x80a   :  { %v1948_v52 = vpop.f32.mrf.mxu2  ;;  %v1961_v29 = vpop.f32.mrf.mxu3 }
 0x80f   :  { %v3174_v61 = vpop.eup %3173 }
 0x810   :  { %v1976_v16 = vmul.f32 0.5, %v3174_v61  ;;  %v1983_v60 = vrot.slane %v3174_v61, 2 }
 0x812   :  { %v1977_v18 = vadd.f32 0.5, %v1976_v16 }
 0x814   :  { %v1979_v8 = vrot.slane %v1977_v18, 1  ;;  %v1985_v23 = vmul.f32 %v1983_v60, %v1977_v18  ;;  %v1988_v55 = vrot.slane %v1977_v18, 3 }
 0x816   :  { %v1981_v21 = vmul.f32 %v1979_v8, %v4197_v46 }
 0x818   :  { %v4241_v42 = vadd.f32 %v1985_v23, %v1981_v21 }
 0x81a   :  { %3175 = vtanh.f32 %v4241_v42 }
 0x820   :  { %v3176_v59 = vpop.eup %3175 }
 0x821   :  { %v1990_v2 = vmul.f32 %v3176_v59, %v1988_v55 }
 0x823   :  { %v1992_v3 = vperm.slane %v1990_v2, 0  ;;  %v1997_v33 = vpack.c.bf16 %v1990_v2, %v1990_v2 }
 0x825   :  { %v4247_v24 = vsel %vm886_vm3, %v1992_v3, %v4203_v53  ;;  %2006 = vmatmul.bf16.vlgmr.msra.gmra.mxu0 %v1997_v33  ;;  %2019 = vmatmul.bf16.vlgmr.msra.gmra.mxu1 %v1997_v33 }
 0x826   :  { %2032 = vmatmul.bf16.vlgmr.msra.gmra.mxu2 %v1997_v33  ;;  %2045 = vmatmul.bf16.vlgmr.msra.gmra.mxu3 %v1997_v33 }
 0x827   :  { %2172 = vmatpush.bf16.msra.mxu0 %v3939_v13  ;;  %2185 = vmatpush.bf16.msra.mxu1 %v3941_v14 }
 0x828   :  { %2198 = vmatpush.bf16.msra.mxu2 %v3943_v15  ;;  %2211 = vmatpush.bf16.msra.mxu3 %v3945_v26 }
 0x82b   :  { %2173 = vmatpush.bf16.msra.mxu0 %v3950_v49  ;;  %2186 = vmatpush.bf16.msra.mxu1 %v3954_v47 }
 0x82c   :  { %2199 = vmatpush.bf16.msra.mxu2 %v3956_v56  ;;  %2212 = vmatpush.bf16.msra.mxu3 %v3959_v63 }
 0x82f   :  { %2174 = vmatpush.bf16.msra.mxu0 %v3962_v22  ;;  %2187 = vmatpush.bf16.msra.mxu1 %v3966_v30 }
 0x830   :  { %2200 = vmatpush.bf16.msra.mxu2 %v3968_v35  ;;  %2213 = vmatpush.bf16.msra.mxu3 %v3971_v51 }
 0x833   :  { %2175 = vmatpush.bf16.msra.mxu0 %v3974_v4  ;;  %2188 = vmatpush.bf16.msra.mxu1 %v3978_v6 }
 0x834   :  { %2201 = vmatpush.bf16.msra.mxu2 %v3980_v32  ;;  %2214 = vmatpush.bf16.msra.mxu3 %v3983_v20 }
 0x837   :  { %2176 = vmatpush.bf16.msra.mxu0 %v3986_v28  ;;  %2189 = vmatpush.bf16.msra.mxu1 %v3990_v40 }
 0x838   :  { %2202 = vmatpush.bf16.msra.mxu2 %v3992_v41  ;;  %2215 = vmatpush.bf16.msra.mxu3 %v3995_v54 }
 0x83b   :  { %2177 = vmatpush.bf16.msra.mxu0 %v3998_v7  ;;  %2190 = vmatpush.bf16.msra.mxu1 %v4002_v19 }
 0x83c   :  { %2203 = vmatpush.bf16.msra.mxu2 %v4004_v25  ;;  %2216 = vmatpush.bf16.msra.mxu3 %v4007_v31 }
 0x83f   :  { %2178 = vmatpush.bf16.msra.mxu0 %v4010_v58  ;;  %2191 = vmatpush.bf16.msra.mxu1 %v4014_v9 }
 0x840   :  { %2204 = vmatpush.bf16.msra.mxu2 %v4016_v10  ;;  %2217 = vmatpush.bf16.msra.mxu3 %v4019_v43 }
 0x843   :  { %2179 = vmatpush.bf16.msra.mxu0 %v4022_v36  ;;  %2192 = vmatpush.bf16.msra.mxu1 %v4026_v0 }
 0x844   :  { %2205 = vmatpush.bf16.msra.mxu2 %v4028_v62  ;;  %2218 = vmatpush.bf16.msra.mxu3 %v4031_v17 }
 0x8a2   :  { %v2007_v46 = vpop.f32.mrf.mxu0  ;;  %v2020_v53 = vpop.f32.mrf.mxu1 }
 0x8a3   :  { %v2054_v34 = vrot.slane %v2020_v53, 7 }
 0x8a5   :  { %v2057_v50 = vsel %vm1706_vm8, %v2007_v46, %v2054_v34 }
 0x8a9   :  { %v2033_v1 = vpop.f32.mrf.mxu2  ;;  %v2046_v27 = vpop.f32.mrf.mxu3 }
 0x8aa   :  { %v2055_v37 = vrot.slane %v2033_v1, 6  ;;  %v2056_v38 = vrot.slane %v2046_v27, 5  ;;  %v2009_v39 = vpop.f32.mrf.mxu0  ;;  %v2022_v57 = vpop.f32.mrf.mxu1 }
 0x8ab   :  { %v2170_v57 = vld [vmem:[#allocation2 + $0x6] ss:$8 sm:$0xf] }
 0x8ac   :  { %v2058_v11 = vsel %vm1708_vm9, %v2055_v37, %v2056_v38 }
 0x8ad   :  { %v2059_v5 = vsel %vm1710_vm10, %v2057_v50, %v2058_v11 }
 0x8ae   :  { %v2061_v45 = vadd.f32 %v2059_v5, %v1996_v12 }
 0x8b0   :  { %3177 = vtanh.f32 %v2061_v45 }
 0x8b1   :  { %v2035_v48 = vpop.f32.mrf.mxu2  ;;  %v2048_v52 = vpop.f32.mrf.mxu3 }
 0x8b6   :  { %v3178_v29 = vpop.eup %3177 }
 0x8b7   :  { %v2063_v61 = vmul.f32 0.5, %v3178_v29  ;;  %v2070_v18 = vrot.slane %v3178_v29, 2 }
 0x8b9   :  { %v2064_v16 = vadd.f32 0.5, %v2063_v61 }
 0x8bb   :  { %v2066_v60 = vrot.slane %v2064_v16, 1  ;;  %v2072_v21 = vmul.f32 %v2070_v18, %v2064_v16  ;;  %v2075_v55 = vrot.slane %v2064_v16, 3 }
 0x8bd   :  { %v2068_v8 = vmul.f32 %v2066_v60, %v4241_v42 }
 0x8bf   :  { %v4285_v23 = vadd.f32 %v2072_v21, %v2068_v8 }
 0x8c1   :  { %3179 = vtanh.f32 %v4285_v23 }
 0x8c7   :  { %v3180_v59 = vpop.eup %3179 }
 0x8c8   :  { %v2077_v2 = vmul.f32 %v3180_v59, %v2075_v55 }
 0x8ca   :  { %v2079_v3 = vperm.slane %v2077_v2, 0  ;;  %v2084_v33 = vpack.c.bf16 %v2077_v2, %v2077_v2 }
 0x8cc   :  { %v4291_v46 = vsel %vm961_vm4, %v2079_v3, %v4247_v24  ;;  %2093 = vmatmul.bf16.vlgmr.msrb.gmra.mxu0 %v2084_v33  ;;  %2106 = vmatmul.bf16.vlgmr.msrb.gmra.mxu1 %v2084_v33 }
 0x8cd   :  { %2119 = vmatmul.bf16.vlgmr.msrb.gmra.mxu2 %v2084_v33  ;;  %2132 = vmatmul.bf16.vlgmr.msrb.gmra.mxu3 %v2084_v33 }
 0x8ce   :  { %2259 = vmatpush.bf16.msrb.mxu0 %v3939_v13  ;;  %2272 = vmatpush.bf16.msrb.mxu1 %v3941_v14 }
 0x8cf   :  { %2285 = vmatpush.bf16.msrb.mxu2 %v3943_v15  ;;  %2298 = vmatpush.bf16.msrb.mxu3 %v3945_v26 }
 0x8d2   :  { %2260 = vmatpush.bf16.msrb.mxu0 %v3950_v49  ;;  %2273 = vmatpush.bf16.msrb.mxu1 %v3954_v47 }
 0x8d3   :  { %2286 = vmatpush.bf16.msrb.mxu2 %v3956_v56  ;;  %2299 = vmatpush.bf16.msrb.mxu3 %v3959_v63 }
 0x8d6   :  { %2261 = vmatpush.bf16.msrb.mxu0 %v3962_v22  ;;  %2274 = vmatpush.bf16.msrb.mxu1 %v3966_v30 }
 0x8d7   :  { %2287 = vmatpush.bf16.msrb.mxu2 %v3968_v35  ;;  %2300 = vmatpush.bf16.msrb.mxu3 %v3971_v51  ;;  %v2083_v51 = vld [vmem:[#allocation2 + $0x5] ss:$8 sm:$0xf] }
 0x8da   :  { %2262 = vmatpush.bf16.msrb.mxu0 %v3974_v4  ;;  %2275 = vmatpush.bf16.msrb.mxu1 %v3978_v6 }
 0x8db   :  { %2288 = vmatpush.bf16.msrb.mxu2 %v3980_v32  ;;  %2301 = vmatpush.bf16.msrb.mxu3 %v3983_v20 }
 0x8de   :  { %2263 = vmatpush.bf16.msrb.mxu0 %v3986_v28  ;;  %2276 = vmatpush.bf16.msrb.mxu1 %v3990_v40 }
 0x8df   :  { %2289 = vmatpush.bf16.msrb.mxu2 %v3992_v41  ;;  %2302 = vmatpush.bf16.msrb.mxu3 %v3995_v54 }
 0x8e2   :  { %2264 = vmatpush.bf16.msrb.mxu0 %v3998_v7  ;;  %2277 = vmatpush.bf16.msrb.mxu1 %v4002_v19 }
 0x8e3   :  { %2290 = vmatpush.bf16.msrb.mxu2 %v4004_v25  ;;  %2303 = vmatpush.bf16.msrb.mxu3 %v4007_v31 }
 0x8e6   :  { %2265 = vmatpush.bf16.msrb.mxu0 %v4010_v58  ;;  %2278 = vmatpush.bf16.msrb.mxu1 %v4014_v9 }
 0x8e7   :  { %2291 = vmatpush.bf16.msrb.mxu2 %v4016_v10  ;;  %2304 = vmatpush.bf16.msrb.mxu3 %v4019_v43 }
 0x8ea   :  { %2266 = vmatpush.bf16.msrb.mxu0 %v4022_v36  ;;  %2279 = vmatpush.bf16.msrb.mxu1 %v4026_v0 }
 0x8eb   :  { %2292 = vmatpush.bf16.msrb.mxu2 %v4028_v62  ;;  %2305 = vmatpush.bf16.msrb.mxu3 %v4031_v17 }
 0x949   :  { %v2094_v13 = vpop.f32.mrf.mxu0  ;;  %v2107_v14 = vpop.f32.mrf.mxu1 }
 0x94a   :  { %v2141_v15 = vrot.slane %v2107_v14, 7 }
 0x94c   :  { %v2144_v30 = vsel %vm1706_vm8, %v2094_v13, %v2141_v15 }
 0x950   :  { %v2120_v26 = vpop.f32.mrf.mxu2  ;;  %v2133_v49 = vpop.f32.mrf.mxu3 }
 0x951   :  { %v2142_v47 = vrot.slane %v2120_v26, 6  ;;  %v2143_v56 = vrot.slane %v2133_v49, 5  ;;  %v2096_v63 = vpop.f32.mrf.mxu0  ;;  %v2109_v22 = vpop.f32.mrf.mxu1 }
 0x952   :  { %v2257_v22 = vld [vmem:[#allocation2 + $0x7] ss:$8 sm:$0xf] }
 0x953   :  { %v2145_v35 = vsel %vm1708_vm9, %v2142_v47, %v2143_v56 }
 0x954   :  { %v2146_v4 = vsel %vm1710_vm10, %v2144_v30, %v2145_v35 }
 0x955   :  { %v2148_v6 = vadd.f32 %v2146_v4, %v2083_v51 }
 0x957   :  { %3181 = vtanh.f32 %v2148_v6 }
 0x958   :  { %v2122_v32 = vpop.f32.mrf.mxu2  ;;  %v2135_v20 = vpop.f32.mrf.mxu3 }
 0x95d   :  { %v3182_v28 = vpop.eup %3181 }
 0x95e   :  { %v2150_v40 = vmul.f32 0.5, %v3182_v28  ;;  %v2157_v54 = vrot.slane %v3182_v28, 2 }
 0x960   :  { %v2151_v41 = vadd.f32 0.5, %v2150_v40 }
 0x962   :  { %v2153_v7 = vrot.slane %v2151_v41, 1  ;;  %v2159_v25 = vmul.f32 %v2157_v54, %v2151_v41  ;;  %v2162_v58 = vrot.slane %v2151_v41, 3 }
 0x964   :  { %v2155_v19 = vmul.f32 %v2153_v7, %v4285_v23 }
 0x966   :  { %v2160_v31 = vadd.f32 %v2159_v25, %v2155_v19 }
 0x968   :  { %3183 = vtanh.f32 %v2160_v31 }
 0x96e   :  { %v3184_v9 = vpop.eup %3183 }
 0x96f   :  { %v2164_v10 = vmul.f32 %v3184_v9, %v2162_v58 }
 0x971   :  { %v2166_v43 = vperm.slane %v2164_v10, 0  ;;  %v2171_v36 = vpack.c.bf16 %v2164_v10, %v2164_v10 }
 0x973   :  { %v2168_v0 = vsel %vm1036_vm5, %v2166_v43, %v4291_v46  ;;  %2180 = vmatmul.bf16.vlgmr.msra.gmra.mxu0 %v2171_v36  ;;  %2193 = vmatmul.bf16.vlgmr.msra.gmra.mxu1 %v2171_v36 }
 0x974   :  { %2206 = vmatmul.bf16.vlgmr.msra.gmra.mxu2 %v2171_v36  ;;  %2219 = vmatmul.bf16.vlgmr.msra.gmra.mxu3 %v2171_v36 }
 0x9f0   :  { %v2181_v62 = vpop.f32.mrf.mxu0  ;;  %v2194_v17 = vpop.f32.mrf.mxu1 }
 0x9f1   :  { %v2228_v42 = vrot.slane %v2194_v17, 7 }
 0x9f3   :  { %v2231_v38 = vsel %vm1706_vm8, %v2181_v62, %v2228_v42 }
 0x9f7   :  { %v2207_v24 = vpop.f32.mrf.mxu2  ;;  %v2220_v53 = vpop.f32.mrf.mxu3 }
 0x9f8   :  { %v2229_v34 = vrot.slane %v2207_v24, 6  ;;  %v2230_v1 = vrot.slane %v2220_v53, 5  ;;  %v2183_v27 = vpop.f32.mrf.mxu0  ;;  %v2196_v37 = vpop.f32.mrf.mxu1 }
 0x9fa   :  { %v2232_v39 = vsel %vm1708_vm9, %v2229_v34, %v2230_v1 }
 0x9fb   :  { %v2233_v50 = vsel %vm1710_vm10, %v2231_v38, %v2232_v39 }
 0x9fc   :  { %v2235_v11 = vadd.f32 %v2233_v50, %v2170_v57 }
 0x9fe   :  { %3185 = vtanh.f32 %v2235_v11 }
 0x9ff   :  { %v2209_v12 = vpop.f32.mrf.mxu2  ;;  %v2222_v5 = vpop.f32.mrf.mxu3 }
 0xa04   :  { %v3186_v45 = vpop.eup %3185 }
 0xa05   :  { %v2237_v48 = vmul.f32 0.5, %v3186_v45  ;;  %v2244_v29 = vrot.slane %v3186_v45, 2 }
 0xa07   :  { %v2238_v52 = vadd.f32 0.5, %v2237_v48 }
 0xa09   :  { %v2240_v61 = vrot.slane %v2238_v52, 1  ;;  %v2246_v18 = vmul.f32 %v2244_v29, %v2238_v52  ;;  %v2249_v8 = vrot.slane %v2238_v52, 3 }
 0xa0b   :  { %v2242_v16 = vmul.f32 %v2240_v61, %v2160_v31 }
 0xa0d   :  { %v2247_v60 = vadd.f32 %v2246_v18, %v2242_v16 }
 0xa0f   :  { %3187 = vtanh.f32 %v2247_v60 }
 0xa15   :  { %v3188_v21 = vpop.eup %3187 }
 0xa16   :  { %v2251_v23 = vmul.f32 %v3188_v21, %v2249_v8 }
 0xa18   :  { %v2253_v55 = vperm.slane %v2251_v23, 0  ;;  %v2258_v59 = vpack.c.bf16 %v2251_v23, %v2251_v23 }
 0xa1a   :  { %v2255_v2 = vsel %vm1111_vm6, %v2253_v55, %v2168_v0  ;;  %2267 = vmatmul.bf16.vlgmr.msrb.gmra.mxu0 %v2258_v59  ;;  %2280 = vmatmul.bf16.vlgmr.msrb.gmra.mxu1 %v2258_v59 }
 0xa1b   :  { %2293 = vmatmul.bf16.vlgmr.msrb.gmra.mxu2 %v2258_v59  ;;  %2306 = vmatmul.bf16.vlgmr.msrb.gmra.mxu3 %v2258_v59 }
 0xa97   :  { %v2268_v3 = vpop.f32.mrf.mxu0  ;;  %v2281_v33 = vpop.f32.mrf.mxu1 }
 0xa98   :  { %v2315_v46 = vrot.slane %v2281_v33, 7 }
 0xa9a   :  { %v2318_v56 = vsel %vm1706_vm8, %v2268_v3, %v2315_v46 }
 0xa9e   :  { %v2294_v13 = vpop.f32.mrf.mxu2  ;;  %v2307_v14 = vpop.f32.mrf.mxu3 }
 0xa9f   :  { %v2316_v15 = vrot.slane %v2294_v13, 6  ;;  %v2317_v26 = vrot.slane %v2307_v14, 5  ;;  %v2270_v49 = vpop.f32.mrf.mxu0  ;;  %v2283_v47 = vpop.f32.mrf.mxu1 }
 0xaa1   :  { %v2319_v63 = vsel %vm1708_vm9, %v2316_v15, %v2317_v26 }
 0xaa2   :  { %v2320_v30 = vsel %vm1710_vm10, %v2318_v56, %v2319_v63 }
 0xaa3   :  { %v2322_v35 = vadd.f32 %v2320_v30, %v2257_v22 }
 0xaa5   :  { %3189 = vtanh.f32 %v2322_v35 }
 0xaa6   :  { %v2296_v51 = vpop.f32.mrf.mxu2  ;;  %v2309_v4 = vpop.f32.mrf.mxu3 }
 0xaab   :  { %v3190_v6 = vpop.eup %3189 }
 0xaac   :  { %v2324_v32 = vmul.f32 0.5, %v3190_v6  ;;  %v2331_v40 = vrot.slane %v3190_v6, 2 }
 0xaae   :  { %v2325_v20 = vadd.f32 0.5, %v2324_v32 }
 0xab0   :  { %v2327_v28 = vrot.slane %v2325_v20, 1  ;;  %v2333_v54 = vmul.f32 %v2331_v40, %v2325_v20  ;;  %v2336_v19 = vrot.slane %v2325_v20, 3 }
 0xab2   :  { %v2329_v41 = vmul.f32 %v2327_v28, %v2247_v60 }
 0xab4   :  { %v2334_v7 = vadd.f32 %v2333_v54, %v2329_v41 }
 0xab6   :  { %3191 = vtanh.f32 %v2334_v7 }
 0xabc   :  { %v3192_v25 = vpop.eup %3191 }
 0xabd   :  { %v2338_v31 = vmul.f32 %v3192_v25, %v2336_v19 }
 0xabf   :  { %v2340_v58 = vperm.slane %v2338_v31, 0 }
 0xac1   :  { %v2342_v9 = vsel %vm1186_vm7, %v2340_v58, %v2255_v2 }
 0xac2   :  { %3420 = dma.done.wait [#allocation6 + $0x2], 2048 }
 0xac3   :  { %3421 = vsyncadd [#allocation6 + $0x2], 4294965248  ;;  %v2361_v10 = vld [vmem:[#allocation5 + $0x78] sm:$0xff]  ;;  %v2360_v43 = vld [vmem:[#allocation5 + $0x70] sm:$0xff]  ;;  %s3435_s1 = smov [#allocation16]   ;;  %s2394_s27 = sshll.u32 %s4357_s9, 4  ;;  %s2395_s27 = int_to_ptr.hbm [resolvable:$true] %s2394_s27 }
 0xac4   :  { %2366 = vmatpush.msra.mxu0 %v2361_v10  ;;  %v2359_v36 = vld [vmem:[#allocation5 + $0x68] sm:$0xff]  ;;  %v2358_v0 = vld [vmem:[#allocation5 + $0x60] sm:$0xff]  ;;  %v2357_v62 = vld [vmem:[#allocation5 + $0x58] sm:$0xff]  ;;  %s2392_s24 = sshll.u32 %s3435_s1, 4  ;;  %s2393_s24 = int_to_ptr.vmem [resolvable:$true] %s2392_s24 }
 0xac5   :  { %v2356_v17 = vld [vmem:[#allocation5 + $0x50] sm:$0xff]  ;;  %v2355_v42 = vld [vmem:[#allocation5 + $0x48] sm:$0xff]  ;;  %v2354_v24 = vld [vmem:[#allocation5 + $0x40] sm:$0xff] }
 0xac6   :  { %2367 = vmatpush.msra.mxu0 %v2360_v43  ;;  %v2353_v53 = vld [vmem:[#allocation5 + $0x38] sm:$0xff]  ;;  %v2352_v44 = vld [vmem:[#allocation5 + $0x30] sm:$0xff]  ;;  %v2351_v34 = vld [vmem:[#allocation5 + $0x28] sm:$0xff] }
 0xac7   :  { %v2350_v1 = vld [vmem:[#allocation5 + $0x20] sm:$0xff]  ;;  %v2349_v27 = vld [vmem:[#allocation5 + $0x18] sm:$0xff]  ;;  %v2348_v37 = vld [vmem:[#allocation5 + $0x10] sm:$0xff] }
 0xac8   :  { %2368 = vmatpush.msra.mxu0 %v2359_v36  ;;  %v2347_v38 = vld [vmem:[#allocation5 + $0x8] sm:$0xff]  ;;  %v2346_v39 = vld [vmem:[#allocation5] sm:$0xff] }
 0xac9   :  { %v3193_v57 = vld [vmem:[%s4353_s5] ss:$0 sm:$0xff] }
 0xaca   :  { %2369 = vmatpush.msra.mxu0 %v2358_v0 }
 0xacc   :  { %2370 = vmatpush.msra.mxu0 %v2357_v62 }
 0xace   :  { %2371 = vmatpush.msra.mxu0 %v2356_v17 }
 0xad0   :  { %2372 = vmatpush.msra.mxu0 %v2355_v42 }
 0xad2   :  { %2373 = vmatpush.msra.mxu0 %v2354_v24 }
 0xad4   :  { %2374 = vmatpush.msra.mxu0 %v2353_v53 }
 0xad6   :  { %2375 = vmatpush.msra.mxu0 %v2352_v44 }
 0xad8   :  { %2376 = vmatpush.msra.mxu0 %v2351_v34 }
 0xada   :  { %2377 = vmatpush.msra.mxu0 %v2350_v1 }
 0xadc   :  { %2378 = vmatpush.msra.mxu0 %v2349_v27 }
 0xade   :  { %2379 = vmatpush.msra.mxu0 %v2348_v37 }
 0xae0   :  { %2380 = vmatpush.msra.mxu0 %v2347_v38 }
 0xae2   :  { %2381 = vmatpush.msra.mxu0 %v2346_v39 }
 0xae3   :  { %2382 = vmatmul.f32.vlgmr.msra.gmra.mxu0 %v2342_v9 }
 0xb60   :  { %v2383_v50 = vpop.f32.mrf.mxu0 }
 0xb61   :  { %v2384_v11 = vadd.f32 %v3193_v57, %v2383_v50 }
 0xb63   :  { %2386 = vst [vmem:[#allocation16] sm:$0xff] %v2384_v11 }
 0xb64   :  { %2397 = dma.vmem_to_hbm [thread:$0]  %s2393_s24, 128, %s2395_s27, [#allocation9]  }
 0xb65   :  { %3422 = dma.done.wait [#allocation9], 128  }
 0xb66   :  { %3423 = vsyncadd [#allocation9], 4294967168 }
 0xb67   :  { %2402 = vsyncpa [#allocation8], 1 }
 0xb68   :  { %2403 = vsyncpa [#allocation11], 1 }
 0xb69   :  { %2404 = vsyncpa [#allocation14], 1 }
 0xb6a   :  { %2405 = vsyncpa [#allocation9], 1 }
 0xb6b   :  { %2406 = vsyncmov [#allocation6] }
 0xb6e   :  { %s2407_s5 = vpop.sfrf %2406 }
 0xb6f   :  { %p2938_p0 = scmp.ne.s32.totalorder %s2407_s5, 0 }
 0xb71   :  { %2411 = shalt.err (%p2938_p0)  }
 0xb72   :  { %2413 = vsyncmov [#allocation6 + $0x1] }
 0xb75   :  { %s2414_s3 = vpop.sfrf %2413 }
 0xb76   :  { %p2939_p1 = scmp.ne.s32.totalorder %s2414_s3, 0 }
 0xb78   :  { %2418 = shalt.err (%p2939_p1)  }
 0xb79   :  { %2420 = vsyncmov [#allocation6 + $0x2] }
 0xb7c   :  { %s2421_s9 = vpop.sfrf %2420 }
 0xb7d   :  { %p2940_p2 = scmp.ne.s32.totalorder %s2421_s9, 0 }
 0xb7f   :  { %2425 = shalt.err (%p2940_p2)  }

</bundles_post_ra>
